<compile_context>
chip_gen: v7x
topology: tpu7x:2x2x1
jax: 0.10.0
libtpu: 0.0.40
codegen_flags: <defaults>
</compile_context>

<pallas_src>
import functools

import jax
import jax.numpy as jnp
from jax import lax
from jax.experimental import pallas as pl
from jax.experimental.pallas import tpu as pltpu

BN_EPS = 1e-5
C3_CHUNK = 256                         # conv3 output-column chunk (lane aligned)


def tnet_stream_kernel(B, N, TN, k, needs_mask,
                       x_ref, w1_ref, a1_ref, c1_ref,
                       w2_ref, b2_ref, g2_ref, be2_ref, w3_ref,
                       sh2_ref, gram_ref, ymx_ref, ymn_ref,
                       s2_ref, q2_ref):
    p = pl.program_id(0)               # 0: conv2-stats sweep, 1: conv3 sweep (+pool)
    b = pl.program_id(1)               # batch element
    t = pl.program_id(2)               # row tile inside the batch element
    inv_rows = 1.0 / float(B * N)
    n_chunks = w3_ref.shape[1] // C3_CHUNK

    if needs_mask:                     # static flag: only emitted when N % TN != 0
        row = t * TN + lax.broadcasted_iota(jnp.int32, (TN, 1), 0)
        mask = row < N
    else:
        mask = None

    @pl.when(jnp.logical_and(p == 0, jnp.logical_and(b == 0, t == 0)))
    def _init_stats():
        s2_ref[...] = jnp.zeros_like(s2_ref)
        q2_ref[...] = jnp.zeros_like(q2_ref)

    def z2_tile():
        # conv1 + BN1 (precomputed affine; conv1 bias folded into c1) + ReLU + conv2
        z1 = jnp.dot(x_ref[0], w1_ref[...], preferred_element_type=jnp.float32)
        h1 = jnp.maximum(z1 * a1_ref[...] + c1_ref[...], 0.0)               # (TN, 64)
        return jnp.dot(h1.astype(jnp.bfloat16), w2_ref[...],
                       preferred_element_type=jnp.float32) + b2_ref[...]    # (TN, 128)

    # ---- pass 0: global batch statistics of z2 = conv2(relu(bn1(conv1 x))) ---------
    @pl.when(p == 0)
    def _pass0():
        z2 = z2_tile()
        if needs_mask:
            z2 = jnp.where(mask, z2, 0.0)
        s2_ref[...] += jnp.sum(z2, axis=0, keepdims=True)
        q2_ref[...] += jnp.sum(z2 * z2, axis=0, keepdims=True)

    # ---- pass 1: BN2+ReLU, h2 stats (sum + Gram), chunked conv3 max/min pool -------
    @pl.when(p == 1)
    def _pass1():
        @pl.when(jnp.logical_and(b == 0, t == 0))
        def _init_h2_stats():
            sh2_ref[...] = jnp.zeros_like(sh2_ref)
            gram_ref[...] = jnp.zeros_like(gram_ref)

        @pl.when(t == 0)
        def _init_pool():
            ymx_ref[...] = jnp.full(ymx_ref.shape, -jnp.inf, ymx_ref.dtype)
            ymn_ref[...] = jnp.full(ymn_ref.shape, jnp.inf, ymn_ref.dtype)

        # BN2 affine from the globally accumulated stats (pass 0 has fully completed)
        mean2 = s2_ref[...] * inv_rows
        var2 = jnp.maximum(q2_ref[...] * inv_rows - mean2 * mean2, 0.0)
        g2p = g2_ref[...] * lax.rsqrt(var2 + BN_EPS)
        b2p = be2_ref[...] - mean2 * g2p

        h2 = jnp.maximum(z2_tile() * g2p + b2p, 0.0)                        # (TN, 128)
        if needs_mask:
            h2 = jnp.where(mask, h2, 0.0)
        h2b = h2.astype(jnp.bfloat16)

        # conv3 batch stats derive from Σh2 and Σh2ᵀh2 in the wrapper (no (TN,1024)
        # sum/sumsq here) -- one extra small MXU matmul instead of ~1.5K VPU ops.
        sh2_ref[...] += jnp.sum(h2b.astype(jnp.float32), axis=0, keepdims=True)
        gram_ref[...] += lax.dot_general(h2b, h2b, (((0,), (0,)), ((), ())),
                                         preferred_element_type=jnp.float32)

        # conv3 (bias added in the wrapper), column-chunked; only max/min survive.
        mx_parts, mn_parts = [], []
        for ci in range(n_chunks):
            y = jnp.dot(h2b, w3_ref[:, ci * C3_CHUNK:(ci + 1) * C3_CHUNK],
                        preferred_element_type=jnp.float32)                 # (TN, 256)
            if needs_mask:
                mx_parts.append(jnp.max(jnp.where(mask, y, -jnp.inf), axis=0, keepdims=True))
                mn_parts.append(jnp.min(jnp.where(mask, y, jnp.inf), axis=0, keepdims=True))
            else:
                mx_parts.append(jnp.max(y, axis=0, keepdims=True))
                mn_parts.append(jnp.min(y, axis=0, keepdims=True))
        tile_mx = jnp.concatenate(mx_parts, axis=-1)                        # (1, 1024)
        tile_mn = jnp.concatenate(mn_parts, axis=-1)
        ymx_ref[0] = jnp.maximum(ymx_ref[0], tile_mx)
        ymn_ref[0] = jnp.minimum(ymn_ref[0], tile_mn)


def make_params(key, k):
    """Deterministic PyTorch-like init. Weights stored transposed: (cin, cout), f32."""
    layer_dims = [(k, 64), (64, 128), (128, 1024), (1024, 512), (512, 256), (256, k * k)]
    keys = jax.random.split(key, 2 * len(layer_dims))
    ws, bs = [], []
    for i, (cin, cout) in enumerate(layer_dims):
        bound = cin ** -0.5
        ws.append(jax.random.uniform(keys[2 * i], (cin, cout), jnp.float32, -bound, bound))
        bs.append(jax.random.uniform(keys[2 * i + 1], (1, cout), jnp.float32, -bound, bound))
    bn_channels = (64, 128, 1024, 512, 256)
    gammas = [jnp.ones((1, c), jnp.float32) for c in bn_channels]
    betas = [jnp.zeros((1, c), jnp.float32) for c in bn_channels]
    return ws, bs, gammas, betas


def _round_up(v, m):
    return ((v + m - 1) // m) * m


def _physical_vmem_bytes():
    try:
        return int(pltpu.get_tpu_info().vmem_capacity_bytes)
    except Exception:
        return 64 * 1024 * 1024        # assume the smallest generation (v7x per-TC)


def _vmem_limit_bytes(TN, k, phys_vmem):
    consts = 2 * 2 * (k * 64 + 64 * 128 + 128 * 1024) + 2 * 4 * (4 * 64 + 4 * 128)
    x_tiles = 2 * 2 * TN * k                                    # bf16, double-buffered
    inter = 4 * TN * (64 + 128) + 2 * 2 * TN * 128 + 2 * 4 * TN * C3_CHUNK
    outs = 2 * 4 * (128 + 128 * 128 + 2 * 1024)
    est = consts + x_tiles + inter + outs + 4 * 2 * 128
    hi = int(0.85 * phys_vmem)                                  # never exceed physical
    return int(min(hi, max(32 * 1024 * 1024, 3 * est)))


def tnet_forward(x, params, k, *, row_tile=None):
    """x: (B, k, N) float32 (PyTorch Conv1d layout). Returns (B, k, k) float32."""
    ws, bs, gammas, betas = params
    B, C, N = x.shape
    assert C == k
    R = B * N
    prec = lax.Precision.HIGHEST

    phys_vmem = _physical_vmem_bytes()
    if row_tile is None:
        # bigger tiles amortize the ~0.35us per-step overhead; cap lower on 64 MiB parts
        row_tile = 2048 if phys_vmem >= (100 << 20) else 1024
    TN = _round_up(min(row_tile, N), 8)
    N_pad = _round_up(N, TN)
    NT = N_pad // TN
    needs_mask = (N_pad != N)

    xr = jnp.transpose(x, (0, 2, 1)).astype(jnp.bfloat16)          # (B, N, k) rows

    # ---- BN1 (training-mode) batch stats in closed form: no data sweep needed ------
    xf = xr.astype(jnp.float32)
    w1f = ws[0].astype(jnp.bfloat16).astype(jnp.float32)           # MXU-rounded W1
    b1 = bs[0][0]
    sx = jnp.sum(xf, axis=(0, 1))                                  # (k,)
    gxx = jnp.einsum('bnk,bnl->kl', xf, xf, precision=prec)        # (k, k)
    sw1 = jnp.dot(sx, w1f, precision=prec)                         # (64,)
    s1 = sw1 + R * b1
    q1 = jnp.einsum('kc,kl,lc->c', w1f, gxx, w1f, precision=prec) + 2.0 * b1 * sw1 + R * b1 * b1
    mean1 = s1 / R
    var1 = jnp.maximum(q1 / R - mean1 * mean1, 0.0)
    g1p = gammas[0][0] * lax.rsqrt(var1 + BN_EPS)
    a1 = g1p.reshape(1, 64)                                        # BN1 scale
    c1 = (b1 * g1p + betas[0][0] - mean1 * g1p).reshape(1, 64)     # conv1 bias folded in

    if needs_mask:
        xr = jnp.pad(xr, ((0, 0), (0, N_pad - N), (0, 0)))

    w1 = ws[0].astype(jnp.bfloat16)
    w2 = ws[1].astype(jnp.bfloat16)
    w3 = ws[2].astype(jnp.bfloat16)
    args = [xr, w1, a1, c1, w2, bs[1], gammas[1], betas[1], w3]

    def _const_spec(arr):
        zeros = (0,) * arr.ndim
        return pl.BlockSpec(arr.shape, lambda p, b, t, _z=zeros: _z)

    in_specs = [pl.BlockSpec((1, TN, k), lambda p, b, t: (b, t, 0))]
    in_specs += [_const_spec(a) for a in args[1:]]

    out_shape = (
        jax.ShapeDtypeStruct((1, 128), jnp.float32),               # Σ h2
        jax.ShapeDtypeStruct((128, 128), jnp.float32),             # Σ h2ᵀh2
        jax.ShapeDtypeStruct((B, 1, 1024), jnp.float32),           # per-batch max(h2·W3)
        jax.ShapeDtypeStruct((B, 1, 1024), jnp.float32),           # per-batch min(h2·W3)
    )
    out_specs = (
        pl.BlockSpec((1, 128), lambda p, b, t: (0, 0)),
        pl.BlockSpec((128, 128), lambda p, b, t: (0, 0)),
        # b*p keeps a single resident block during pass 0 (no spurious write-backs)
        pl.BlockSpec((1, 1, 1024), lambda p, b, t: (b * p, 0, 0)),
        pl.BlockSpec((1, 1, 1024), lambda p, b, t: (b * p, 0, 0)),
    )

    kernel = functools.partial(tnet_stream_kernel, B, N, TN, k, needs_mask)
    sh2, gram, ymx, ymn = pl.pallas_call(
        kernel,
        out_shape=out_shape,
        grid_spec=pltpu.PrefetchScalarGridSpec(
            num_scalar_prefetch=0,
            grid=(2, B, NT),
            in_specs=in_specs,
            out_specs=out_specs,
            scratch_shapes=[pltpu.VMEM((1, 128), jnp.float32),     # Σ z2
                            pltpu.VMEM((1, 128), jnp.float32)]),   # Σ z2²
        compiler_params=pltpu.CompilerParams(
            # BN2 stats, the h2 sum/Gram and the pooled max/min accumulate into shared
            # VMEM on every grid step -> all axes must stay sequential.
            dimension_semantics=("arbitrary", "arbitrary", "arbitrary"),
            vmem_limit_bytes=_vmem_limit_bytes(TN, k, phys_vmem)),
    )(*args)

    ymx = ymx.reshape(B, 1024)
    ymn = ymn.reshape(B, 1024)

    # ---- conv3 batch stats derived from Σh2 / Gram(h2); BN3 + max-pool identity ----
    w3f = ws[2].astype(jnp.bfloat16).astype(jnp.float32)
    b3 = bs[2]                                                     # (1, 1024)
    sw3 = jnp.dot(sh2, w3f, precision=prec)                        # (1, 1024)
    s3 = sw3 + R * b3
    q3 = (jnp.einsum('kc,kl,lc->c', w3f, gram, w3f, precision=prec)[None, :]
          + 2.0 * b3 * sw3 + R * b3 * b3)
    mean3 = s3 / R
    var3 = jnp.maximum(q3 / R - mean3 * mean3, 0.0)
    g3p = gammas[2] * lax.rsqrt(var3 + BN_EPS)
    b3p = betas[2] - mean3 * g3p
    # max_n ReLU(g*z+b) == ReLU(g*(g>=0 ? max_n z : min_n z) + b),  z = h2·W3 + b3
    picked = jnp.where(g3p >= 0.0, ymx + b3, ymn + b3)             # (B, 1024)
    pooled = jnp.maximum(picked * g3p + b3p, 0.0)

    # ---- tiny FC head (B rows): plain JAX, keeps fc weights out of kernel VMEM -----
    def mm(a, w, bias):
        return jnp.dot(a.astype(jnp.bfloat16), w.astype(jnp.bfloat16),
                       preferred_element_type=jnp.float32) + bias

    def bn_relu(z, g, be):
        mean = jnp.mean(z, axis=0, keepdims=True)
        var = jnp.maximum(jnp.mean(z * z, axis=0, keepdims=True) - mean * mean, 0.0)
        gp = g * lax.rsqrt(var + BN_EPS)
        return jnp.maximum(z * gp + (be - mean * gp), 0.0)

    f = bn_relu(mm(pooled, ws[3], bs[3]), gammas[3], betas[3])     # (B, 512)
    f = bn_relu(mm(f, ws[4], bs[4]), gammas[4], betas[4])          # (B, 256)
    out = mm(f, ws[5], bs[5]) + jnp.eye(k, dtype=jnp.float32).reshape(1, k * k)
    return out.reshape(B, k, k)


def tnet_reference(x, params, k):
    """Pure-JAX reference with the same bf16-operand / f32-accumulate matmuls."""
    ws, bs, gammas, betas = params
    B, _, N = x.shape

    def mm(a, w, bias):
        return jnp.dot(a.astype(jnp.bfloat16), w.astype(jnp.bfloat16),
                       preferred_element_type=jnp.float32) + bias

    def bn_relu(z, g, be):
        mean = jnp.mean(z, axis=0, keepdims=True)
        var = jnp.mean(jnp.square(z - mean), axis=0, keepdims=True)
        return jnp.maximum((z - mean) * lax.rsqrt(var + BN_EPS) * g + be, 0.0)

    h = jnp.transpose(x, (0, 2, 1)).reshape(B * N, k)
    h = bn_relu(mm(h, ws[0], bs[0]), gammas[0], betas[0])
    h = bn_relu(mm(h, ws[1], bs[1]), gammas[1], betas[1])
    h = bn_relu(mm(h, ws[2], bs[2]), gammas[2], betas[2])
    pooled = jnp.max(h.reshape(B, N, 1024), axis=1)
    f = bn_relu(mm(pooled, ws[3], bs[3]), gammas[3], betas[3])
    f = bn_relu(mm(f, ws[4], bs[4]), gammas[4], betas[4])
    f = mm(f, ws[5], bs[5]) + jnp.eye(k, dtype=jnp.float32).reshape(1, k * k)
    return f.reshape(B, k, k)


if __name__ == "__main__":
    B, k, N = 2, 16, 256               # small demo shapes; row_tile=128 -> 2 tiles/batch
    key = jax.random.PRNGKey(0)
    kx, kp = jax.random.split(key)
    x = jax.random.normal(kx, (B, k, N), dtype=jnp.float32)
    params = make_params(kp, k)

    out = tnet_forward(x, params, k, row_tile=128)
    out = jax.block_until_ready(out)
    assert out.shape == (B, k, k)
    assert out.dtype == jnp.float32

    ref = tnet_reference(x, params, k)
    err = float(jnp.max(jnp.abs(out - ref)))
    assert err < 5e-2, f"kernel/reference mismatch: max abs err = {err}"
    print("KERNEL_OK")
</pallas_src>

<mosaic_0001>
module attributes {stable_mosaic.version = 11 : i64} {
  func.func @tnet_stream_kernel(%arg0: i32, %arg1: i32, %arg2: i32, %arg3: memref<1x128x16xbf16, #tpu.memory_space<vmem>>, %arg4: memref<16x64xbf16, #tpu.memory_space<vmem>>, %arg5: memref<1x64xf32, #tpu.memory_space<vmem>>, %arg6: memref<1x64xf32, #tpu.memory_space<vmem>>, %arg7: memref<64x128xbf16, #tpu.memory_space<vmem>>, %arg8: memref<1x128xf32, #tpu.memory_space<vmem>>, %arg9: memref<1x128xf32, #tpu.memory_space<vmem>>, %arg10: memref<1x128xf32, #tpu.memory_space<vmem>>, %arg11: memref<128x1024xbf16, #tpu.memory_space<vmem>>, %arg12: memref<1x128xf32, #tpu.memory_space<vmem>>, %arg13: memref<128x128xf32, #tpu.memory_space<vmem>>, %arg14: memref<1x1x1024xf32, #tpu.memory_space<vmem>>, %arg15: memref<1x1x1024xf32, #tpu.memory_space<vmem>>, %arg16: memref<1x128xf32, #tpu.memory_space<vmem>>, %arg17: memref<1x128xf32, #tpu.memory_space<vmem>>) attributes {dimension_semantics = [#tpu.dimension_semantics<arbitrary>, #tpu.dimension_semantics<arbitrary>, #tpu.dimension_semantics<arbitrary>], iteration_bounds = array<i64: 2, 2, 2>, scalar_prefetch = 0 : i64, scratch_operands = 2 : i64, tpu.core_type = #tpu.core_type<tc>, window_params = [{transform_indices = @transform_0, window_bounds = array<i64: 1, 128, 16>}, {pipeline_mode = #tpu.pipeline_mode<synchronous>, transform_indices = @transform_1, window_bounds = array<i64: 16, 64>}, {pipeline_mode = #tpu.pipeline_mode<synchronous>, transform_indices = @transform_2, window_bounds = array<i64: 1, 64>}, {pipeline_mode = #tpu.pipeline_mode<synchronous>, transform_indices = @transform_3, window_bounds = array<i64: 1, 64>}, {pipeline_mode = #tpu.pipeline_mode<synchronous>, transform_indices = @transform_4, window_bounds = array<i64: 64, 128>}, {pipeline_mode = #tpu.pipeline_mode<synchronous>, transform_indices = @transform_5, window_bounds = array<i64: 1, 128>}, {pipeline_mode = #tpu.pipeline_mode<synchronous>, transform_indices = @transform_6, window_bounds = array<i64: 1, 128>}, {pipeline_mode = #tpu.pipeline_mode<synchronous>, transform_indices = @transform_7, window_bounds = array<i64: 1, 128>}, {pipeline_mode = #tpu.pipeline_mode<synchronous>, transform_indices = @transform_8, window_bounds = array<i64: 128, 1024>}, {pipeline_mode = #tpu.pipeline_mode<synchronous>, transform_indices = @transform_9, window_bounds = array<i64: 1, 128>}, {pipeline_mode = #tpu.pipeline_mode<synchronous>, transform_indices = @transform_10, window_bounds = array<i64: 128, 128>}, {transform_indices = @transform_11, window_bounds = array<i64: 1, 1, 1024>}, {transform_indices = @transform_12, window_bounds = array<i64: 1, 1, 1024>}]} {
    %c0_i32 = arith.constant 0 : i32
    %0 = arith.cmpi eq, %arg0, %c0_i32 : i32
    %c0_i32_0 = arith.constant 0 : i32
    %1 = arith.cmpi eq, %arg1, %c0_i32_0 : i32
    %c0_i32_1 = arith.constant 0 : i32
    %2 = arith.cmpi eq, %arg2, %c0_i32_1 : i32
    %3 = arith.andi %1, %2 : i1
    %4 = arith.andi %0, %3 : i1
    %5 = arith.extui %4 : i1 to i32
    %c0_i32_2 = arith.constant 0 : i32
    %6 = arith.cmpi ne, %5, %c0_i32_2 : i32
    scf.if %6 {
      %cst = arith.constant 0.000000e+00 : f32
      %13 = vector.broadcast %cst : f32 to vector<1x128xf32>
      %c0 = arith.constant 0 : index
      %c0_6 = arith.constant 0 : index
      %14 = vector.load %arg16[%c0, %c0_6] : memref<1x128xf32, #tpu.memory_space<vmem>>, vector<1x128xf32>
      tpu.vector_store %arg16[%c0, %c0_6], %13 {strides = array<i32>} : memref<1x128xf32, #tpu.memory_space<vmem>>, vector<1x128xf32>,
      %cst_7 = arith.constant 0.000000e+00 : f32
      %15 = vector.broadcast %cst_7 : f32 to vector<1x128xf32>
      %c0_8 = arith.constant 0 : index
      %c0_9 = arith.constant 0 : index
      %16 = vector.load %arg17[%c0_8, %c0_9] : memref<1x128xf32, #tpu.memory_space<vmem>>, vector<1x128xf32>
      tpu.vector_store %arg17[%c0_8, %c0_9], %15 {strides = array<i32>} : memref<1x128xf32, #tpu.memory_space<vmem>>, vector<1x128xf32>,
    } else {
    }
    %c0_i32_3 = arith.constant 0 : i32
    %7 = arith.cmpi eq, %arg0, %c0_i32_3 : i32
    %8 = arith.extui %7 : i1 to i32
    %c0_i32_4 = arith.constant 0 : i32
    %9 = arith.cmpi ne, %8, %c0_i32_4 : i32
    scf.if %9 {
      %c0 = arith.constant 0 : index
      %c0_6 = arith.constant 0 : index
      %c0_7 = arith.constant 0 : index
      %13 = vector.load %arg3[%c0, %c0_6, %c0_7] : memref<1x128x16xbf16, #tpu.memory_space<vmem>>, vector<1x128x16xbf16>
      %14 = vector.shape_cast %13 : vector<1x128x16xbf16> to vector<128x16xbf16>
      %c0_8 = arith.constant 0 : index
      %c0_9 = arith.constant 0 : index
      %15 = vector.load %arg4[%c0_8, %c0_9] : memref<16x64xbf16, #tpu.memory_space<vmem>>, vector<16x64xbf16>
      %cst = arith.constant dense<0.000000e+00> : vector<128x64xf32>
      %16 = tpu.matmul %14, %15, %cst {dimension_numbers = #tpu.dot_dimension_numbers<[1], [0], [0], [1], [0, 0, 1, 1], [], []>} : vector<128x16xbf16>, vector<16x64xbf16>, vector<128x64xf32> -> vector<128x64xf32>
      %c0_10 = arith.constant 0 : index
      %c0_11 = arith.constant 0 : index
      %17 = vector.load %arg5[%c0_10, %c0_11] : memref<1x64xf32, #tpu.memory_space<vmem>>, vector<1x64xf32>
      %18 = vector.broadcast %17 : vector<1x64xf32> to vector<128x64xf32>
      %19 = arith.mulf %16, %18 : vector<128x64xf32>
      %c0_12 = arith.constant 0 : index
      %c0_13 = arith.constant 0 : index
      %20 = vector.load %arg6[%c0_12, %c0_13] : memref<1x64xf32, #tpu.memory_space<vmem>>, vector<1x64xf32>
      %21 = vector.broadcast %20 : vector<1x64xf32> to vector<128x64xf32>
      %22 = arith.addf %19, %21 : vector<128x64xf32>
      %cst_14 = arith.constant 0.000000e+00 : f32
      %23 = vector.broadcast %cst_14 : f32 to vector<128x64xf32>
      %24 = arith.maximumf %22, %23 : vector<128x64xf32>
      %25 = arith.truncf %24 : vector<128x64xf32> to vector<128x64xbf16>
      %c0_15 = arith.constant 0 : index
      %c0_16 = arith.constant 0 : index
      %26 = vector.load %arg7[%c0_15, %c0_16] : memref<64x128xbf16, #tpu.memory_space<vmem>>, vector<64x128xbf16>
      %cst_17 = arith.constant dense<0.000000e+00> : vector<128x128xf32>
      %27 = tpu.matmul %25, %26, %cst_17 {dimension_numbers = #tpu.dot_dimension_numbers<[1], [0], [0], [1], [0, 0, 1, 1], [], []>} : vector<128x64xbf16>, vector<64x128xbf16>, vector<128x128xf32> -> vector<128x128xf32>
      %c0_18 = arith.constant 0 : index
      %c0_19 = arith.constant 0 : index
      %28 = vector.load %arg8[%c0_18, %c0_19] : memref<1x128xf32, #tpu.memory_space<vmem>>, vector<1x128xf32>
      %29 = vector.broadcast %28 : vector<1x128xf32> to vector<128x128xf32>
      %30 = arith.addf %27, %29 : vector<128x128xf32>
      %c0_20 = arith.constant 0 : index
      %c0_21 = arith.constant 0 : index
      %31 = vector.load %arg16[%c0_20, %c0_21] : memref<1x128xf32, #tpu.memory_space<vmem>>, vector<1x128xf32>
      %cst_22 = arith.constant dense<0.000000e+00> : vector<128xf32>
      %32 = vector.multi_reduction <add>, %30, %cst_22 [0] : vector<128x128xf32> to vector<128xf32>
      %33 = vector.shape_cast %32 : vector<128xf32> to vector<1x128xf32>
      %34 = arith.addf %31, %33 : vector<1x128xf32>
      %c0_23 = arith.constant 0 : index
      %c0_24 = arith.constant 0 : index
      %35 = vector.load %arg16[%c0_23, %c0_24] : memref<1x128xf32, #tpu.memory_space<vmem>>, vector<1x128xf32>
      tpu.vector_store %arg16[%c0_23, %c0_24], %34 {strides = array<i32>} : memref<1x128xf32, #tpu.memory_space<vmem>>, vector<1x128xf32>,
      %c0_25 = arith.constant 0 : index
      %c0_26 = arith.constant 0 : index
      %36 = vector.load %arg17[%c0_25, %c0_26] : memref<1x128xf32, #tpu.memory_space<vmem>>, vector<1x128xf32>
      %37 = arith.mulf %30, %30 : vector<128x128xf32>
      %cst_27 = arith.constant dense<0.000000e+00> : vector<128xf32>
      %38 = vector.multi_reduction <add>, %37, %cst_27 [0] : vector<128x128xf32> to vector<128xf32>
      %39 = vector.shape_cast %38 : vector<128xf32> to vector<1x128xf32>
      %40 = arith.addf %36, %39 : vector<1x128xf32>
      %c0_28 = arith.constant 0 : index
      %c0_29 = arith.constant 0 : index
      %41 = vector.load %arg17[%c0_28, %c0_29] : memref<1x128xf32, #tpu.memory_space<vmem>>, vector<1x128xf32>
      tpu.vector_store %arg17[%c0_28, %c0_29], %40 {strides = array<i32>} : memref<1x128xf32, #tpu.memory_space<vmem>>, vector<1x128xf32>,
    } else {
    }
    %c1_i32 = arith.constant 1 : i32
    %10 = arith.cmpi eq, %arg0, %c1_i32 : i32
    %11 = arith.extui %10 : i1 to i32
    %c0_i32_5 = arith.constant 0 : i32
    %12 = arith.cmpi ne, %11, %c0_i32_5 : i32
    scf.if %12 {
      %c0_i32_6 = arith.constant 0 : i32
      %13 = arith.cmpi eq, %arg1, %c0_i32_6 : i32
      %c0_i32_7 = arith.constant 0 : i32
      %14 = arith.cmpi eq, %arg2, %c0_i32_7 : i32
      %15 = arith.andi %13, %14 : i1
      %16 = arith.extui %15 : i1 to i32
      %c0_i32_8 = arith.constant 0 : i32
      %17 = arith.cmpi ne, %16, %c0_i32_8 : i32
      scf.if %17 {
        %cst_77 = arith.constant 0.000000e+00 : f32
        %112 = vector.broadcast %cst_77 : f32 to vector<1x128xf32>
        %c0_78 = arith.constant 0 : index
        %c0_79 = arith.constant 0 : index
        %113 = vector.load %arg12[%c0_78, %c0_79] : memref<1x128xf32, #tpu.memory_space<vmem>>, vector<1x128xf32>
        tpu.vector_store %arg12[%c0_78, %c0_79], %112 {strides = array<i32>} : memref<1x128xf32, #tpu.memory_space<vmem>>, vector<1x128xf32>,
        %cst_80 = arith.constant 0.000000e+00 : f32
        %114 = vector.broadcast %cst_80 : f32 to vector<128x128xf32>
        %c0_81 = arith.constant 0 : index
        %c0_82 = arith.constant 0 : index
        %115 = vector.load %arg13[%c0_81, %c0_82] : memref<128x128xf32, #tpu.memory_space<vmem>>, vector<128x128xf32>
        tpu.vector_store %arg13[%c0_81, %c0_82], %114 {strides = array<i32>} : memref<128x128xf32, #tpu.memory_space<vmem>>, vector<128x128xf32>,
      } else {
      }
      %c0_i32_9 = arith.constant 0 : i32
      %18 = arith.cmpi eq, %arg2, %c0_i32_9 : i32
      %19 = arith.extui %18 : i1 to i32
      %c0_i32_10 = arith.constant 0 : i32
      %20 = arith.cmpi ne, %19, %c0_i32_10 : i32
      scf.if %20 {
        %cst_77 = arith.constant 0xFF800000 : f32
        %112 = vector.broadcast %cst_77 : f32 to vector<1x1x1024xf32>
        %c0_78 = arith.constant 0 : index
        %c0_79 = arith.constant 0 : index
        %c0_80 = arith.constant 0 : index
        %113 = vector.load %arg14[%c0_78, %c0_79, %c0_80] : memref<1x1x1024xf32, #tpu.memory_space<vmem>>, vector<1x1x1024xf32>
        tpu.vector_store %arg14[%c0_78, %c0_79, %c0_80], %112 {strides = array<i32>} : memref<1x1x1024xf32, #tpu.memory_space<vmem>>, vector<1x1x1024xf32>,
        %cst_81 = arith.constant 0x7F800000 : f32
        %114 = vector.broadcast %cst_81 : f32 to vector<1x1x1024xf32>
        %c0_82 = arith.constant 0 : index
        %c0_83 = arith.constant 0 : index
        %c0_84 = arith.constant 0 : index
        %115 = vector.load %arg15[%c0_82, %c0_83, %c0_84] : memref<1x1x1024xf32, #tpu.memory_space<vmem>>, vector<1x1x1024xf32>
        tpu.vector_store %arg15[%c0_82, %c0_83, %c0_84], %114 {strides = array<i32>} : memref<1x1x1024xf32, #tpu.memory_space<vmem>>, vector<1x1x1024xf32>,
      } else {
      }
      %c0 = arith.constant 0 : index
      %c0_11 = arith.constant 0 : index
      %21 = vector.load %arg16[%c0, %c0_11] : memref<1x128xf32, #tpu.memory_space<vmem>>, vector<1x128xf32>
      %cst = arith.constant 0.001953125 : f32
      %22 = vector.broadcast %cst : f32 to vector<1x128xf32>
      %23 = arith.mulf %21, %22 : vector<1x128xf32>
      %c0_12 = arith.constant 0 : index
      %c0_13 = arith.constant 0 : index
      %24 = vector.load %arg17[%c0_12, %c0_13] : memref<1x128xf32, #tpu.memory_space<vmem>>, vector<1x128xf32>
      %cst_14 = arith.constant 0.001953125 : f32
      %25 = vector.broadcast %cst_14 : f32 to vector<1x128xf32>
      %26 = arith.mulf %24, %25 : vector<1x128xf32>
      %27 = arith.mulf %23, %23 : vector<1x128xf32>
      %28 = arith.subf %26, %27 : vector<1x128xf32>
      %cst_15 = arith.constant 0.000000e+00 : f32
      %29 = vector.broadcast %cst_15 : f32 to vector<1x128xf32>
      %30 = arith.maximumf %28, %29 : vector<1x128xf32>
      %c0_16 = arith.constant 0 : index
      %c0_17 = arith.constant 0 : index
      %31 = vector.load %arg9[%c0_16, %c0_17] : memref<1x128xf32, #tpu.memory_space<vmem>>, vector<1x128xf32>
      %cst_18 = arith.constant 9.99999974E-6 : f32
      %32 = vector.broadcast %cst_18 : f32 to vector<1x128xf32>
      %33 = arith.addf %30, %32 : vector<1x128xf32>
      %34 = math.rsqrt %33 : vector<1x128xf32>
      %35 = arith.mulf %31, %34 : vector<1x128xf32>
      %c0_19 = arith.constant 0 : index
      %c0_20 = arith.constant 0 : index
      %36 = vector.load %arg10[%c0_19, %c0_20] : memref<1x128xf32, #tpu.memory_space<vmem>>, vector<1x128xf32>
      %37 = arith.mulf %23, %35 : vector<1x128xf32>
      %38 = arith.subf %36, %37 : vector<1x128xf32>
      %c0_21 = arith.constant 0 : index
      %c0_22 = arith.constant 0 : index
      %c0_23 = arith.constant 0 : index
      %39 = vector.load %arg3[%c0_21, %c0_22, %c0_23] : memref<1x128x16xbf16, #tpu.memory_space<vmem>>, vector<1x128x16xbf16>
      %40 = vector.shape_cast %39 : vector<1x128x16xbf16> to vector<128x16xbf16>
      %c0_24 = arith.constant 0 : index
      %c0_25 = arith.constant 0 : index
      %41 = vector.load %arg4[%c0_24, %c0_25] : memref<16x64xbf16, #tpu.memory_space<vmem>>, vector<16x64xbf16>
      %cst_26 = arith.constant dense<0.000000e+00> : vector<128x64xf32>
      %42 = tpu.matmul %40, %41, %cst_26 {dimension_numbers = #tpu.dot_dimension_numbers<[1], [0], [0], [1], [0, 0, 1, 1], [], []>} : vector<128x16xbf16>, vector<16x64xbf16>, vector<128x64xf32> -> vector<128x64xf32>
      %c0_27 = arith.constant 0 : index
      %c0_28 = arith.constant 0 : index
      %43 = vector.load %arg5[%c0_27, %c0_28] : memref<1x64xf32, #tpu.memory_space<vmem>>, vector<1x64xf32>
      %44 = vector.broadcast %43 : vector<1x64xf32> to vector<128x64xf32>
      %45 = arith.mulf %42, %44 : vector<128x64xf32>
      %c0_29 = arith.constant 0 : index
      %c0_30 = arith.constant 0 : index
      %46 = vector.load %arg6[%c0_29, %c0_30] : memref<1x64xf32, #tpu.memory_space<vmem>>, vector<1x64xf32>
      %47 = vector.broadcast %46 : vector<1x64xf32> to vector<128x64xf32>
      %48 = arith.addf %45, %47 : vector<128x64xf32>
      %cst_31 = arith.constant 0.000000e+00 : f32
      %49 = vector.broadcast %cst_31 : f32 to vector<128x64xf32>
      %50 = arith.maximumf %48, %49 : vector<128x64xf32>
      %51 = arith.truncf %50 : vector<128x64xf32> to vector<128x64xbf16>
      %c0_32 = arith.constant 0 : index
      %c0_33 = arith.constant 0 : index
      %52 = vector.load %arg7[%c0_32, %c0_33] : memref<64x128xbf16, #tpu.memory_space<vmem>>, vector<64x128xbf16>
      %cst_34 = arith.constant dense<0.000000e+00> : vector<128x128xf32>
      %53 = tpu.matmul %51, %52, %cst_34 {dimension_numbers = #tpu.dot_dimension_numbers<[1], [0], [0], [1], [0, 0, 1, 1], [], []>} : vector<128x64xbf16>, vector<64x128xbf16>, vector<128x128xf32> -> vector<128x128xf32>
      %c0_35 = arith.constant 0 : index
      %c0_36 = arith.constant 0 : index
      %54 = vector.load %arg8[%c0_35, %c0_36] : memref<1x128xf32, #tpu.memory_space<vmem>>, vector<1x128xf32>
      %55 = vector.broadcast %54 : vector<1x128xf32> to vector<128x128xf32>
      %56 = arith.addf %53, %55 : vector<128x128xf32>
      %57 = vector.broadcast %35 : vector<1x128xf32> to vector<128x128xf32>
      %58 = arith.mulf %56, %57 : vector<128x128xf32>
      %59 = vector.broadcast %38 : vector<1x128xf32> to vector<128x128xf32>
      %60 = arith.addf %58, %59 : vector<128x128xf32>
      %cst_37 = arith.constant 0.000000e+00 : f32
      %61 = vector.broadcast %cst_37 : f32 to vector<128x128xf32>
      %62 = arith.maximumf %60, %61 : vector<128x128xf32>
      %63 = arith.truncf %62 : vector<128x128xf32> to vector<128x128xbf16>
      %c0_38 = arith.constant 0 : index
      %c0_39 = arith.constant 0 : index
      %64 = vector.load %arg12[%c0_38, %c0_39] : memref<1x128xf32, #tpu.memory_space<vmem>>, vector<1x128xf32>
      %65 = arith.extf %63 : vector<128x128xbf16> to vector<128x128xf32>
      %cst_40 = arith.constant dense<0.000000e+00> : vector<128xf32>
      %66 = vector.multi_reduction <add>, %65, %cst_40 [0] : vector<128x128xf32> to vector<128xf32>
      %67 = vector.shape_cast %66 : vector<128xf32> to vector<1x128xf32>
      %68 = arith.addf %64, %67 : vector<1x128xf32>
      %c0_41 = arith.constant 0 : index
      %c0_42 = arith.constant 0 : index
      %69 = vector.load %arg12[%c0_41, %c0_42] : memref<1x128xf32, #tpu.memory_space<vmem>>, vector<1x128xf32>
      tpu.vector_store %arg12[%c0_41, %c0_42], %68 {strides = array<i32>} : memref<1x128xf32, #tpu.memory_space<vmem>>, vector<1x128xf32>,
      %c0_43 = arith.constant 0 : index
      %c0_44 = arith.constant 0 : index
      %70 = vector.load %arg13[%c0_43, %c0_44] : memref<128x128xf32, #tpu.memory_space<vmem>>, vector<128x128xf32>
      %cst_45 = arith.constant dense<0.000000e+00> : vector<128x128xf32>
      %71 = tpu.matmul %63, %63, %cst_45 {dimension_numbers = #tpu.dot_dimension_numbers<[0], [0], [1], [1], [0, 1, 1, 1], [], []>} : vector<128x128xbf16>, vector<128x128xbf16>, vector<128x128xf32> -> vector<128x128xf32>
      %72 = arith.addf %70, %71 : vector<128x128xf32>
      %c0_46 = arith.constant 0 : index
      %c0_47 = arith.constant 0 : index
      %73 = vector.load %arg13[%c0_46, %c0_47] : memref<128x128xf32, #tpu.memory_space<vmem>>, vector<128x128xf32>
      tpu.vector_store %arg13[%c0_46, %c0_47], %72 {strides = array<i32>} : memref<128x128xf32, #tpu.memory_space<vmem>>, vector<128x128xf32>,
      %c0_48 = arith.constant 0 : index
      %c0_49 = arith.constant 0 : index
      %74 = vector.load %arg11[%c0_48, %c0_49] : memref<128x1024xbf16, #tpu.memory_space<vmem>>, vector<128x256xbf16>
      %cst_50 = arith.constant dense<0.000000e+00> : vector<128x256xf32>
      %75 = tpu.matmul %63, %74, %cst_50 {dimension_numbers = #tpu.dot_dimension_numbers<[1], [0], [0], [1], [0, 0, 1, 1], [], []>} : vector<128x128xbf16>, vector<128x256xbf16>, vector<128x256xf32> -> vector<128x256xf32>
      %cst_51 = arith.constant dense<0xFF800000> : vector<256xf32>
      %76 = vector.multi_reduction <maximumf>, %75, %cst_51 [0] : vector<128x256xf32> to vector<256xf32>
      %77 = vector.shape_cast %76 : vector<256xf32> to vector<1x256xf32>
      %cst_52 = arith.constant dense<0x7F800000> : vector<256xf32>
      %78 = vector.multi_reduction <minimumf>, %75, %cst_52 [0] : vector<128x256xf32> to vector<256xf32>
      %79 = vector.shape_cast %78 : vector<256xf32> to vector<1x256xf32>
      %c0_53 = arith.constant 0 : index
      %c256 = arith.constant 256 : index
      %80 = vector.load %arg11[%c0_53, %c256] : memref<128x1024xbf16, #tpu.memory_space<vmem>>, vector<128x256xbf16>
      %cst_54 = arith.constant dense<0.000000e+00> : vector<128x256xf32>
      %81 = tpu.matmul %63, %80, %cst_54 {dimension_numbers = #tpu.dot_dimension_numbers<[1], [0], [0], [1], [0, 0, 1, 1], [], []>} : vector<128x128xbf16>, vector<128x256xbf16>, vector<128x256xf32> -> vector<128x256xf32>
      %cst_55 = arith.constant dense<0xFF800000> : vector<256xf32>
      %82 = vector.multi_reduction <maximumf>, %81, %cst_55 [0] : vector<128x256xf32> to vector<256xf32>
      %83 = vector.shape_cast %82 : vector<256xf32> to vector<1x256xf32>
      %cst_56 = arith.constant dense<0x7F800000> : vector<256xf32>
      %84 = vector.multi_reduction <minimumf>, %81, %cst_56 [0] : vector<128x256xf32> to vector<256xf32>
      %85 = vector.shape_cast %84 : vector<256xf32> to vector<1x256xf32>
      %c0_57 = arith.constant 0 : index
      %c512 = arith.constant 512 : index
      %86 = vector.load %arg11[%c0_57, %c512] : memref<128x1024xbf16, #tpu.memory_space<vmem>>, vector<128x256xbf16>
      %cst_58 = arith.constant dense<0.000000e+00> : vector<128x256xf32>
      %87 = tpu.matmul %63, %86, %cst_58 {dimension_numbers = #tpu.dot_dimension_numbers<[1], [0], [0], [1], [0, 0, 1, 1], [], []>} : vector<128x128xbf16>, vector<128x256xbf16>, vector<128x256xf32> -> vector<128x256xf32>
      %cst_59 = arith.constant dense<0xFF800000> : vector<256xf32>
      %88 = vector.multi_reduction <maximumf>, %87, %cst_59 [0] : vector<128x256xf32> to vector<256xf32>
      %89 = vector.shape_cast %88 : vector<256xf32> to vector<1x256xf32>
      %cst_60 = arith.constant dense<0x7F800000> : vector<256xf32>
      %90 = vector.multi_reduction <minimumf>, %87, %cst_60 [0] : vector<128x256xf32> to vector<256xf32>
      %91 = vector.shape_cast %90 : vector<256xf32> to vector<1x256xf32>
      %c0_61 = arith.constant 0 : index
      %c768 = arith.constant 768 : index
      %92 = vector.load %arg11[%c0_61, %c768] : memref<128x1024xbf16, #tpu.memory_space<vmem>>, vector<128x256xbf16>
      %cst_62 = arith.constant dense<0.000000e+00> : vector<128x256xf32>
      %93 = tpu.matmul %63, %92, %cst_62 {dimension_numbers = #tpu.dot_dimension_numbers<[1], [0], [0], [1], [0, 0, 1, 1], [], []>} : vector<128x128xbf16>, vector<128x256xbf16>, vector<128x256xf32> -> vector<128x256xf32>
      %cst_63 = arith.constant dense<0xFF800000> : vector<256xf32>
      %94 = vector.multi_reduction <maximumf>, %93, %cst_63 [0] : vector<128x256xf32> to vector<256xf32>
      %95 = vector.shape_cast %94 : vector<256xf32> to vector<1x256xf32>
      %cst_64 = arith.constant dense<0x7F800000> : vector<256xf32>
      %96 = vector.multi_reduction <minimumf>, %93, %cst_64 [0] : vector<128x256xf32> to vector<256xf32>
      %97 = vector.shape_cast %96 : vector<256xf32> to vector<1x256xf32>
      %98 = tpu.concatenate %77, %83, %89, %95 in 1 : vector<1x256xf32>, vector<1x256xf32>, vector<1x256xf32>, vector<1x256xf32> -> vector<1x1024xf32>
      %99 = tpu.concatenate %79, %85, %91, %97 in 1 : vector<1x256xf32>, vector<1x256xf32>, vector<1x256xf32>, vector<1x256xf32> -> vector<1x1024xf32>
      %c0_65 = arith.constant 0 : index
      %c0_66 = arith.constant 0 : index
      %c0_67 = arith.constant 0 : index
      %100 = vector.load %arg14[%c0_65, %c0_66, %c0_67] : memref<1x1x1024xf32, #tpu.memory_space<vmem>>, vector<1x1x1024xf32>
      %101 = vector.shape_cast %100 : vector<1x1x1024xf32> to vector<1x1024xf32>
      %102 = arith.maximumf %101, %98 : vector<1x1024xf32>
      %c0_68 = arith.constant 0 : index
      %c0_69 = arith.constant 0 : index
      %c0_70 = arith.constant 0 : index
      %103 = vector.load %arg14[%c0_68, %c0_69, %c0_70] : memref<1x1x1024xf32, #tpu.memory_space<vmem>>, vector<1x1x1024xf32>
      %104 = vector.shape_cast %103 : vector<1x1x1024xf32> to vector<1x1024xf32>
      %105 = vector.shape_cast %102 : vector<1x1024xf32> to vector<1x1x1024xf32>
      tpu.vector_store %arg14[%c0_68, %c0_69, %c0_70], %105 {strides = array<i32>} : memref<1x1x1024xf32, #tpu.memory_space<vmem>>, vector<1x1x1024xf32>,
      %c0_71 = arith.constant 0 : index
      %c0_72 = arith.constant 0 : index
      %c0_73 = arith.constant 0 : index
      %106 = vector.load %arg15[%c0_71, %c0_72, %c0_73] : memref<1x1x1024xf32, #tpu.memory_space<vmem>>, vector<1x1x1024xf32>
      %107 = vector.shape_cast %106 : vector<1x1x1024xf32> to vector<1x1024xf32>
      %108 = arith.minimumf %107, %99 : vector<1x1024xf32>
      %c0_74 = arith.constant 0 : index
      %c0_75 = arith.constant 0 : index
      %c0_76 = arith.constant 0 : index
      %109 = vector.load %arg15[%c0_74, %c0_75, %c0_76] : memref<1x1x1024xf32, #tpu.memory_space<vmem>>, vector<1x1x1024xf32>
      %110 = vector.shape_cast %109 : vector<1x1x1024xf32> to vector<1x1024xf32>
      %111 = vector.shape_cast %108 : vector<1x1024xf32> to vector<1x1x1024xf32>
      tpu.vector_store %arg15[%c0_74, %c0_75, %c0_76], %111 {strides = array<i32>} : memref<1x1x1024xf32, #tpu.memory_space<vmem>>, vector<1x1x1024xf32>,
    } else {
    }
    return
  }
  func.func @transform_0(%arg0: i32, %arg1: i32, %arg2: i32) -> (i32, i32, i32) {
    %c0_i32 = arith.constant 0 : i32
    %c0_i32_0 = arith.constant 0 : i32
    return %arg1, %arg2, %c0_i32 : i32, i32, i32
  }
  func.func @transform_1(%arg0: i32, %arg1: i32, %arg2: i32) -> (i32, i32) {
    %c0_i32 = arith.constant 0 : i32
    %c0_i32_0 = arith.constant 0 : i32
    %c0_i32_1 = arith.constant 0 : i32
    return %c0_i32, %c0_i32_0 : i32, i32
  }
  func.func @transform_2(%arg0: i32, %arg1: i32, %arg2: i32) -> (i32, i32) {
    %c0_i32 = arith.constant 0 : i32
    %c0_i32_0 = arith.constant 0 : i32
    %c0_i32_1 = arith.constant 0 : i32
    return %c0_i32, %c0_i32_0 : i32, i32
  }
  func.func @transform_3(%arg0: i32, %arg1: i32, %arg2: i32) -> (i32, i32) {
    %c0_i32 = arith.constant 0 : i32
    %c0_i32_0 = arith.constant 0 : i32
    %c0_i32_1 = arith.constant 0 : i32
    return %c0_i32, %c0_i32_0 : i32, i32
  }
  func.func @transform_4(%arg0: i32, %arg1: i32, %arg2: i32) -> (i32, i32) {
    %c0_i32 = arith.constant 0 : i32
    %c0_i32_0 = arith.constant 0 : i32
    %c0_i32_1 = arith.constant 0 : i32
    return %c0_i32, %c0_i32_0 : i32, i32
  }
  func.func @transform_5(%arg0: i32, %arg1: i32, %arg2: i32) -> (i32, i32) {
    %c0_i32 = arith.constant 0 : i32
    %c0_i32_0 = arith.constant 0 : i32
    %c0_i32_1 = arith.constant 0 : i32
    return %c0_i32, %c0_i32_0 : i32, i32
  }
  func.func @transform_6(%arg0: i32, %arg1: i32, %arg2: i32) -> (i32, i32) {
    %c0_i32 = arith.constant 0 : i32
    %c0_i32_0 = arith.constant 0 : i32
    %c0_i32_1 = arith.constant 0 : i32
    return %c0_i32, %c0_i32_0 : i32, i32
  }
  func.func @transform_7(%arg0: i32, %arg1: i32, %arg2: i32) -> (i32, i32) {
    %c0_i32 = arith.constant 0 : i32
    %c0_i32_0 = arith.constant 0 : i32
    %c0_i32_1 = arith.constant 0 : i32
    return %c0_i32, %c0_i32_0 : i32, i32
  }
  func.func @transform_8(%arg0: i32, %arg1: i32, %arg2: i32) -> (i32, i32) {
    %c0_i32 = arith.constant 0 : i32
    %c0_i32_0 = arith.constant 0 : i32
    %c0_i32_1 = arith.constant 0 : i32
    return %c0_i32, %c0_i32_0 : i32, i32
  }
  func.func @transform_9(%arg0: i32, %arg1: i32, %arg2: i32) -> (i32, i32) {
    %c0_i32 = arith.constant 0 : i32
    %c0_i32_0 = arith.constant 0 : i32
    %c0_i32_1 = arith.constant 0 : i32
    return %c0_i32, %c0_i32_0 : i32, i32
  }
  func.func @transform_10(%arg0: i32, %arg1: i32, %arg2: i32) -> (i32, i32) {
    %c0_i32 = arith.constant 0 : i32
    %c0_i32_0 = arith.constant 0 : i32
    %c0_i32_1 = arith.constant 0 : i32
    return %c0_i32, %c0_i32_0 : i32, i32
  }
  func.func @transform_11(%arg0: i32, %arg1: i32, %arg2: i32) -> (i32, i32, i32) {
    %0 = arith.muli %arg1, %arg0 : i32
    %c0_i32 = arith.constant 0 : i32
    %c0_i32_0 = arith.constant 0 : i32
    %c0_i32_1 = arith.constant 0 : i32
    return %0, %c0_i32, %c0_i32_0 : i32, i32, i32
  }
  func.func @transform_12(%arg0: i32, %arg1: i32, %arg2: i32) -> (i32, i32, i32) {
    %0 = arith.muli %arg1, %arg0 : i32
    %c0_i32 = arith.constant 0 : i32
    %c0_i32_0 = arith.constant 0 : i32
    %c0_i32_1 = arith.constant 0 : i32
    return %0, %c0_i32, %c0_i32_0 : i32, i32, i32
  }
}

</mosaic_0001>

<bundles_post_ra>
// kernel: tpu_custom_call.1
= control target key start
LH: loop header
LB: loop body
LE: loop exit
PB: predicated region body
PF: predicated region fallthrough
CT: control target
= control target key end

     0   :  { %s4859_s0 = inlined_call_operand.vmem [shape: bf16[2,256,16], index: 0, kind: input, shape index: {}]   ;;  %s4860_s1 = inlined_call_operand.vmem [shape: bf16[16,64], index: 1, kind: input, shape index: {}]   ;;  %s4861_s2 = inlined_call_operand.vmem [shape: f32[1,64], index: 2, kind: input, shape index: {}]   ;;  %s4862_s3 = inlined_call_operand.vmem [shape: f32[1,64], index: 3, kind: input, shape index: {}]   ;;  %s4863_s4 = inlined_call_operand.vmem [shape: bf16[64,128], index: 4, kind: input, shape index: {}]   ;;  %s4864_s5 = inlined_call_operand.vmem [shape: f32[1,128], index: 5, kind: input, shape index: {}]   ;;  %s4865_s6 = inlined_call_operand.vmem [shape: f32[1,128], index: 6, kind: input, shape index: {}]   ;;  %s4866_s7 = inlined_call_operand.vmem [shape: f32[1,128], index: 7, kind: input, shape index: {}]   ;;  %s4867_s8 = inlined_call_operand.hbm [shape: bf16[128,1024], index: 8, kind: input, shape index: {}]   ;;  %s4868_s9 = inlined_call_operand.hbm [shape: f32[1,128], index: 9, kind: output, shape index: {0}]   ;;  %s4869_s10 = inlined_call_operand.hbm [shape: f32[128,128], index: 10, kind: output, shape index: {1}]   ;;  %s4870_s11 = inlined_call_operand.hbm [shape: f32[2,1,1024], index: 11, kind: output, shape index: {2}]   ;;  %s4871_s12 = inlined_call_operand.hbm [shape: f32[2,1,1024], index: 12, kind: output, shape index: {3}]  }
   0x1   :  { %4887 = sst [smem:[#allocation24_spill]] %s4859_s0 }
   0x2   :  { %4888 = sst [smem:[#allocation25_spill]] %s4860_s1 }
   0x3   :  { %4889 = sst [smem:[#allocation26_spill]] %s4861_s2 }
   0x4   :  { %4890 = sst [smem:[#allocation27_spill]] %s4869_s10 }
   0x5   :  { %4891 = sst [smem:[#allocation28_spill]] %s4871_s12 }
   0x6   :  { %18 = vsyncpa [#allocation5], 0 }
   0x7   :  { %19 = vsyncpa [#allocation6], 0 }
   0x8   :  { %20 = vsyncpa [#allocation9], 0  ;;  %s4005_s21 = smov 0   ;;  %s4007_s22 = smov 0  }
   0x9   :  { %s4009_s23 = smov 0   ;;  %s4011_s24 = smov 0  }
   0xa   :  { %s4013_s25 = smov 0   ;;  %s4015_s26 = smov 0  }
   0xb   :  { %s4017_s27 = smov 0   ;;  %s4019_s28 = smov 0  }
   0xc   :  { %s4021_s29 = smov 0   ;;  %s4023_s30 = smov 0  }
   0xd LB: > { %4892 = sst [smem:[#allocation16_spill]] %s3911_s27  ;;  %s4054_s13 = sadd.s32 4294967295, %s3923_s30   ;;  %s3923_s30 = sphi %s4023_s30, %s4940_s30   ;;  %s3919_s29 = sphi %s4021_s29, %s4936_s29   ;;  %s3915_s28 = sphi %s4019_s28, %s4935_s28   ;;  %s3911_s27 = sphi %s4017_s27, %s4934_s27   ;;  %s3907_s26 = sphi %s4015_s26, %s4933_s26   ;;  %s3903_s25 = sphi %s4013_s25, %s4932_s25   ;;  %s3899_s24 = sphi %s4011_s24, %s4931_s24   ;;  %s3895_s23 = sphi %s4009_s23, %s4939_s23   ;;  %s3891_s22 = sphi %s4007_s22, %s4938_s22   ;;  %s3887_s21 = sphi %s4005_s21, %s4937_s21  }
   0xe   : > { %4893 = sst [smem:[#allocation17_spill]] %s3915_s28  ;;  %s4872_s14 = sadd.s32 4294967294, %s3923_s30  }
   0xf   : > { %4894 = sst [smem:[#allocation18_spill]] %s3919_s29  ;;  %s38_s15 = sadd.s32 1, %s3911_s27 }
  0x10   : > { %4895 = sst [smem:[#allocation19_spill]] %s3923_s30  ;;  %p39_p0 = scmp.ge.s32.totalorder %s38_s15, 2 }
  0x11   : > { %s41_s16 = sadd.s32 1, %s3915_s28  ;;  %s45_s17 = sadd.s32 1, %s3919_s29 }
  0x12   : > { %s287_s18 = smul.u32 %s3915_s28, %s3919_s29  ;;  %s4942_s15 = smov (%p39_p0, %s38_s15), 0 }
  0x13   : > { %4896 = sst [smem:[#allocation20_spill]] %s4942_s15  ;;  %s4944_s16 = smov (!%p39_p0, %s41_s16), %s3915_s28 }
  0x14   : > { %p302_p1 = scmp.ne.s32.totalorder %s3895_s23, %s3891_s22  ;;  %p4883_p2 = scmp.eq.s32.totalorder %s4054_s13, 7 }
  0x15   : > { %p43_p3 = scmp.ge.s32.totalorder %s4944_s16, 2  ;;  %p308_p4 = scmp.ne.s32.totalorder %s3891_s22, %s3887_s21 }
  0x16   : > { %p4071_p5 = por %p4883_p2, %p302_p1  ;;  %p309_p6 = scmp.eq.s32.totalorder %s4872_s14, 7 }
  0x17   : > { %s4946_s16 = smov (%p43_p3, %s4944_s16), 0  ;;  %s4948_s17 = smov (!%p43_p3, %s45_s17), %s3919_s29 }
  0x18   : > { %s4897_s19 = scalar_select %p4071_p5, 1, 0 }
  0x19   : > { %4898 = sst [smem:[#allocation21_spill]] %s4946_s16  ;;  %p4080_p7 = por %p309_p6, %p308_p4 }
  0x1a   : > { %p3193_p8 = scmp.ge.s32.totalorder %s3923_s30, 1  ;;  %p47_p9 = scmp.ge.s32.totalorder %s4948_s17, 2 }
  0x1b   : > { %s4899_s20 = scalar_select %p4080_p7, 1, 0 }
  0x1c   : > { %p344_p10 = scmp.lt.s32.totalorder %s3923_s30, 9  ;;  %p4884_p11 = scmp.eq.s32.totalorder %s4054_s13, 0 }
  0x1d   : > { %4900 = sst [smem:[#allocation22_spill]] %s4899_s20  ;;  %s4950_s17 = smov (%p47_p9, %s4948_s17), 0 }
  0x1e   : > { %4901 = sst [smem:[#allocation23_spill]] %s4950_s17  ;;  %p4089_p12 = pnand %p3193_p8, %p344_p10 }
  0x1f   : > { %s288_s14 = smul.u32 %s4950_s17, %s4946_s16  ;;  %s3925_s15 = smov [#allocation4]  }
  0x20   : > { %s4902_s21 = scalar_select %p4089_p12, 1, 0 }
  0x21   : > { %s377_s29 = sshll.u32 %s3925_s15, 4  ;;  %s292_s28 = sadd.s32 1, %s3895_s23  ;;  %s378_s29 = int_to_ptr.vmem [resolvable:$true] %s377_s29 }
  0x22   : > { %p3554_p13 = pneg %p4089_p12  ;;  %s289_s27 = ssub.s32 %s287_s18, %s288_s14 }
  0x23   : > { %p290_p0 = scmp.eq.s32.totalorder %s289_s27, 0  ;;  %s3693_s17 = scalar_lea.hbm %s4867_s8, 8192 }
  0x24   : > { %p4100_p1 = pnand %p4884_p11, %p3554_p13  ;;  %p3694_p3 = scmp.ne.s32.totalorder %s4867_s8, %s3693_s17 }
  0x25   : > { %s4105_s30 = scalar_select %p290_p0, %s3895_s23, %s292_s28  }
  0x26   : > { %p3695_p4 = pneg %p4100_p1  ;;  %p3700_p9 = scmp.lt.u32.totalorder %s3693_s17, %s4867_s8 }
  0x28   : > { %p3696_p6 = pnand %p3695_p4, %p3694_p3 }
  0x2a   : > { %p3697_p8 = pneg %p3696_p6 }
  0x2c   : > { %p3702_p10 = pnand %p3700_p9, %p3697_p8 }
  0x2e   : > { %3705 = shalt.err (!%p3702_p10)
}
  0x2f   : > { %s3706_s28 = scalar_lea.vmem %s378_s29, 8192  ;;  %p3714_p11 = scmp.lt.s32.totalorder %s378_s29, %s378_s29 }
  0x30   : > { %p3707_p13 = scmp.ne.s32.totalorder %s378_s29, %s3706_s28  ;;  %p3715_p7 = scmp.lt.s32.totalorder %s3706_s28, %s3706_s28 }
  0x32   : > { %p3709_p0 = pnand %p3707_p13, %p3695_p4  ;;  %p3716_p5 = por %p3715_p7, %p3714_p11 }
  0x34   : > { %p3710_p2 = pneg %p3709_p0 }
  0x36   : > { %p3717_p12 = pnand %p3716_p5, %p3710_p2 }
  0x38   : > { %3720 = shalt.err (!%p3717_p12)
}
  0x39   : > { %s3926_s10 = smov 512   ;;  %s3927_s12 = smov 32  }
  0x3a   : > { %3557 = dma.hbm_to_vmem [thread:$0]  (!%p4100_p1), %s4867_s8, 8192, %s378_s29, [#allocation5], %s3926_s10, %s3926_s10, %s3927_s12  }
  0x3b   : > { %p4904_p3 = scmp.ne.s32.totalorder %s4902_s21, 0 }
  0x3c   : > { %p4905_p6 = scmp.eq.s32.totalorder (!%p4904_p3), %s4054_s13, 0 }
  0x3d   : > { %406 = sbr.rel (%p4904_p3) target bundleno = 1683 (0x693), region = 56 }
  0x44   : > { %3870 = dma.done.wait (%p4905_p6), [#allocation5], 8192   ;;  %p4906_p4 = pmov %p4905_p6 }
  0x45   : > { %s447_s17 = sand.u32 1, %s3891_s22   ;;  %s3200_s20 = sshll.u32 %s3899_s24, 4 }
  0x46   : > { %3872 = vsyncadd (%p4906_p4), [#allocation5], 4294959104  ;;  %s3198_s15 = sshll.u32 %s447_s17, 3  ;;  %p458_p2 = scmp.lt.s32.totalorder %s3903_s25, 1 }
  0x47   : > { %p460_p5 = scmp.lt.s32.totalorder %s3200_s20, 31  ;;  %p471_p7 = scmp.eq.s32.totalorder %s3903_s25, 0 }
  0x48   : > { %s459_s29 = scalar_select %p458_p2, %s3903_s25, 1 }
  0x49   : > { %s4952_s20 = smov (!%p460_p5, %s3200_s20), 31  ;;  %p472_p11 = scmp.eq.s32.totalorder %s3899_s24, 0 }
  0x4a   : > { %s3201_s21 = sshll.u32 %s459_s29, 5  ;;  %p470_p12 = scmp.eq.s32.totalorder %s3907_s26, 0 }
  0x4b   : > { %s463_s27 = sadd.s32 %s3201_s21, %s4952_s20  ;;  %p4136_p1 = pnand %p472_p11, %p471_p7 }
  0x4c   : > { %s3202_s14 = sshll.u32 %s463_s27, 2  ;;  %s4908_s0 = sld [smem:[#allocation24_spill]] }
  0x4d   : > { %p474_p8 = pneg %p4136_p1  ;;  %s4147_s18 = scalar_lea.vmem [#allocation10], %s3198_s15 }
  0x4e   : > { %s4149_s17 = scalar_lea.vmem [#allocation11], %s3198_s15 }
  0x4f   : > { %p475_p9 = pnand %p474_p8, %p470_p12 }
  0x50   : > { %v3928_v0 = vmov (!%p475_p9), 0.0  }
  0x51   : > { %478 = sbr.rel (%p475_p9) target bundleno = 88 (0x58), region = 64  ;;  %479 = vst [vmem:[#allocation2] sm:$0x1] (!%p475_p9), %v3928_v0  ;;  %480 = vst [vmem:[#allocation3] sm:$0x1] (!%p475_p9), %v3928_v0 }
  0x52   : > { %s4143_s16 = scalar_lea.vmem %s4908_s0, %s3202_s14 }
  0x58 PF: > { %p3203_p10 = scmp.ne.s32.totalorder %s3907_s26, 0 }
  0x59   : > { %s4909_s1 = sld [smem:[#allocation25_spill]] (!%p3203_p10)  ;;  %vm548_vm0 = vcmask (!%p3203_p10), 130048   ;;  %v3666_v2 = vld [vmem:[%s4143_s16] sm:$0xff] (!%p3203_p10)   ;;  %v3667_v3 = vld [vmem:[%s4143_s16 + $0x8] sm:$0xff] (!%p3203_p10)   ;;  %v3668_v4 = vld [vmem:[%s4143_s16 + $0x10] sm:$0xff] (!%p3203_p10)   ;;  %s4910_s2 = sld [smem:[#allocation26_spill]] (!%p3203_p10) }
  0x5a   : > { %483 = sbr.rel (%p3203_p10) target bundleno = 588 (0x24c), region = 68  ;;  %3408 = vmatprep.mubr.msk.bf16.mxu0 (!%p3203_p10), %vm548_vm0, %v3666_v2  ;;  %v3669_v5 = vld [vmem:[%s4143_s16 + $0x18] sm:$0xff] (!%p3203_p10)   ;;  %v3670_v6 = vld [vmem:[%s4143_s16 + $0x20] sm:$0xff] (!%p3203_p10)   ;;  %v3671_v8 = vld [vmem:[%s4143_s16 + $0x28] sm:$0xff] (!%p3203_p10)   ;;  %vm779_vm1 = vcmask (!%p3203_p10), 523264  }
  0x5b   : > { %v3674_v7 = vld [vmem:[%s4863_s4] sm:$0xff] (!%p3203_p10)   ;;  %v3672_v9 = vld [vmem:[%s4143_s16 + $0x30] sm:$0xff] (!%p3203_p10)   ;;  %v3673_v10 = vld [vmem:[%s4143_s16 + $0x38] sm:$0xff] (!%p3203_p10)  }
  0x5c   : > { %3424 = vmatprep.subr.bf16.mxu1 (!%p3203_p10), %v3674_v7  ;;  %v3675_v11 = vld [vmem:[%s4863_s4 + $0x8] sm:$0xff] (!%p3203_p10)   ;;  %v3676_v12 = vld [vmem:[%s4863_s4 + $0x10] sm:$0xff] (!%p3203_p10)   ;;  %v3677_v13 = vld [vmem:[%s4863_s4 + $0x18] sm:$0xff] (!%p3203_p10)  }
  0x5d   : > { %3425 = vmatpush3.bf16.msra.mxu1 (!%p3203_p10), %v3674_v7  ;;  %v4191_v16 = vld [vmem:[%s4862_s3] ss:$0 sm:$0xff] (!%p3203_p10) }
  0x5e   : > { %3426 = vmatprep.subr.bf16.mxu1 (!%p3203_p10), %v3675_v11 }
  0x5f   : > { %v3665_v1 = vld [vmem:[%s4909_s1] sm:$0xff] (!%p3203_p10)  }
  0x60   : > { %3406 = vmatprep.subr.bf16.mxu0 (!%p3203_p10), %v3665_v1  ;;  %v4186_v14 = vld [vmem:[%s4910_s2] ss:$0 sm:$0xff] (!%p3203_p10) }
  0x61   : > { %3407 = vmatpush3.bf16.msra.mxu0 %v3665_v1  ;;  %3427 = vmatpush3.bf16.msra.mxu1 %v3675_v11 }
  0x62   : > { %3428 = vmatprep.subr.bf16.mxu1 %v3676_v12 }
  0x64   : > { %3409 = vmatmul.mubr.msk.bf16.vlgmr.msra.gmra.mrb[0].mxu0 %vm548_vm0, %v3667_v3 }
  0x65   : > { %3412 = vmatprep.mubr.msk.bf16.mxu0 %vm548_vm0, %v3668_v4  ;;  %3429 = vmatpush3.bf16.msra.mxu1 %v3676_v12 }
  0x66   : > { %3430 = vmatprep.subr.bf16.mxu1 %v3677_v13 }
  0x69   : > { %3431 = vmatpush3.bf16.msra.mxu1 %v3677_v13 }
  0x6c   : > { %3413 = vmatmul.mubr.msk.bf16.gmra.mrb[4].mxu0 %vm548_vm0, %v3669_v5 }
  0x6d   : > { %3416 = vmatprep.mubr.msk.bf16.mxu0 %vm548_vm0, %v3670_v6 }
  0x74   : > { %3417 = vmatmul.mubr.msk.bf16.gmra.mrb[8].mxu0 %vm548_vm0, %v3671_v8 }
  0x75   : > { %3420 = vmatprep.mubr.msk.bf16.mxu0 %vm548_vm0, %v3672_v9 }
  0x7c   : > { %3421 = vmatmul.mubr.msk.bf16.gmra.mrb[12].mxu0 %vm548_vm0, %v3673_v10 }
 0x137   : > { %v3410_v15 = vpop.f32.mrb[0].mxu0 }
 0x138   : > { %v679_v17 = vmul.f32 %v3410_v15, %v4186_v14  ;;  %v607_v18 = vpop.f32.mrb[1].mxu0 }
 0x139   : > { %v677_v19 = vmul.f32 %v4186_v14, %v607_v18  ;;  %v3411_v20 = vpop.f32.mrb[2].mxu0 }
 0x13a   : > { %v702_v21 = vadd.f32 %v4191_v16, %v679_v17  ;;  %v680_v22 = vmul.f32 %v3411_v20, %v4186_v14  ;;  %v610_v23 = vpop.f32.mrb[3].mxu0 }
 0x13b   : > { %v700_v24 = vadd.f32 %v4191_v16, %v677_v19  ;;  %v678_v25 = vmul.f32 %v4186_v14, %v610_v23 }
 0x13c   : > { %v703_v26 = vadd.f32 %v4191_v16, %v680_v22  ;;  %v718_v28 = vmax.f32 %v702_v21, 0.0 }
 0x13d   : > { %v701_v27 = vadd.f32 %v4191_v16, %v678_v25  ;;  %v716_v30 = vmax.f32 %v700_v24, 0.0 }
 0x13e   : > { %v719_v29 = vmax.f32 %v703_v26, 0.0 }
 0x13f   : > { %v717_v31 = vmax.f32 %v701_v27, 0.0  ;;  %v3414_v32 = vpop.f32.mrb[4].mxu0 }
 0x140   : > { %v733_v33 = vpack.c.bf16 %v719_v29, %v718_v28  ;;  %v683_v34 = vmul.f32 %v3414_v32, %v4186_v14  ;;  %v623_v35 = vpop.f32.mrb[5].mxu0 }
 0x141   : > { %v681_v36 = vmul.f32 %v4186_v14, %v623_v35  ;;  %v3415_v37 = vpop.f32.mrb[6].mxu0  ;;  %v732_v38 = vpack.c.bf16 %v717_v31, %v716_v30 }
 0x142   : > { %v706_v39 = vadd.f32 %v4191_v16, %v683_v34  ;;  %v684_v40 = vmul.f32 %v3415_v37, %v4186_v14  ;;  %v626_v41 = vpop.f32.mrb[7].mxu0 }
 0x143   : > { %v704_v42 = vadd.f32 %v4191_v16, %v681_v36  ;;  %v682_v43 = vmul.f32 %v4186_v14, %v626_v41  ;;  %3432 = vmatprep.mubr.msk.bf16.mxu1 %vm779_vm1, %v732_v38 }
 0x144   : > { %v707_v44 = vadd.f32 %v4191_v16, %v684_v40  ;;  %3433 = vmatmul.mubr.msk.bf16.vlgmr.msra.gmra.mrb[0].mxu1 %vm779_vm1, %v733_v33  ;;  %v722_v46 = vmax.f32 %v706_v39, 0.0 }
 0x145   : > { %v705_v45 = vadd.f32 %v4191_v16, %v682_v43  ;;  %v720_v48 = vmax.f32 %v704_v42, 0.0 }
 0x146   : > { %v723_v47 = vmax.f32 %v707_v44, 0.0 }
 0x147   : > { %v721_v49 = vmax.f32 %v705_v45, 0.0  ;;  %v3418_v50 = vpop.f32.mrb[8].mxu0 }
 0x148   : > { %v735_v51 = vpack.c.bf16 %v723_v47, %v722_v46  ;;  %v687_v52 = vmul.f32 %v3418_v50, %v4186_v14  ;;  %v639_v53 = vpop.f32.mrb[9].mxu0 }
 0x149   : > { %v734_v54 = vpack.c.bf16 %v721_v49, %v720_v48  ;;  %v685_v55 = vmul.f32 %v4186_v14, %v639_v53  ;;  %v3419_v56 = vpop.f32.mrb[10].mxu0 }
 0x14a   : > { %v710_v57 = vadd.f32 %v4191_v16, %v687_v52  ;;  %v688_v58 = vmul.f32 %v3419_v56, %v4186_v14  ;;  %v642_v59 = vpop.f32.mrb[11].mxu0 }
 0x14b   : > { %v708_v60 = vadd.f32 %v4191_v16, %v685_v55  ;;  %v686_v61 = vmul.f32 %v4186_v14, %v642_v59  ;;  %3436 = vmatprep.mubr.msk.bf16.mxu1 %vm779_vm1, %v734_v54 }
 0x14c   : > { %v711_v62 = vadd.f32 %v4191_v16, %v688_v58  ;;  %3437 = vmatmul.mubr.msk.bf16.gmra.mrb[4].mxu1 %vm779_vm1, %v735_v51  ;;  %v726_v0 = vmax.f32 %v710_v57, 0.0 }
 0x14d   : > { %v709_v63 = vadd.f32 %v4191_v16, %v686_v61  ;;  %v724_v2 = vmax.f32 %v708_v60, 0.0 }
 0x14e   : > { %v727_v1 = vmax.f32 %v711_v62, 0.0 }
 0x14f   : > { %v725_v3 = vmax.f32 %v709_v63, 0.0  ;;  %v3422_v4 = vpop.f32.mrb[12].mxu0 }
 0x150   : > { %v737_v5 = vpack.c.bf16 %v727_v1, %v726_v0  ;;  %v691_v6 = vmul.f32 %v3422_v4, %v4186_v14  ;;  %v655_v7 = vpop.f32.mrb[13].mxu0 }
 0x151   : > { %v736_v8 = vpack.c.bf16 %v725_v3, %v724_v2  ;;  %v689_v9 = vmul.f32 %v4186_v14, %v655_v7  ;;  %v3423_v10 = vpop.f32.mrb[14].mxu0 }
 0x152   : > { %v714_v11 = vadd.f32 %v4191_v16, %v691_v6  ;;  %v692_v12 = vmul.f32 %v3423_v10, %v4186_v14  ;;  %v658_v13 = vpop.f32.mrb[15].mxu0 }
 0x153   : > { %v712_v15 = vadd.f32 %v4191_v16, %v689_v9  ;;  %v690_v17 = vmul.f32 %v4186_v14, %v658_v13  ;;  %3440 = vmatprep.mubr.msk.bf16.mxu1 %vm779_vm1, %v736_v8  ;;  %v4236_v14 = vld [vmem:[%s4864_s5] ss:$0 sm:$0xff] }
 0x154   : > { %v715_v18 = vadd.f32 %v4191_v16, %v692_v12  ;;  %3441 = vmatmul.mubr.msk.bf16.gmra.mrb[8].mxu1 %vm779_vm1, %v737_v5  ;;  %v730_v20 = vmax.f32 %v714_v11, 0.0 }
 0x155   : > { %v713_v19 = vadd.f32 %v4191_v16, %v690_v17  ;;  %v728_v22 = vmax.f32 %v712_v15, 0.0 }
 0x156   : > { %v731_v21 = vmax.f32 %v715_v18, 0.0 }
 0x157   : > { %v729_v23 = vmax.f32 %v713_v19, 0.0 }
 0x158   : > { %v739_v24 = vpack.c.bf16 %v731_v21, %v730_v20 }
 0x159   : > { %v738_v25 = vpack.c.bf16 %v729_v23, %v728_v22 }
 0x15b   : > { %3444 = vmatprep.mubr.msk.bf16.mxu1 %vm779_vm1, %v738_v25 }
 0x15c   : > { %3445 = vmatmul.mubr.msk.bf16.gmra.mrb[12].mxu1 %vm779_vm1, %v739_v24 }
 0x217   : > { %v3434_v26 = vpop.f32.mrb[0].mxu1 }
 0x218   : > { %v838_v27 = vpop.f32.mrb[1].mxu1  ;;  %v847_v30 = vadd.f32 %v3434_v26, %v4236_v14 }
 0x219   : > { %v839_v28 = vadd.f32 %v4236_v14, %v838_v27  ;;  %v3435_v16 = vpop.f32.mrb[2].mxu1 }
 0x21a   : > { %v841_v29 = vpop.f32.mrb[3].mxu1  ;;  %v850_v33 = vadd.f32 %v3435_v16, %v4236_v14  ;;  %v928_v36 = vmul.f32 %v847_v30, %v847_v30 }
 0x21b   : > { %v842_v31 = vadd.f32 %v4236_v14, %v841_v29  ;;  %v926_v32 = vmul.f32 %v839_v28, %v839_v28 }
 0x21c   : > { %v929_v41 = vmul.f32 %v850_v33, %v850_v33 }
 0x21d   : > { %v902_v34 = vadd.f32 %v842_v31, %v839_v28  ;;  %v927_v35 = vmul.f32 %v842_v31, %v842_v31 }
 0x21f   : > { %v903_v37 = vadd.f32 %v902_v34, %v847_v30  ;;  %v942_v38 = vadd.f32 %v927_v35, %v926_v32  ;;  %v3438_v39 = vpop.f32.mrb[4].mxu1 }
 0x220   : > { %v854_v40 = vpop.f32.mrb[5].mxu1  ;;  %v863_v46 = vadd.f32 %v3438_v39, %v4236_v14 }
 0x221   : > { %v943_v42 = vadd.f32 %v942_v38, %v928_v36  ;;  %v855_v43 = vadd.f32 %v4236_v14, %v854_v40  ;;  %v904_v44 = vadd.f32 %v903_v37, %v850_v33  ;;  %v3439_v45 = vpop.f32.mrb[6].mxu1 }
 0x222   : > { %v857_v47 = vpop.f32.mrb[7].mxu1  ;;  %v866_v53 = vadd.f32 %v3439_v45, %v4236_v14  ;;  %v932_v56 = vmul.f32 %v863_v46, %v863_v46 }
 0x223   : > { %v905_v48 = vadd.f32 %v904_v44, %v855_v43  ;;  %v930_v49 = vmul.f32 %v855_v43, %v855_v43  ;;  %v944_v50 = vadd.f32 %v943_v42, %v929_v41  ;;  %v858_v51 = vadd.f32 %v4236_v14, %v857_v47 }
 0x224   : > { %v933_v61 = vmul.f32 %v866_v53, %v866_v53 }
 0x225   : > { %v945_v52 = vadd.f32 %v944_v50, %v930_v49  ;;  %v906_v54 = vadd.f32 %v905_v48, %v858_v51  ;;  %v931_v55 = vmul.f32 %v858_v51, %v858_v51  ;;  %v901_v49 = vld [vmem:[#allocation2] sm:$0x1]  ;;  %v925_v51 = vld [vmem:[#allocation3] sm:$0x1] }
 0x227   : > { %v907_v57 = vadd.f32 %v906_v54, %v863_v46  ;;  %v946_v58 = vadd.f32 %v945_v52, %v931_v55  ;;  %v3442_v59 = vpop.f32.mrb[8].mxu1 }
 0x228   : > { %v870_v60 = vpop.f32.mrb[9].mxu1  ;;  %v879_v2 = vadd.f32 %v3442_v59, %v4236_v14 }
 0x229   : > { %v947_v62 = vadd.f32 %v946_v58, %v932_v56  ;;  %v871_v63 = vadd.f32 %v4236_v14, %v870_v60  ;;  %v908_v0 = vadd.f32 %v907_v57, %v866_v53  ;;  %v3443_v1 = vpop.f32.mrb[10].mxu1 }
 0x22a   : > { %v873_v3 = vpop.f32.mrb[11].mxu1  ;;  %v882_v9 = vadd.f32 %v3443_v1, %v4236_v14  ;;  %v936_v12 = vmul.f32 %v879_v2, %v879_v2 }
 0x22b   : > { %v909_v4 = vadd.f32 %v908_v0, %v871_v63  ;;  %v934_v5 = vmul.f32 %v871_v63, %v871_v63  ;;  %v948_v6 = vadd.f32 %v947_v62, %v933_v61  ;;  %v874_v7 = vadd.f32 %v4236_v14, %v873_v3 }
 0x22c   : > { %v937_v19 = vmul.f32 %v882_v9, %v882_v9 }
 0x22d   : > { %v949_v8 = vadd.f32 %v948_v6, %v934_v5  ;;  %v910_v10 = vadd.f32 %v909_v4, %v874_v7  ;;  %v935_v11 = vmul.f32 %v874_v7, %v874_v7 }
 0x22f   : > { %v911_v13 = vadd.f32 %v910_v10, %v879_v2  ;;  %v950_v15 = vadd.f32 %v949_v8, %v935_v11  ;;  %v3446_v17 = vpop.f32.mrb[12].mxu1 }
 0x230   : > { %v886_v18 = vpop.f32.mrb[13].mxu1  ;;  %v895_v24 = vadd.f32 %v3446_v17, %v4236_v14 }
 0x231   : > { %v951_v20 = vadd.f32 %v950_v15, %v936_v12  ;;  %v887_v21 = vadd.f32 %v4236_v14, %v886_v18  ;;  %v912_v22 = vadd.f32 %v911_v13, %v882_v9  ;;  %v3447_v23 = vpop.f32.mrb[14].mxu1 }
 0x232   : > { %v889_v25 = vpop.f32.mrb[15].mxu1  ;;  %v898_v30 = vadd.f32 %v3447_v23, %v4236_v14  ;;  %v940_v33 = vmul.f32 %v895_v24, %v895_v24 }
 0x233   : > { %v913_v26 = vadd.f32 %v912_v22, %v887_v21  ;;  %v938_v27 = vmul.f32 %v887_v21, %v887_v21  ;;  %v952_v28 = vadd.f32 %v951_v20, %v937_v19  ;;  %v890_v16 = vadd.f32 %v4236_v14, %v889_v25 }
 0x234   : > { %v941_v36 = vmul.f32 %v898_v30, %v898_v30 }
 0x235   : > { %v953_v29 = vadd.f32 %v952_v28, %v938_v27  ;;  %v914_v31 = vadd.f32 %v913_v26, %v890_v16  ;;  %v939_v32 = vmul.f32 %v890_v16, %v890_v16 }
 0x237   : > { %v915_v34 = vadd.f32 %v914_v31, %v895_v24  ;;  %v954_v35 = vadd.f32 %v953_v29, %v939_v32 }
 0x239   : > { %v916_v37 = vadd.f32 %v915_v34, %v898_v30  ;;  %v955_v38 = vadd.f32 %v954_v35, %v940_v33 }
 0x23b   : > { %v917_v39 = vrot.slane %v916_v37, 4  ;;  %v956_v40 = vadd.f32 %v955_v38, %v941_v36 }
 0x23d   : > { %v918_v41 = vadd.f32 %v917_v39, %v916_v37  ;;  %v957_v42 = vrot.slane %v956_v40, 4 }
 0x23f   : > { %v919_v43 = vrot.slane %v918_v41, 2  ;;  %v958_v44 = vadd.f32 %v957_v42, %v956_v40 }
 0x241   : > { %v920_v45 = vadd.f32 %v919_v43, %v918_v41  ;;  %v959_v46 = vrot.slane %v958_v44, 2 }
 0x243   : > { %v921_v47 = vrot.slane %v920_v45, 1  ;;  %v960_v48 = vadd.f32 %v959_v46, %v958_v44 }
 0x245   : > { %v922_v14 = vadd.f32 %v921_v47, %v920_v45  ;;  %v961_v50 = vrot.slane %v960_v48, 1 }
 0x247   : > { %v923_v52 = vadd.f32 %v922_v14, %v901_v49  ;;  %v962_v53 = vadd.f32 %v961_v50, %v960_v48 }
 0x249   : > { %924 = vst [vmem:[#allocation2] sm:$0x1] %v923_v52  ;;  %v963_v54 = vadd.f32 %v962_v53, %v925_v51 }
 0x24b   : > { %964 = vst [vmem:[#allocation3] sm:$0x1] %v963_v54 }
 0x24c PF: > { %p3236_p13 = scmp.ne.s32.totalorder %s3907_s26, 1 }
 0x24e   : > { %968 = sbr.rel (%p3236_p13) target bundleno = 1573 (0x625), region = 72 }
 0x255   : > { %970 = sbr.rel (%p4136_p1) target bundleno = 607 (0x25f), region = 76  ;;  %v3929_v55 = vmov (!%p4136_p1), 0.0  }
 0x256   : > { %971 = vst [vmem:[#allocation7] sm:$0x1] (!%p4136_p1), %v3929_v55  ;;  %972 = vst [vmem:[#allocation8] sm:$0xff] (!%p4136_p1), %v3929_v55 }
 0x257   : > { %973 = vst [vmem:[#allocation8 + $0x8] sm:$0xff] (!%p4136_p1), %v3929_v55  ;;  %974 = vst [vmem:[#allocation8 + $0x10] sm:$0xff] (!%p4136_p1), %v3929_v55 }
 0x258   : > { %975 = vst [vmem:[#allocation8 + $0x18] sm:$0xff] (!%p4136_p1), %v3929_v55  ;;  %976 = vst [vmem:[#allocation8 + $0x20] sm:$0xff] (!%p4136_p1), %v3929_v55 }
 0x259   : > { %977 = vst [vmem:[#allocation8 + $0x28] sm:$0xff] (!%p4136_p1), %v3929_v55  ;;  %978 = vst [vmem:[#allocation8 + $0x30] sm:$0xff] (!%p4136_p1), %v3929_v55 }
 0x25a   : > { %979 = vst [vmem:[#allocation8 + $0x38] sm:$0xff] (!%p4136_p1), %v3929_v55  ;;  %980 = vst [vmem:[#allocation8 + $0x40] sm:$0xff] (!%p4136_p1), %v3929_v55 }
 0x25b   : > { %981 = vst [vmem:[#allocation8 + $0x48] sm:$0xff] (!%p4136_p1), %v3929_v55  ;;  %982 = vst [vmem:[#allocation8 + $0x50] sm:$0xff] (!%p4136_p1), %v3929_v55 }
 0x25c   : > { %983 = vst [vmem:[#allocation8 + $0x58] sm:$0xff] %v3929_v55  ;;  %984 = vst [vmem:[#allocation8 + $0x60] sm:$0xff] %v3929_v55 }
 0x25d   : > { %985 = vst [vmem:[#allocation8 + $0x68] sm:$0xff] %v3929_v55  ;;  %986 = vst [vmem:[#allocation8 + $0x70] sm:$0xff] %v3929_v55 }
 0x25e   : > { %987 = vst [vmem:[#allocation8 + $0x78] sm:$0xff] %v3929_v55 }
 0x25f PF: > { %p3237_p0 = scmp.ne.s32.totalorder %s3899_s24, 0 }
 0x260   : > { %v3930_v56 = vmov (!%p3237_p0), -inf   ;;  %v3931_v57 = vmov (!%p3237_p0), inf  }
 0x261   : > { %990 = sbr.rel (%p3237_p0) target bundleno = 616 (0x268), region = 80  ;;  %991 = vst [vmem:[%s4147_s18] sm:$0xff] (!%p3237_p0), %v3930_v56  ;;  %992 = vst [vmem:[%s4149_s17] sm:$0xff] (!%p3237_p0), %v3931_v57 }
 0x268 PF: > { %s4911_s1 = sld [smem:[#allocation25_spill]]  ;;  %vm1071_vm2 = vcmask 130048   ;;  %v3679_v59 = vld [vmem:[%s4143_s16] sm:$0xff]   ;;  %v3680_v60 = vld [vmem:[%s4143_s16 + $0x8] sm:$0xff]   ;;  %v3681_v61 = vld [vmem:[%s4143_s16 + $0x10] sm:$0xff]   ;;  %s4912_s2 = sld [smem:[#allocation26_spill]] }
 0x269   : > { %3450 = vmatprep.mubr.msk.bf16.mxu0 %vm1071_vm2, %v3679_v59  ;;  %v3682_v62 = vld [vmem:[%s4143_s16 + $0x18] sm:$0xff]   ;;  %v3683_v63 = vld [vmem:[%s4143_s16 + $0x20] sm:$0xff]   ;;  %v3684_v1 = vld [vmem:[%s4143_s16 + $0x28] sm:$0xff]   ;;  %vm1302_vm3 = vcmask 523264  }
 0x26a   : > { %v3687_v0 = vld [vmem:[%s4863_s4] sm:$0xff]   ;;  %v3685_v2 = vld [vmem:[%s4143_s16 + $0x30] sm:$0xff]   ;;  %v3686_v3 = vld [vmem:[%s4143_s16 + $0x38] sm:$0xff]  }
 0x26b   : > { %3466 = vmatprep.subr.bf16.mxu1 %v3687_v0  ;;  %v3688_v4 = vld [vmem:[%s4863_s4 + $0x8] sm:$0xff]   ;;  %v3689_v5 = vld [vmem:[%s4863_s4 + $0x10] sm:$0xff]   ;;  %v3690_v6 = vld [vmem:[%s4863_s4 + $0x18] sm:$0xff]  }
 0x26c   : > { %3467 = vmatpush3.bf16.msra.mxu1 %v3687_v0  ;;  %v1693_v7 = vld [vmem:[#allocation4] sm:$0xff]  ;;  %v4299_v13 = vld [vmem:[%s4862_s3] ss:$0 sm:$0xff] }
 0x26d   : > { %3468 = vmatprep.subr.bf16.mxu1 %v3688_v4  ;;  %v1694_v8 = vld [vmem:[#allocation4 + $0x20] sm:$0xff] }
 0x26e   : > { %v3678_v58 = vld [vmem:[%s4911_s1] sm:$0xff]   ;;  %v3270_v9 = vcombine.low %v1693_v7, %v1694_v8  ;;  %v3271_v10 = vcombine.high %v1693_v7, %v1694_v8 }
 0x26f   : > { %3448 = vmatprep.subr.bf16.mxu0 %v3678_v58  ;;  %v4294_v11 = vld [vmem:[%s4912_s2] ss:$0 sm:$0xff]  ;;  %v1695_v31 = vld [vmem:[#allocation4 + $0x40] sm:$0xff] }
 0x270   : > { %3449 = vmatpush3.bf16.msra.mxu0 %v3678_v58  ;;  %3469 = vmatpush3.bf16.msra.mxu1 %v3688_v4  ;;  %v1696_v32 = vld [vmem:[#allocation4 + $0x60] sm:$0xff] }
 0x271   : > { %3470 = vmatprep.subr.bf16.mxu1 %v3689_v5  ;;  %v3273_v42 = vcombine.high %v1695_v31, %v1696_v32  ;;  %v1697_v45 = vld [vmem:[#allocation4 + $0x80] sm:$0xff]  ;;  %v3272_v49 = vcombine.low %v1695_v31, %v1696_v32 }
 0x272   : > { %v1698_v46 = vld [vmem:[#allocation4 + $0xa0] sm:$0xff] }
 0x273   : > { %3451 = vmatmul.mubr.msk.bf16.vlgmr.msra.gmra.mrb[0].mxu0 %vm1071_vm2, %v3680_v60  ;;  %v3275_v51 = vcombine.high %v1697_v45, %v1698_v46  ;;  %v1699_v55 = vld [vmem:[#allocation4 + $0xc0] sm:$0xff] }
 0x274   : > { %3454 = vmatprep.mubr.msk.bf16.mxu0 %vm1071_vm2, %v3681_v61  ;;  %3471 = vmatpush3.bf16.msra.mxu1 %v3689_v5  ;;  %v1700_v56 = vld [vmem:[#allocation4 + $0xe0] sm:$0xff] }
 0x275   : > { %3472 = vmatprep.subr.bf16.mxu1 %v3690_v6  ;;  %v1702_v7 = vld [vmem:[#allocation4 + $0x120] sm:$0xff] }
 0x278   : > { %3473 = vmatpush3.bf16.msra.mxu1 %v3690_v6  ;;  %v1701_v6 = vld [vmem:[#allocation4 + $0x100] sm:$0xff] }
 0x279   : > { %1789 = vmatprep.subr.bf16.mxu1 %v3271_v10  ;;  %v3276_v10 = vcombine.low %v1699_v55, %v1700_v56 }
 0x27b   : > { %3455 = vmatmul.mubr.msk.bf16.gmra.mrb[4].mxu0 %vm1071_vm2, %v3682_v62 }
 0x27c   : > { %3458 = vmatprep.mubr.msk.bf16.mxu0 %vm1071_vm2, %v3683_v63  ;;  %v3274_v63 = vcombine.low %v1697_v45, %v1698_v46  ;;  %v1707_v46 = vld [vmem:[#allocation4 + $0x1c0] sm:$0xff] }
 0x283   : > { %3459 = vmatmul.mubr.msk.bf16.gmra.mrb[8].mxu0 %vm1071_vm2, %v3684_v1 }
 0x284   : > { %3462 = vmatprep.mubr.msk.bf16.mxu0 %vm1071_vm2, %v3685_v2 }
 0x28b   : > { %3463 = vmatmul.mubr.msk.bf16.gmra.mrb[12].mxu0 %vm1071_vm2, %v3686_v3  ;;  %v3277_v3 = vcombine.high %v1699_v55, %v1700_v56  ;;  %v995_v56 = vld [vmem:[#allocation3] sm:$0x1] }
 0x346   : > { %v3452_v12 = vpop.f32.mrb[0].mxu0 }
 0x347   : > { %v1202_v15 = vmul.f32 %v3452_v12, %v4294_v11  ;;  %v1130_v17 = vpop.f32.mrb[1].mxu0 }
 0x348   : > { %v1200_v18 = vmul.f32 %v4294_v11, %v1130_v17  ;;  %v3453_v19 = vpop.f32.mrb[2].mxu0  ;;  %v3279_v17 = vcombine.high %v1701_v6, %v1702_v7 }
 0x349   : > { %v1225_v20 = vadd.f32 %v4299_v13, %v1202_v15  ;;  %v1203_v21 = vmul.f32 %v3453_v19, %v4294_v11  ;;  %v1133_v22 = vpop.f32.mrb[3].mxu0 }
 0x34a   : > { %v1223_v23 = vadd.f32 %v4299_v13, %v1200_v18  ;;  %v1201_v24 = vmul.f32 %v4294_v11, %v1133_v22 }
 0x34b   : > { %v1226_v25 = vadd.f32 %v4299_v13, %v1203_v21  ;;  %v1241_v27 = vmax.f32 %v1225_v20, 0.0 }
 0x34c   : > { %v1224_v26 = vadd.f32 %v4299_v13, %v1201_v24  ;;  %v1239_v16 = vmax.f32 %v1223_v23, 0.0 }
 0x34d   : > { %v1242_v28 = vmax.f32 %v1226_v25, 0.0 }
 0x34e   : > { %v1240_v29 = vmax.f32 %v1224_v26, 0.0  ;;  %v3456_v30 = vpop.f32.mrb[4].mxu0 }
 0x34f   : > { %v1256_v33 = vpack.c.bf16 %v1242_v28, %v1241_v27  ;;  %v1206_v34 = vmul.f32 %v3456_v30, %v4294_v11  ;;  %v1146_v35 = vpop.f32.mrb[5].mxu0  ;;  %v3278_v27 = vcombine.low %v1701_v6, %v1702_v7  ;;  %v1004_v7 = vld [vmem:[%s4866_s7] sm:$0x1] }
 0x350   : > { %v1204_v36 = vmul.f32 %v4294_v11, %v1146_v35  ;;  %v3457_v37 = vpop.f32.mrb[6].mxu0  ;;  %v1255_v38 = vpack.c.bf16 %v1240_v29, %v1239_v16 }
 0x351   : > { %v1229_v39 = vadd.f32 %v4299_v13, %v1206_v34  ;;  %v1207_v40 = vmul.f32 %v3457_v37, %v4294_v11  ;;  %v1149_v41 = vpop.f32.mrb[7].mxu0 }
 0x352   : > { %v1227_v43 = vadd.f32 %v4299_v13, %v1204_v36  ;;  %v1205_v44 = vmul.f32 %v4294_v11, %v1149_v41  ;;  %3474 = vmatprep.mubr.msk.bf16.mxu1 %vm1302_vm3, %v1255_v38 }
 0x353   : > { %v1230_v47 = vadd.f32 %v4299_v13, %v1207_v40  ;;  %3475 = vmatmul.mubr.msk.bf16.vlgmr.msra.gmra.mrb[0].mxu1 %vm1302_vm3, %v1256_v33  ;;  %v1245_v14 = vmax.f32 %v1229_v39, 0.0  ;;  %v1704_v40 = vld [vmem:[#allocation4 + $0x160] sm:$0xff] }
 0x354   : > { %v1228_v48 = vadd.f32 %v4299_v13, %v1205_v44  ;;  %1790 = vmatpush1.bf16.msra.mxu1 %v3270_v9  ;;  %v1243_v52 = vmax.f32 %v1227_v43, 0.0  ;;  %v1705_v43 = vld [vmem:[#allocation4 + $0x180] sm:$0xff] }
 0x355   : > { %v1246_v50 = vmax.f32 %v1230_v47, 0.0  ;;  %1791 = vmatprep.subr.bf16.mxu1 %v3273_v42  ;;  %v1706_v44 = vld [vmem:[#allocation4 + $0x1a0] sm:$0xff] }
 0x356   : > { %v1244_v53 = vmax.f32 %v1228_v48, 0.0  ;;  %v3460_v54 = vpop.f32.mrb[8].mxu0  ;;  %v3282_v45 = vcombine.low %v1705_v43, %v1706_v44  ;;  %v1708_v47 = vld [vmem:[#allocation4 + $0x1e0] sm:$0xff] }
 0x357   : > { %v1258_v57 = vpack.c.bf16 %v1246_v50, %v1245_v14  ;;  %v1210_v58 = vmul.f32 %v3460_v54, %v4294_v11  ;;  %v1162_v59 = vpop.f32.mrb[9].mxu0  ;;  %v3285_v48 = vcombine.high %v1707_v46, %v1708_v47  ;;  %v3932_v14 = vmov 0   ;;  %v4342_v50 = vld [vmem:[#allocation4 + $0x10] sm:$0xff]  ;;  %v993_v54 = vld [vmem:[#allocation2] sm:$0x1] }
 0x358   : > { %v1257_v60 = vpack.c.bf16 %v1244_v53, %v1243_v52  ;;  %v1208_v61 = vmul.f32 %v4294_v11, %v1162_v59  ;;  %v3461_v62 = vpop.f32.mrb[10].mxu0  ;;  %1792 = vmatpush1.bf16.msra.mxu1 %v3272_v49  ;;  %v3284_v49 = vcombine.low %v1707_v46, %v1708_v47  ;;  %v994_v55 = vmul.f32 0.001953125, %v993_v54 }
 0x359   : > { %v1233_v0 = vadd.f32 %v4299_v13, %v1210_v58  ;;  %v1211_v1 = vmul.f32 %v3461_v62, %v4294_v11  ;;  %v1165_v2 = vpop.f32.mrb[11].mxu0  ;;  %1793 = vmatprep.subr.bf16.mxu1 %v3275_v51  ;;  %v4344_v51 = vld [vmem:[#allocation4 + $0x30] sm:$0xff] }
 0x35a   : > { %v1231_v4 = vadd.f32 %v4299_v13, %v1208_v61  ;;  %v1209_v5 = vmul.f32 %v4294_v11, %v1165_v2  ;;  %3478 = vmatprep.mubr.msk.bf16.mxu1 %vm1302_vm3, %v1257_v60  ;;  %v3303_v52 = vcombine.high %v4342_v50, %v4344_v51  ;;  %v3302_v53 = vcombine.low %v4342_v50, %v4344_v51 }
 0x35b   : > { %v1234_v8 = vadd.f32 %v4299_v13, %v1211_v1  ;;  %3479 = vmatmul.mubr.msk.bf16.gmra.mrb[4].mxu1 %vm1302_vm3, %v1258_v57  ;;  %v1249_v12 = vmax.f32 %v1233_v0, 0.0  ;;  %v996_v57 = vmul.f32 0.001953125, %v995_v56  ;;  %v997_v58 = vmul.f32 %v994_v55, %v994_v55 }
 0x35c   : > { %v1232_v9 = vadd.f32 %v4299_v13, %v1209_v5  ;;  %1794 = vmatpush1.bf16.msra.mxu1 %v3274_v63  ;;  %v1247_v18 = vmax.f32 %v1231_v4, 0.0  ;;  %v1000_v63 = vld [vmem:[%s4865_s6] sm:$0x1]  ;;  %v1425_v0 = vlaneseq  ;;  %v4357_v4 = vld [vmem:[#allocation4 + $0x28] sm:$0xff] }
 0x35d   : > { %v1250_v15 = vmax.f32 %v1234_v8, 0.0  ;;  %1795 = vmatprep.subr.bf16.mxu1 %v3277_v3  ;;  %v998_v59 = vsub.f32 %v996_v57, %v997_v58  ;;  %v4355_v3 = vld [vmem:[#allocation4 + $0x8] sm:$0xff] }
 0x35e   : > { %v1248_v19 = vmax.f32 %v1232_v9, 0.0  ;;  %v3464_v20 = vpop.f32.mrb[12].mxu0  ;;  %v4353_v2 = vshrl.u32 %v1425_v0, 7  ;;  %v3286_v6 = vcombine.low %v4355_v3, %v4357_v4 }
 0x35f   : > { %v1260_v21 = vpack.c.bf16 %v1250_v15, %v1249_v12  ;;  %v1214_v22 = vmul.f32 %v3464_v20, %v4294_v11  ;;  %v1178_v23 = vpop.f32.mrb[13].mxu0  ;;  %v999_v60 = vmax.f32 %v998_v59, 0.0 }
 0x360   : > { %v1259_v24 = vpack.c.bf16 %v1248_v19, %v1247_v18  ;;  %v1212_v25 = vmul.f32 %v4294_v11, %v1178_v23  ;;  %v3465_v26 = vpop.f32.mrb[14].mxu0  ;;  %1796 = vmatpush1.bf16.msra.mxu1 %v3276_v10  ;;  %v1427_v8 = vsub.s32 0, %v4353_v2  ;;  %v4368_v10 = vld [vmem:[%s4864_s5] ss:$0 sm:$0xff] }
 0x361   : > { %v1237_v28 = vadd.f32 %v4299_v13, %v1214_v22  ;;  %v1215_v16 = vmul.f32 %v3465_v26, %v4294_v11  ;;  %v1181_v29 = vpop.f32.mrb[15].mxu0  ;;  %1797 = vmatprep.subr.bf16.mxu1 %v3279_v17  ;;  %v1001_v61 = vadd.f32 1e-05, %v999_v60 }
 0x362   : > { %v1235_v30 = vadd.f32 %v4299_v13, %v1212_v25  ;;  %v1213_v31 = vmul.f32 %v4294_v11, %v1181_v29  ;;  %3482 = vmatprep.mubr.msk.bf16.mxu1 %vm1302_vm3, %v1259_v24  ;;  %v1703_v11 = vld [vmem:[#allocation4 + $0x140] sm:$0xff] }
 0x363   : > { %v1238_v32 = vadd.f32 %v4299_v13, %v1215_v16  ;;  %3483 = vmatmul.mubr.msk.bf16.gmra.mrb[8].mxu1 %vm1302_vm3, %v1260_v21  ;;  %v1253_v34 = vmax.f32 %v1237_v28, 0.0  ;;  %v3281_v41 = vcombine.high %v1703_v11, %v1704_v40  ;;  %v3280_v42 = vcombine.low %v1703_v11, %v1704_v40  ;;  %v2281_v40 = vld [vmem:[#allocation4 + $0x50] sm:$0xff] }
 0x364   : > { %v1236_v33 = vadd.f32 %v4299_v13, %v1213_v31  ;;  %1798 = vmatpush1.bf16.msra.mxu1 %v3278_v27  ;;  %v1251_v36 = vmax.f32 %v1235_v30, 0.0  ;;  %v3283_v13 = vcombine.high %v1705_v43, %v1706_v44  ;;  %3691 = vrsqrt.f32 %v1001_v61 }
 0x365   : > { %v1254_v35 = vmax.f32 %v1238_v32, 0.0  ;;  %1799 = vmatprep.subr.bf16.mxu1 %v3281_v41  ;;  %v2282_v41 = vld [vmem:[#allocation4 + $0x70] sm:$0xff] }
 0x366   : > { %v1252_v37 = vmax.f32 %v1236_v33, 0.0 }
 0x367   : > { %v1262_v38 = vpack.c.bf16 %v1254_v35, %v1253_v34 }
 0x368   : > { %v1261_v39 = vpack.c.bf16 %v1252_v37, %v1251_v36  ;;  %1800 = vmatpush1.bf16.msra.mxu1 %v3280_v42 }
 0x369   : > { %1801 = vmatprep.subr.bf16.mxu1 %v3283_v13 }
 0x36a   : > { %3486 = vmatprep.mubr.msk.bf16.mxu1 %vm1302_vm3, %v1261_v39 }
 0x36b   : > { %3487 = vmatmul.mubr.msk.bf16.gmra.mrb[12].mxu1 %vm1302_vm3, %v1262_v38 }
 0x36c   : > { %1802 = vmatpush1.bf16.msra.mxu1 %v3282_v45  ;;  %1821 = vmatprep.mubr.bf16.mxu1 %v3932_v14 }
 0x36d   : > { %1803 = vmatprep.subr.bf16.mxu1 %v3285_v48 }
 0x36e   : > { %v3692_v62 = vpop.eup %3691 }
 0x36f   : > { %v1003_v1 = vmul.f32 %v3692_v62, %v1000_v63 }
 0x370   : > { %1804 = vmatpush1.bf16.msra.mxu1 %v3284_v49 }
 0x371   : > { %2375 = vmatprep.subr.bf16.mxu1 %v3303_v52  ;;  %v1005_v5 = vmul.f32 %v1003_v1, %v994_v55  ;;  %v4370_v12 = vrot.slane %v1003_v1, %v1427_v8  ;;  %v3305_v52 = vcombine.high %v2281_v40, %v2282_v41 }
 0x373   : > { %v1006_v9 = vsub.f32 %v1004_v7, %v1005_v5  ;;  %v3304_v7 = vcombine.low %v2281_v40, %v2282_v41 }
 0x375   : > { %v4373_v18 = vrot.slane %v1006_v9, %v1427_v8 }
 0x426   : > { %v3476_v15 = vpop.f32.mrb[0].mxu1 }
 0x427   : > { %v1370_v17 = vadd.f32 %v3476_v15, %v4368_v10  ;;  %v1361_v19 = vpop.f32.mrb[1].mxu1 }
 0x428   : > { %v1362_v20 = vadd.f32 %v4368_v10, %v1361_v19  ;;  %v3477_v21 = vpop.f32.mrb[2].mxu1 }
 0x429   : > { %v1432_v22 = vmul.f32 %v4370_v12, %v1370_v17  ;;  %v1373_v23 = vadd.f32 %v3477_v21, %v4368_v10  ;;  %v1364_v24 = vpop.f32.mrb[3].mxu1  ;;  %v2284_v21 = vld [vmem:[#allocation4 + $0xb0] sm:$0xff] }
 0x42a   : > { %v1430_v25 = vmul.f32 %v4370_v12, %v1362_v20  ;;  %v1365_v26 = vadd.f32 %v4368_v10, %v1364_v24  ;;  %v2283_v20 = vld [vmem:[#allocation4 + $0x90] sm:$0xff] }
 0x42b   : > { %v1454_v27 = vadd.f32 %v4373_v18, %v1432_v22  ;;  %v1433_v28 = vmul.f32 %v4370_v12, %v1373_v23 }
 0x42c   : > { %v1452_v16 = vadd.f32 %v4373_v18, %v1430_v25  ;;  %v1431_v29 = vmul.f32 %v4370_v12, %v1365_v26 }
 0x42d   : > { %v1455_v30 = vadd.f32 %v4373_v18, %v1433_v28  ;;  %v1470_v33 = vmax.f32 %v1454_v27, 0.0  ;;  %v4427_v27 = vld [vmem:[#allocation4 + $0xd0] sm:$0xff] }
 0x42e   : > { %v1453_v31 = vadd.f32 %v4373_v18, %v1431_v29  ;;  %v3480_v32 = vpop.f32.mrb[4].mxu1  ;;  %v1468_v37 = vmax.f32 %v1452_v16, 0.0  ;;  %v4429_v28 = vld [vmem:[#allocation4 + $0xf0] sm:$0xff] }
 0x42f   : > { %v1471_v34 = vmax.f32 %v1455_v30, 0.0  ;;  %v1386_v35 = vadd.f32 %v3480_v32, %v4368_v10  ;;  %v1377_v36 = vpop.f32.mrb[5].mxu1  ;;  %v3306_v30 = vcombine.low %v2283_v20, %v2284_v21 }
 0x430   : > { %v1469_v38 = vmax.f32 %v1453_v31, 0.0  ;;  %v1378_v39 = vadd.f32 %v4368_v10, %v1377_v36  ;;  %v3481_v11 = vpop.f32.mrb[6].mxu1  ;;  %v3307_v31 = vcombine.high %v2283_v20, %v2284_v21  ;;  %v2289_v21 = vld [vmem:[#allocation4 + $0x150] sm:$0xff] }
 0x431   : > { %v4388_v42 = vpack.c.bf16 %v1471_v34, %v1470_v33  ;;  %v1436_v43 = vmul.f32 %v4370_v12, %v1386_v35  ;;  %v1389_v44 = vadd.f32 %v3481_v11, %v4368_v10  ;;  %v1380_v13 = vpop.f32.mrb[7].mxu1 }
 0x432   : > { %v4392_v45 = vpack.c.bf16 %v1469_v38, %v1468_v37  ;;  %v1434_v46 = vmul.f32 %v4370_v12, %v1378_v39  ;;  %v1381_v47 = vadd.f32 %v4368_v10, %v1380_v13  ;;  %v3309_v37 = vcombine.high %v4427_v27, %v4429_v28 }
 0x433   : > { %v1458_v48 = vadd.f32 %v4373_v18, %v1436_v43  ;;  %v1437_v49 = vmul.f32 %v4370_v12, %v1389_v44  ;;  %v1495_v59 = vunpack.c.l.bf16 %v4388_v42  ;;  %v1496_v51 = vunpack.c.h.bf16 %v4388_v42 }
 0x434   : > { %v1493_v54 = vunpack.c.l.bf16 %v4392_v45  ;;  %v1494_v55 = vunpack.c.h.bf16 %v4392_v45  ;;  %v1456_v56 = vadd.f32 %v4373_v18, %v1434_v46  ;;  %v1435_v57 = vmul.f32 %v4370_v12, %v1381_v47  ;;  %1548 = vxpose.xlu0.c.b16.start [1/8] %v4392_v45, 128  ;;  %3490 = vmatprep.subr.bf16.mxu0 %v4392_v45 }
 0x435   : > { %v1459_v58 = vadd.f32 %v4373_v18, %v1437_v49  ;;  %1822 = vmatmul.mubr.bf16.vlgmr.msra.gmra.mrb[16].mxu1 %v4392_v45  ;;  %3491 = vmatpush3.bf16.msra.mxu0 %v4392_v45  ;;  %v1474_v63 = vmax.f32 %v1458_v48, 0.0 }
 0x436   : > { %v1509_v60 = vadd.f32 %v1494_v55, %v1493_v54  ;;  %v1457_v61 = vadd.f32 %v4373_v18, %v1435_v57  ;;  %v3484_v62 = vpop.f32.mrb[8].mxu1  ;;  %3492 = vmatprep.subr.bf16.mxu0 %v4388_v42  ;;  %1831 = vmatprep.mubr.bf16.mxu1 %v3932_v14  ;;  %v1472_v9 = vmax.f32 %v1456_v56, 0.0 }
 0x437   : > { %v1475_v0 = vmax.f32 %v1459_v58, 0.0  ;;  %v1402_v1 = vadd.f32 %v3484_v62, %v4368_v10  ;;  %v1393_v5 = vpop.f32.mrb[9].mxu1  ;;  %2376 = vmatpush1.bf16.msra.mxu1 %v3302_v53 }
 0x438   : > { %v1510_v8 = vadd.f32 %v1509_v60, %v1495_v59  ;;  %v1473_v15 = vmax.f32 %v1457_v61, 0.0  ;;  %v1394_v17 = vadd.f32 %v4368_v10, %v1393_v5  ;;  %v3485_v19 = vpop.f32.mrb[10].mxu1  ;;  %1549 = vxpose.xlu0.c.b16.cont [2/8] %v4388_v42, 128  ;;  %2377 = vmatprep.subr.bf16.mxu1 %v3305_v52  ;;  %v2287_v60 = vld [vmem:[#allocation4 + $0x110] sm:$0xff] }
 0x439   : > { %v4417_v22 = vpack.c.bf16 %v1475_v0, %v1474_v63  ;;  %v1440_v23 = vmul.f32 %v4370_v12, %v1402_v1  ;;  %v1405_v24 = vadd.f32 %v3485_v19, %v4368_v10  ;;  %v1396_v50 = vpop.f32.mrb[11].mxu1  ;;  %3493 = vmatpush3.bf16.msra.mxu0 %v4388_v42  ;;  %v2288_v61 = vld [vmem:[#allocation4 + $0x130] sm:$0xff] }
 0x43a   : > { %v4423_v53 = vpack.c.bf16 %v1473_v15, %v1472_v9  ;;  %v1438_v25 = vmul.f32 %v4370_v12, %v1394_v17  ;;  %v1397_v26 = vadd.f32 %v4368_v10, %v1396_v50  ;;  %v1511_v33 = vadd.f32 %v1510_v8, %v1496_v51 }
 0x43b   : > { %v1462_v16 = vadd.f32 %v4373_v18, %v1440_v23  ;;  %v1441_v29 = vmul.f32 %v4370_v12, %v1405_v24  ;;  %2378 = vmatpush1.bf16.msra.mxu1 %v3304_v7  ;;  %v1499_v41 = vunpack.c.l.bf16 %v4417_v22  ;;  %v1500_v55 = vunpack.c.h.bf16 %v4417_v22  ;;  %v2290_v23 = vld [vmem:[#allocation4 + $0x170] sm:$0xff] }
 0x43c   : > { %v1497_v32 = vunpack.c.l.bf16 %v4423_v53  ;;  %v1460_v34 = vadd.f32 %v4373_v18, %v1438_v25  ;;  %v1439_v35 = vmul.f32 %v4370_v12, %v1397_v26  ;;  %1550 = vxpose.xlu0.c.b16.cont [3/8] %v4423_v53, 128  ;;  %3494 = vmatprep.subr.bf16.mxu0 %v4423_v53  ;;  %v1498_v38 = vunpack.c.h.bf16 %v4423_v53 }
 0x43d   : > { %v1463_v36 = vadd.f32 %v4373_v18, %v1441_v29  ;;  %1832 = vmatmul.mubr.bf16.gmra.mrb[20].mxu1 %v4388_v42  ;;  %3495 = vmatpush3.bf16.msra.mxu0 %v4423_v53  ;;  %v1478_v43 = vmax.f32 %v1462_v16, 0.0  ;;  %v3308_v8 = vcombine.low %v4427_v27, %v4429_v28  ;;  %v3311_v17 = vcombine.high %v2287_v60, %v2288_v61 }
 0x43e   : > { %v1512_v39 = vadd.f32 %v1511_v33, %v1497_v32  ;;  %v1461_v11 = vadd.f32 %v4373_v18, %v1439_v35  ;;  %v3488_v40 = vpop.f32.mrb[12].mxu1  ;;  %3496 = vmatprep.subr.bf16.mxu0 %v4417_v22  ;;  %1841 = vmatprep.mubr.bf16.mxu1 %v3932_v14  ;;  %v1476_v48 = vmax.f32 %v1460_v34, 0.0  ;;  %v3310_v27 = vcombine.low %v2287_v60, %v2288_v61  ;;  %v2291_v34 = vld [vmem:[#allocation4 + $0x190] sm:$0xff] }
 0x43f   : > { %v1479_v44 = vmax.f32 %v1463_v36, 0.0  ;;  %v1418_v13 = vadd.f32 %v3488_v40, %v4368_v10  ;;  %v1409_v46 = vpop.f32.mrb[13].mxu1  ;;  %2379 = vmatprep.subr.bf16.mxu1 %v3307_v31  ;;  %v3313_v16 = vcombine.high %v2289_v21, %v2290_v23  ;;  %v2294_v40 = vld [vmem:[#allocation4 + $0x1f0] sm:$0xff] }
 0x440   : > { %v1513_v47 = vadd.f32 %v1512_v39, %v1498_v38  ;;  %v1477_v49 = vmax.f32 %v1461_v11, 0.0  ;;  %v1410_v52 = vadd.f32 %v4368_v10, %v1409_v46  ;;  %v3489_v54 = vpop.f32.mrb[14].mxu1  ;;  %1551 = vxpose.xlu0.c.b16.cont [4/8] %v4417_v22, 128  ;;  %2380 = vmatpush1.bf16.msra.mxu1 %v3306_v30  ;;  %v2293_v11 = vld [vmem:[#allocation4 + $0x1d0] sm:$0xff] }
 0x441   : > { %v4452_v56 = vpack.c.bf16 %v1479_v44, %v1478_v43  ;;  %v1444_v57 = vmul.f32 %v4370_v12, %v1418_v13  ;;  %v1421_v58 = vadd.f32 %v3489_v54, %v4368_v10  ;;  %v1412_v59 = vpop.f32.mrb[15].mxu1  ;;  %3497 = vmatpush3.bf16.msra.mxu0 %v4417_v22  ;;  %2381 = vmatprep.subr.bf16.mxu1 %v3309_v37 }
 0x442   : > { %v1514_v62 = vadd.f32 %v1513_v47, %v1499_v41  ;;  %v4457_v63 = vpack.c.bf16 %v1477_v49, %v1476_v48  ;;  %v1442_v0 = vmul.f32 %v4370_v12, %v1410_v52  ;;  %v1413_v1 = vadd.f32 %v4368_v10, %v1412_v59  ;;  %v2572_v49 = vld [vmem:[#allocation4 + $0x18] sm:$0xff] }
 0x443   : > { %v1466_v5 = vadd.f32 %v4373_v18, %v1444_v57  ;;  %v1445_v7 = vmul.f32 %v4370_v12, %v1421_v58  ;;  %v1504_v32 = vunpack.c.h.bf16 %v4452_v56  ;;  %v3312_v37 = vcombine.low %v2289_v21, %v2290_v23  ;;  %v2573_v52 = vld [vmem:[#allocation4 + $0x38] sm:$0xff] }
 0x444   : > { %v1501_v9 = vunpack.c.l.bf16 %v4457_v63  ;;  %v1515_v15 = vadd.f32 %v1514_v62, %v1500_v55  ;;  %1552 = vxpose.xlu0.c.b16.cont [5/8] %v4457_v63, 128  ;;  %3498 = vmatprep.subr.bf16.mxu0 %v4457_v63  ;;  %v1464_v19 = vadd.f32 %v4373_v18, %v1442_v0  ;;  %v1443_v10 = vmul.f32 %v4370_v12, %v1413_v1 }
 0x445   : > { %v1467_v20 = vadd.f32 %v4373_v18, %v1445_v7  ;;  %1842 = vmatmul.mubr.bf16.gmra.mrb[24].mxu1 %v4423_v53  ;;  %3499 = vmatpush3.bf16.msra.mxu0 %v4457_v63  ;;  %v1502_v24 = vunpack.c.h.bf16 %v4457_v63  ;;  %v1482_v51 = vmax.f32 %v1466_v5, 0.0  ;;  %v1503_v12 = vunpack.c.l.bf16 %v4452_v56  ;;  %v1492_v5 = vld [vmem:[#allocation7] sm:$0x1] }
 0x446   : > { %v1516_v50 = vadd.f32 %v1515_v15, %v1501_v9  ;;  %3500 = vmatprep.subr.bf16.mxu0 %v4452_v56  ;;  %1851 = vmatprep.mubr.bf16.mxu1 %v3932_v14  ;;  %v1465_v26 = vadd.f32 %v4373_v18, %v1443_v10  ;;  %v1480_v29 = vmax.f32 %v1464_v19, 0.0  ;;  %v2292_v18 = vld [vmem:[#allocation4 + $0x1b0] sm:$0xff]  ;;  %v3287_v44 = vcombine.high %v4355_v3, %v4357_v4  ;;  %v2574_v9 = vld [vmem:[#allocation4 + $0x58] sm:$0xff] }
 0x447   : > { %v1483_v25 = vmax.f32 %v1467_v20, 0.0  ;;  %2382 = vmatpush1.bf16.msra.mxu1 %v3308_v8  ;;  %v3315_v39 = vcombine.high %v2291_v34, %v2292_v18  ;;  %v3314_v13 = vcombine.low %v2291_v34, %v2292_v18  ;;  %v3317_v48 = vcombine.high %v2293_v11, %v2294_v40  ;;  %v2575_v15 = vld [vmem:[#allocation4 + $0x78] sm:$0xff] }
 0x448   : > { %v1517_v28 = vadd.f32 %v1516_v50, %v1502_v24  ;;  %1553 = vxpose.xlu0.c.b16.cont [6/8] %v4452_v56, 128  ;;  %2383 = vmatprep.subr.bf16.mxu1 %v3311_v17  ;;  %v1481_v31 = vmax.f32 %v1465_v26, 0.0  ;;  %v3316_v57 = vcombine.low %v2293_v11, %v2294_v40  ;;  %v4499_v59 = vcombine.high %v2572_v49, %v2573_v52  ;;  %v2576_v20 = vld [vmem:[#allocation4 + $0x98] sm:$0xff] }
 0x449   : > { %v4479_v30 = vpack.c.bf16 %v1483_v25, %v1482_v51  ;;  %3501 = vmatpush3.bf16.msra.mxu0 %v4452_v56  ;;  %v4510_v17 = vcombine.low %v2572_v49, %v2573_v52  ;;  %v4512_v19 = vcombine.high %v2574_v9, %v2575_v15  ;;  %v2577_v10 = vld [vmem:[#allocation4 + $0xb8] sm:$0xff]  ;;  %v4517_v21 = vcombine.low %v2574_v9, %v2575_v15  ;;  %v1998_v15 = vld [vmem:[#allocation4 + $0x188] sm:$0xff] }
 0x44a   : > { %v1518_v33 = vadd.f32 %v1517_v28, %v1503_v12  ;;  %v4483_v35 = vpack.c.bf16 %v1481_v31, %v1480_v29  ;;  %v4520_v23 = vcombine.high %v2576_v20, %v2577_v10  ;;  %v2578_v24 = vld [vmem:[#allocation4 + $0xd8] sm:$0xff]  ;;  %v4523_v51 = vcombine.low %v2576_v20, %v2577_v10  ;;  %v1999_v20 = vld [vmem:[#allocation4 + $0x1a8] sm:$0xff] }
 0x44b   : > { %2384 = vmatpush1.bf16.msra.mxu1 %v3310_v27  ;;  %v1507_v46 = vunpack.c.l.bf16 %v4479_v30  ;;  %v1508_v54 = vunpack.c.h.bf16 %v4479_v30  ;;  %v2579_v50 = vld [vmem:[#allocation4 + $0xf8] sm:$0xff] }
 0x44c   : > { %v1519_v36 = vadd.f32 %v1518_v33, %v1504_v32  ;;  %2385 = vmatprep.subr.bf16.mxu1 %v3313_v16  ;;  %v1505_v38 = vunpack.c.l.bf16 %v4483_v35  ;;  %1554 = vxpose.xlu0.c.b16.cont [7/8] %v4483_v35, 128  ;;  %v1506_v41 = vunpack.c.h.bf16 %v4483_v35  ;;  %v4526_v25 = vcombine.high %v2578_v24, %v2579_v50  ;;  %v2580_v26 = vld [vmem:[#allocation4 + $0x118] sm:$0xff] }
 0x44d   : > { %3502 = vmatprep.subr.bf16.mxu0 %v4483_v35  ;;  %1852 = vmatmul.mubr.bf16.gmra.mrb[28].mxu1 %v4417_v22  ;;  %v2581_v27 = vld [vmem:[#allocation4 + $0x138] sm:$0xff]  ;;  %v4531_v12 = vcombine.low %v2578_v24, %v2579_v50  ;;  %v3299_v24 = vcombine.high %v1998_v15, %v1999_v20 }
 0x44e   : > { %3503 = vmatpush3.bf16.msra.mxu0 %v4483_v35  ;;  %v1520_v43 = vadd.f32 %v1519_v36, %v1505_v38  ;;  %1861 = vmatprep.mubr.bf16.mxu1 %v3932_v14  ;;  %v4534_v28 = vcombine.high %v2580_v26, %v2581_v27  ;;  %v2582_v16 = vld [vmem:[#allocation4 + $0x158] sm:$0xff]  ;;  %v4537_v31 = vcombine.low %v2580_v26, %v2581_v27  ;;  %v2000_v26 = vld [vmem:[#allocation4 + $0x1c8] sm:$0xff] }
 0x44f   : > { %3504 = vmatprep.subr.bf16.mxu0 %v4479_v30  ;;  %2386 = vmatpush1.bf16.msra.mxu1 %v3312_v37  ;;  %v2583_v29 = vld [vmem:[#allocation4 + $0x178] sm:$0xff]  ;;  %v2001_v27 = vld [vmem:[#allocation4 + $0x1e8] sm:$0xff] }
 0x450   : > { %v1521_v47 = vadd.f32 %v1520_v43, %v1506_v41  ;;  %1555 = vxpose.xlu0.c.b16.end [8/8] %v4479_v30, 128  ;;  %2387 = vmatprep.subr.bf16.mxu1 %v3315_v39  ;;  %v4540_v32 = vcombine.high %v2582_v16, %v2583_v29  ;;  %v2584_v33 = vld [vmem:[#allocation4 + $0x198] sm:$0xff]  ;;  %v4545_v18 = vcombine.low %v2582_v16, %v2583_v29  ;;  %v1988_v43 = vld [vmem:[#allocation4 + $0x48] sm:$0xff] }
 0x451   : > { %v2585_v34 = vld [vmem:[#allocation4 + $0x1b8] sm:$0xff]  ;;  %v3298_v16 = vcombine.low %v1998_v15, %v1999_v20  ;;  %v3301_v29 = vcombine.high %v2000_v26, %v2001_v27 }
 0x452   : > { %3505 = vmatpush3.bf16.msra.mxu0 %v4479_v30  ;;  %v1522_v55 = vadd.f32 %v1521_v47, %v1507_v46  ;;  %v4548_v36 = vcombine.high %v2584_v33, %v2585_v34  ;;  %v2586_v37 = vld [vmem:[#allocation4 + $0x1d8] sm:$0xff]  ;;  %v4551_v39 = vcombine.low %v2584_v33, %v2585_v34  ;;  %v1990_v47 = vld [vmem:[#allocation4 + $0x88] sm:$0xff]  ;;  %v3300_v34 = vcombine.low %v2000_v26, %v2001_v27 }
 0x453   : > { %2082 = vmatprep.subr.bf16.mxu0 %v3287_v44  ;;  %2388 = vmatpush1.bf16.msra.mxu1 %v3314_v13  ;;  %v2587_v38 = vld [vmem:[#allocation4 + $0x1f8] sm:$0xff]  ;;  %v1989_v44 = vld [vmem:[#allocation4 + $0x68] sm:$0xff] }
 0x454   : > { %v1523_v58 = vadd.f32 %v1522_v55, %v1508_v54  ;;  %2389 = vmatprep.subr.bf16.mxu1 %v3317_v48  ;;  %v4554_v11 = vcombine.high %v2586_v37, %v2587_v38  ;;  %v4559_v40 = vcombine.low %v2586_v37, %v2587_v38  ;;  %v3289_v13 = vcombine.high %v1988_v43, %v1989_v44  ;;  %v1991_v48 = vld [vmem:[#allocation4 + $0xa8] sm:$0xff] }
 0x455   : > { %1862 = vmatmul.mubr.bf16.gmra.mrb[32].mxu1 %v4457_v63  ;;  %v3288_v49 = vcombine.low %v1988_v43, %v1989_v44  ;;  %v3291_v52 = vcombine.high %v1990_v47, %v1991_v48  ;;  %v1992_v55 = vld [vmem:[#allocation4 + $0xc8] sm:$0xff] }
 0x456   : > { %v1524_v60 = vrot.slane %v1523_v58, 4  ;;  %1871 = vmatprep.mubr.bf16.mxu1 %v3932_v14 }
 0x457   : > { %2390 = vmatpush1.bf16.msra.mxu1 %v3316_v57  ;;  %v1993_v57 = vld [vmem:[#allocation4 + $0xe8] sm:$0xff] }
 0x458   : > { %v1525_v61 = vadd.f32 %v1524_v60, %v1523_v58  ;;  %3522 = vmatprep.subr.bf16.mxu1 %v4499_v59  ;;  %v3290_v58 = vcombine.low %v1990_v47, %v1991_v48  ;;  %v3293_v60 = vcombine.high %v1992_v55, %v1993_v57  ;;  %v3292_v3 = vcombine.low %v1992_v55, %v1993_v57 }
 0x45a   : > { %v1526_v62 = vrot.slane %v1525_v61, 2 }
 0x45c   : > { %v1527_v0 = vadd.f32 %v1526_v62, %v1525_v61  ;;  %v1994_v62 = vld [vmem:[#allocation4 + $0x108] sm:$0xff] }
 0x45d   : > { %1872 = vmatmul.mubr.bf16.gmra.mrb[36].mxu1 %v4452_v56 }
 0x45e   : > { %v1528_v1 = vrot.slane %v1527_v0, 1  ;;  %1881 = vmatprep.mubr.bf16.mxu1 %v3932_v14 }
 0x460   : > { %v1529_v7 = vadd.f32 %v1528_v1, %v1527_v0  ;;  %v1995_v0 = vld [vmem:[#allocation4 + $0x128] sm:$0xff] }
 0x461   : > { %v3295_v4 = vcombine.high %v1994_v62, %v1995_v0  ;;  %v1996_v1 = vld [vmem:[#allocation4 + $0x148] sm:$0xff] }
 0x462   : > { %v1530_v8 = vadd.f32 %v1529_v7, %v1492_v5  ;;  %v1997_v5 = vld [vmem:[#allocation4 + $0x168] sm:$0xff]  ;;  %v3294_v7 = vcombine.low %v1994_v62, %v1995_v0 }
 0x463   : > { %v3296_v10 = vcombine.low %v1996_v1, %v1997_v5 }
 0x464   : > { %1531 = vst [vmem:[#allocation7] sm:$0x1] %v1530_v8  ;;  %v3297_v8 = vcombine.high %v1996_v1, %v1997_v5 }
 0x465   : > { %1882 = vmatmul.mubr.bf16.gmra.mrb[40].mxu1 %v4483_v35 }
 0x466   : > { %1891 = vmatprep.mubr.bf16.mxu1 %v3932_v14 }
 0x46d   : > { %1892 = vmatmul.mubr.bf16.gmra.mrb[44].mxu1 %v4479_v30 }
 0x46e   : > { %2407 = vmatprep.mubr.bf16.mxu1 %v3932_v14 }
 0x475   : > { %2408 = vmatmul.mubr.bf16.vlgmr.msra.gmra.mrb[48].mxu1 %v4392_v45 }
 0x476   : > { %2417 = vmatprep.mubr.bf16.mxu1 %v3932_v14  ;;  %3530 = vmatpush1.bf16.msra.mxu1 %v4510_v17 }
 0x477   : > { %3523 = vmatprep.subr.bf16.mxu1 %v4512_v19 }
 0x47a   : > { %3531 = vmatpush1.bf16.msra.mxu1 %v4517_v21 }
 0x47b   : > { %3524 = vmatprep.subr.bf16.mxu1 %v4520_v23 }
 0x47d   : > { %2418 = vmatmul.mubr.bf16.gmra.mrb[52].mxu1 %v4388_v42 }
 0x47e   : > { %2427 = vmatprep.mubr.bf16.mxu1 %v3932_v14  ;;  %3532 = vmatpush1.bf16.msra.mxu1 %v4523_v51 }
 0x47f   : > { %3525 = vmatprep.subr.bf16.mxu1 %v4526_v25 }
 0x482   : > { %3533 = vmatpush1.bf16.msra.mxu1 %v4531_v12 }
 0x483   : > { %3526 = vmatprep.subr.bf16.mxu1 %v4534_v28 }
 0x485   : > { %2428 = vmatmul.mubr.bf16.gmra.mrb[56].mxu1 %v4423_v53 }
 0x486   : > { %2437 = vmatprep.mubr.bf16.mxu1 %v3932_v14  ;;  %3534 = vmatpush1.bf16.msra.mxu1 %v4537_v31 }
 0x487   : > { %3527 = vmatprep.subr.bf16.mxu1 %v4540_v32 }
 0x48a   : > { %3535 = vmatpush1.bf16.msra.mxu1 %v4545_v18 }
 0x48b   : > { %3528 = vmatprep.subr.bf16.mxu1 %v4548_v36 }
 0x48d   : > { %2438 = vmatmul.mubr.bf16.gmra.mrb[60].mxu1 %v4417_v22 }
 0x48e   : > { %2447 = vmatprep.mubr.bf16.mxu1 %v3932_v14  ;;  %3536 = vmatpush1.bf16.msra.mxu1 %v4551_v39 }
 0x48f   : > { %3529 = vmatprep.subr.bf16.mxu1 %v4554_v11 }
 0x492   : > { %3537 = vmatpush1.bf16.msra.mxu1 %v4559_v40 }
 0x495   : > { %2448 = vmatmul.mubr.bf16.gmra.mrb[64].mxu1 %v4457_v63 }
 0x496   : > { %2457 = vmatprep.mubr.bf16.mxu1 %v3932_v14 }
 0x49a   : > { %v1556_v41 = vpop.trf.xlu0 }
 0x49b   : > { %3506 = vmatprep.mubr.bf16.mxu0 %v1556_v41 }
 0x49d   : > { %2458 = vmatmul.mubr.bf16.gmra.mrb[68].mxu1 %v4452_v56 }
 0x49e   : > { %v1557_v46 = vpop.trf.xlu0  ;;  %2467 = vmatprep.mubr.bf16.mxu1 %v3932_v14 }
 0x49f   : > { %3507 = vmatmul.mubr.bf16.vlgmr.msra.gmra.mrb[16].mxu0 %v1557_v46 }
 0x4a0   : > { %2083 = vmatpush1.bf16.msra.mxu0 %v3286_v6 }
 0x4a1   : > { %2084 = vmatprep.subr.bf16.mxu0 %v3289_v13 }
 0x4a2   : > { %v1558_v54 = vpop.trf.xlu0 }
 0x4a3   : > { %3510 = vmatprep.mubr.bf16.mxu0 %v1558_v54 }
 0x4a4   : > { %2085 = vmatpush1.bf16.msra.mxu0 %v3288_v49 }
 0x4a5   : > { %2468 = vmatmul.mubr.bf16.gmra.mrb[72].mxu1 %v4483_v35  ;;  %2086 = vmatprep.subr.bf16.mxu0 %v3291_v52 }
 0x4a6   : > { %v1559_v61 = vpop.trf.xlu0  ;;  %2477 = vmatprep.mubr.bf16.mxu1 %v3932_v14 }
 0x4a7   : > { %3511 = vmatmul.mubr.bf16.gmra.mrb[20].mxu0 %v1559_v61 }
 0x4a8   : > { %2087 = vmatpush1.bf16.msra.mxu0 %v3290_v58 }
 0x4a9   : > { %2088 = vmatprep.subr.bf16.mxu0 %v3293_v60 }
 0x4aa   : > { %v1560_v6 = vpop.trf.xlu0 }
 0x4ab   : > { %3514 = vmatprep.mubr.bf16.mxu0 %v1560_v6 }
 0x4ac   : > { %2089 = vmatpush1.bf16.msra.mxu0 %v3292_v3 }
 0x4ad   : > { %2478 = vmatmul.mubr.bf16.gmra.mrb[76].mxu1 %v4479_v30  ;;  %2090 = vmatprep.subr.bf16.mxu0 %v3295_v4 }
 0x4ae   : > { %v1561_v9 = vpop.trf.xlu0  ;;  %2770 = vmatprep.mubr.bf16.mxu1 %v3932_v14 }
 0x4af   : > { %3515 = vmatmul.mubr.bf16.gmra.mrb[24].mxu0 %v1561_v9 }
 0x4b0   : > { %2091 = vmatpush1.bf16.msra.mxu0 %v3294_v7 }
 0x4b1   : > { %2092 = vmatprep.subr.bf16.mxu0 %v3297_v8 }
 0x4b2   : > { %v1562_v50 = vpop.trf.xlu0 }
 0x4b3   : > { %3518 = vmatprep.mubr.bf16.mxu0 %v1562_v50 }
 0x4b4   : > { %2093 = vmatpush1.bf16.msra.mxu0 %v3296_v10 }
 0x4b5   : > { %2771 = vmatmul.mubr.bf16.vlgmr.msra.gmra.mrb[80].mxu1 %v4479_v30  ;;  %2094 = vmatprep.subr.bf16.mxu0 %v3299_v24 }
 0x4b6   : > { %v1563_v33 = vpop.trf.xlu0 }
 0x4b7   : > { %3519 = vmatmul.mubr.bf16.gmra.mrb[28].mxu0 %v1563_v33 }
 0x4b8   : > { %2095 = vmatpush1.bf16.msra.mxu0 %v3298_v16  ;;  %2114 = vmatprep.mubr.bf16.mxu0 %v3932_v14 }
 0x4b9   : > { %2096 = vmatprep.subr.bf16.mxu0 %v3301_v29 }
 0x4bc   : > { %2097 = vmatpush1.bf16.msra.mxu0 %v3300_v34 }
 0x4bd   : > { %2668 = vmatprep.subr.bf16.mxu0 %v4499_v59 }
 0x4bf   : > { %2115 = vmatmul.mubr.bf16.vlgmr.msra.gmra.mrb[32].mxu0 %v4392_v45 }
 0x4c0   : > { %2669 = vmatpush1.bf16.msra.mxu0 %v4510_v17  ;;  %2124 = vmatprep.mubr.bf16.mxu0 %v3932_v14 }
 0x4c1   : > { %2670 = vmatprep.subr.bf16.mxu0 %v4512_v19 }
 0x4c4   : > { %2671 = vmatpush1.bf16.msra.mxu0 %v4517_v21 }
 0x4c5   : > { %2672 = vmatprep.subr.bf16.mxu0 %v4520_v23 }
 0x4c7   : > { %2125 = vmatmul.mubr.bf16.gmra.mrb[36].mxu0 %v4388_v42 }
 0x4c8   : > { %2134 = vmatprep.mubr.bf16.mxu0 %v3932_v14  ;;  %2673 = vmatpush1.bf16.msra.mxu0 %v4523_v51 }
 0x4c9   : > { %2674 = vmatprep.subr.bf16.mxu0 %v4526_v25 }
 0x4cc   : > { %2675 = vmatpush1.bf16.msra.mxu0 %v4531_v12 }
 0x4cd   : > { %2676 = vmatprep.subr.bf16.mxu0 %v4534_v28 }
 0x4cf   : > { %2135 = vmatmul.mubr.bf16.gmra.mrb[40].mxu0 %v4423_v53 }
 0x4d0   : > { %2144 = vmatprep.mubr.bf16.mxu0 %v3932_v14  ;;  %2677 = vmatpush1.bf16.msra.mxu0 %v4537_v31 }
 0x4d1   : > { %2678 = vmatprep.subr.bf16.mxu0 %v4540_v32 }
 0x4d4   : > { %2679 = vmatpush1.bf16.msra.mxu0 %v4545_v18 }
 0x4d5   : > { %2680 = vmatprep.subr.bf16.mxu0 %v4548_v36 }
 0x4d7   : > { %2145 = vmatmul.mubr.bf16.gmra.mrb[44].mxu0 %v4417_v22 }
 0x4d8   : > { %2154 = vmatprep.mubr.bf16.mxu0 %v3932_v14  ;;  %2681 = vmatpush1.bf16.msra.mxu0 %v4551_v39 }
 0x4d9   : > { %2682 = vmatprep.subr.bf16.mxu0 %v4554_v11 }
 0x4dc   : > { %2683 = vmatpush1.bf16.msra.mxu0 %v4559_v40 }
 0x4df   : > { %2155 = vmatmul.mubr.bf16.gmra.mrb[48].mxu0 %v4457_v63 }
 0x4e0   : > { %2164 = vmatprep.mubr.bf16.mxu0 %v3932_v14 }
 0x4e7   : > { %2165 = vmatmul.mubr.bf16.gmra.mrb[52].mxu0 %v4452_v56 }
 0x4e8   : > { %2174 = vmatprep.mubr.bf16.mxu0 %v3932_v14 }
 0x4ef   : > { %2175 = vmatmul.mubr.bf16.gmra.mrb[56].mxu0 %v4483_v35 }
 0x4f0   : > { %2184 = vmatprep.mubr.bf16.mxu0 %v3932_v14 }
 0x4f7   : > { %2185 = vmatmul.mubr.bf16.gmra.mrb[60].mxu0 %v4479_v30 }
 0x4f8   : > { %2700 = vmatprep.mubr.bf16.mxu0 %v3932_v14 }
 0x4ff   : > { %2701 = vmatmul.mubr.bf16.vlgmr.msra.gmra.mrb[64].mxu0 %v4392_v45 }
 0x500   : > { %2710 = vmatprep.mubr.bf16.mxu0 %v3932_v14 }
 0x507   : > { %2711 = vmatmul.mubr.bf16.gmra.mrb[68].mxu0 %v4388_v42 }
 0x508   : > { %v1823_v59 = vpop.f32.mrb[16].mxu1  ;;  %2720 = vmatprep.mubr.bf16.mxu0 %v3932_v14 }
 0x509   : > { %v1825_v17 = vpop.f32.mrb[17].mxu1 }
 0x50a   : > { %v1827_v19 = vpop.f32.mrb[18].mxu1 }
 0x50b   : > { %v1829_v21 = vpop.f32.mrb[19].mxu1 }
 0x50f   : > { %2721 = vmatmul.mubr.bf16.gmra.mrb[72].mxu0 %v4423_v53 }
 0x510   : > { %v1833_v23 = vpop.f32.mrb[20].mxu1  ;;  %2730 = vmatprep.mubr.bf16.mxu0 %v3932_v14 }
 0x511   : > { %v1902_v51 = vmax.f32 %v1823_v59, %v1833_v23  ;;  %v1944_v25 = vmin.f32 %v1823_v59, %v1833_v23  ;;  %v1835_v30 = vpop.f32.mrb[21].mxu1 }
 0x512   : > { %v1923_v12 = vmax.f32 %v1825_v17, %v1835_v30  ;;  %v1965_v45 = vmin.f32 %v1825_v17, %v1835_v30  ;;  %v1837_v28 = vpop.f32.mrb[22].mxu1 }
 0x513   : > { %v1903_v31 = vmax.f32 %v1827_v19, %v1837_v28  ;;  %v1945_v32 = vmin.f32 %v1827_v19, %v1837_v28  ;;  %v1839_v18 = vpop.f32.mrb[23].mxu1 }
 0x514   : > { %v1924_v42 = vmax.f32 %v1829_v21, %v1839_v18  ;;  %v1966_v36 = vmin.f32 %v1829_v21, %v1839_v18 }
 0x517   : > { %2731 = vmatmul.mubr.bf16.gmra.mrb[76].mxu0 %v4417_v22 }
 0x518   : > { %v1843_v37 = vpop.f32.mrb[24].mxu1  ;;  %2740 = vmatprep.mubr.bf16.mxu0 %v3932_v14 }
 0x519   : > { %v1904_v38 = vmax.f32 %v1902_v51, %v1843_v37  ;;  %v1946_v39 = vmin.f32 %v1944_v25, %v1843_v37  ;;  %v1845_v11 = vpop.f32.mrb[25].mxu1 }
 0x51a   : > { %v1925_v53 = vmax.f32 %v1923_v12, %v1845_v11  ;;  %v1967_v40 = vmin.f32 %v1965_v45, %v1845_v11  ;;  %v1847_v41 = vpop.f32.mrb[26].mxu1 }
 0x51b   : > { %v1905_v43 = vmax.f32 %v1903_v31, %v1847_v41  ;;  %v1947_v44 = vmin.f32 %v1945_v32, %v1847_v41  ;;  %v1849_v13 = vpop.f32.mrb[27].mxu1 }
 0x51c   : > { %v1926_v46 = vmax.f32 %v1924_v42, %v1849_v13  ;;  %v1968_v47 = vmin.f32 %v1966_v36, %v1849_v13 }
 0x51f   : > { %2741 = vmatmul.mubr.bf16.gmra.mrb[80].mxu0 %v4457_v63 }
 0x520   : > { %v1853_v48 = vpop.f32.mrb[28].mxu1  ;;  %2750 = vmatprep.mubr.bf16.mxu0 %v3932_v14 }
 0x521   : > { %v1906_v49 = vmax.f32 %v1904_v38, %v1853_v48  ;;  %v1948_v22 = vmin.f32 %v1946_v39, %v1853_v48  ;;  %v1855_v52 = vpop.f32.mrb[29].mxu1 }
 0x522   : > { %v1927_v54 = vmax.f32 %v1925_v53, %v1855_v52  ;;  %v1969_v55 = vmin.f32 %v1967_v40, %v1855_v52  ;;  %v1857_v57 = vpop.f32.mrb[30].mxu1 }
 0x523   : > { %v1907_v58 = vmax.f32 %v1905_v43, %v1857_v57  ;;  %v1949_v60 = vmin.f32 %v1947_v44, %v1857_v57  ;;  %v1859_v61 = vpop.f32.mrb[31].mxu1 }
 0x524   : > { %v1928_v62 = vmax.f32 %v1926_v46, %v1859_v61  ;;  %v1970_v0 = vmin.f32 %v1968_v47, %v1859_v61 }
 0x527   : > { %2751 = vmatmul.mubr.bf16.gmra.mrb[84].mxu0 %v4452_v56 }
 0x528   : > { %v1863_v3 = vpop.f32.mrb[32].mxu1  ;;  %2760 = vmatprep.mubr.bf16.mxu0 %v3932_v14 }
 0x529   : > { %v1908_v63 = vmax.f32 %v1906_v49, %v1863_v3  ;;  %v1950_v4 = vmin.f32 %v1948_v22, %v1863_v3  ;;  %v1865_v6 = vpop.f32.mrb[33].mxu1 }
 0x52a   : > { %v1929_v1 = vmax.f32 %v1927_v54, %v1865_v6  ;;  %v1971_v5 = vmin.f32 %v1969_v55, %v1865_v6  ;;  %v1867_v7 = vpop.f32.mrb[34].mxu1 }
 0x52b   : > { %v1909_v8 = vmax.f32 %v1907_v58, %v1867_v7  ;;  %v1951_v9 = vmin.f32 %v1949_v60, %v1867_v7  ;;  %v1869_v15 = vpop.f32.mrb[35].mxu1 }
 0x52c   : > { %v1930_v20 = vmax.f32 %v1928_v62, %v1869_v15  ;;  %v1972_v10 = vmin.f32 %v1970_v0, %v1869_v15 }
 0x52f   : > { %2761 = vmatmul.mubr.bf16.gmra.mrb[88].mxu0 %v4483_v35 }
 0x530   : > { %v1873_v24 = vpop.f32.mrb[36].mxu1 }
 0x531   : > { %v1910_v50 = vmax.f32 %v1908_v63, %v1873_v24  ;;  %v1952_v26 = vmin.f32 %v1950_v4, %v1873_v24  ;;  %v1875_v56 = vpop.f32.mrb[37].mxu1 }
 0x532   : > { %v1931_v27 = vmax.f32 %v1929_v1, %v1875_v56  ;;  %v1973_v16 = vmin.f32 %v1971_v5, %v1875_v56  ;;  %v1877_v14 = vpop.f32.mrb[38].mxu1 }
 0x533   : > { %v1911_v29 = vmax.f32 %v1909_v8, %v1877_v14  ;;  %v1953_v33 = vmin.f32 %v1951_v9, %v1877_v14  ;;  %v1879_v34 = vpop.f32.mrb[39].mxu1 }
 0x534   : > { %v1932_v59 = vmax.f32 %v1930_v20, %v1879_v34  ;;  %v1974_v17 = vmin.f32 %v1972_v10, %v1879_v34 }
 0x538   : > { %v1883_v19 = vpop.f32.mrb[40].mxu1 }
 0x539   : > { %v1912_v21 = vmax.f32 %v1910_v50, %v1883_v19  ;;  %v1954_v23 = vmin.f32 %v1952_v26, %v1883_v19  ;;  %v1885_v51 = vpop.f32.mrb[41].mxu1 }
 0x53a   : > { %v1933_v25 = vmax.f32 %v1931_v27, %v1885_v51  ;;  %v1975_v30 = vmin.f32 %v1973_v16, %v1885_v51  ;;  %v1887_v12 = vpop.f32.mrb[42].mxu1 }
 0x53b   : > { %v1913_v35 = vmax.f32 %v1911_v29, %v1887_v12  ;;  %v1955_v45 = vmin.f32 %v1953_v33, %v1887_v12  ;;  %v1889_v28 = vpop.f32.mrb[43].mxu1 }
 0x53c   : > { %v1934_v31 = vmax.f32 %v1932_v59, %v1889_v28  ;;  %v1976_v32 = vmin.f32 %v1974_v17, %v1889_v28 }
 0x540   : > { %v1893_v18 = vpop.f32.mrb[44].mxu1 }
 0x541   : > { %v1914_v42 = vmax.f32 %v1912_v21, %v1893_v18  ;;  %v1956_v36 = vmin.f32 %v1954_v23, %v1893_v18  ;;  %v1895_v37 = vpop.f32.mrb[45].mxu1 }
 0x542   : > { %v1935_v38 = vmax.f32 %v1933_v25, %v1895_v37  ;;  %v1977_v39 = vmin.f32 %v1975_v30, %v1895_v37  ;;  %v1897_v11 = vpop.f32.mrb[46].mxu1 }
 0x543   : > { %v1915_v53 = vmax.f32 %v1913_v35, %v1897_v11  ;;  %v1957_v40 = vmin.f32 %v1955_v45, %v1897_v11  ;;  %v1899_v41 = vpop.f32.mrb[47].mxu1 }
 0x544   : > { %v1936_v43 = vmax.f32 %v1934_v31, %v1899_v41  ;;  %v1978_v44 = vmin.f32 %v1976_v32, %v1899_v41 }
 0x545   : > { %v1916_v13 = vmax.f32 %v1914_v42, %v1915_v53  ;;  %v1958_v46 = vmin.f32 %v1956_v36, %v1957_v40 }
 0x546   : > { %v1937_v47 = vmax.f32 %v1935_v38, %v1936_v43  ;;  %v1979_v48 = vmin.f32 %v1977_v39, %v1978_v44 }
 0x547   : > { %v1917_v49 = vrot.slane %v1916_v13, 4  ;;  %v1959_v22 = vrot.slane %v1958_v46, 4 }
 0x548   : > { %v1938_v52 = vrot.slane %v1937_v47, 4  ;;  %v1980_v54 = vrot.slane %v1979_v48, 4  ;;  %v2409_v55 = vpop.f32.mrb[48].mxu1 }
 0x549   : > { %v1918_v57 = vmax.f32 %v1916_v13, %v1917_v49  ;;  %v1960_v58 = vmin.f32 %v1958_v46, %v1959_v22  ;;  %v2411_v60 = vpop.f32.mrb[49].mxu1 }
 0x54a   : > { %v1939_v61 = vmax.f32 %v1937_v47, %v1938_v52  ;;  %v1981_v62 = vmin.f32 %v1979_v48, %v1980_v54  ;;  %v2413_v0 = vpop.f32.mrb[50].mxu1 }
 0x54b   : > { %v1919_v3 = vrot.slane %v1918_v57, 2  ;;  %v1961_v63 = vrot.slane %v1960_v58, 2  ;;  %v2415_v4 = vpop.f32.mrb[51].mxu1 }
 0x54c   : > { %v1940_v6 = vrot.slane %v1939_v61, 2  ;;  %v1982_v1 = vrot.slane %v1981_v62, 2 }
 0x54d   : > { %v1920_v5 = vmax.f32 %v1918_v57, %v1919_v3  ;;  %v1962_v7 = vmin.f32 %v1960_v58, %v1961_v63 }
 0x54e   : > { %v1941_v8 = vmax.f32 %v1939_v61, %v1940_v6  ;;  %v1983_v9 = vmin.f32 %v1981_v62, %v1982_v1 }
 0x54f   : > { %v1921_v15 = vrot.slane %v1920_v5, 1  ;;  %v1963_v20 = vrot.slane %v1962_v7, 1 }
 0x550   : > { %v1942_v10 = vrot.slane %v1941_v8, 1  ;;  %v1984_v24 = vrot.slane %v1983_v9, 1  ;;  %v2419_v50 = vpop.f32.mrb[52].mxu1 }
 0x551   : > { %v4621_v26 = vmax.f32 %v1920_v5, %v1921_v15  ;;  %v4623_v56 = vmin.f32 %v1962_v7, %v1963_v20  ;;  %v2488_v27 = vmax.f32 %v2409_v55, %v2419_v50  ;;  %v2530_v16 = vmin.f32 %v2409_v55, %v2419_v50  ;;  %v2421_v14 = vpop.f32.mrb[53].mxu1  ;;  %v1534_v5 = vld [vmem:[#allocation8 + $0x10] sm:$0xff]  ;;  %v1532_v15 = vld [vmem:[#allocation8] sm:$0xff] }
 0x552   : > { %v4625_v29 = vmax.f32 %v1941_v8, %v1942_v10  ;;  %v4627_v33 = vmin.f32 %v1983_v9, %v1984_v24  ;;  %v2509_v34 = vmax.f32 %v2411_v60, %v2421_v14  ;;  %v2551_v59 = vmin.f32 %v2411_v60, %v2421_v14  ;;  %v2423_v17 = vpop.f32.mrb[54].mxu1 }
 0x553   : > { %v2489_v19 = vmax.f32 %v2413_v0, %v2423_v17  ;;  %v2531_v21 = vmin.f32 %v2413_v0, %v2423_v17  ;;  %v2425_v23 = vpop.f32.mrb[55].mxu1 }
 0x554   : > { %v2874_v51 = vcombine.low %v4621_v26, %v4625_v29  ;;  %v2935_v25 = vcombine.low %v4623_v56, %v4627_v33  ;;  %v2510_v30 = vmax.f32 %v2415_v4, %v2425_v23  ;;  %v2552_v12 = vmin.f32 %v2415_v4, %v2425_v23 }
 0x558   : > { %v2429_v35 = vpop.f32.mrb[56].mxu1 }
 0x559   : > { %v2490_v45 = vmax.f32 %v2488_v27, %v2429_v35  ;;  %v2532_v28 = vmin.f32 %v2530_v16, %v2429_v35  ;;  %v2431_v31 = vpop.f32.mrb[57].mxu1  ;;  %v1535_v27 = vld [vmem:[#allocation8 + $0x18] sm:$0xff] }
 0x55a   : > { %v2511_v32 = vmax.f32 %v2509_v34, %v2431_v31  ;;  %v2553_v18 = vmin.f32 %v2551_v59, %v2431_v31  ;;  %v2433_v42 = vpop.f32.mrb[58].mxu1 }
 0x55b   : > { %v2491_v36 = vmax.f32 %v2489_v19, %v2433_v42  ;;  %v2533_v37 = vmin.f32 %v2531_v21, %v2433_v42  ;;  %v2435_v38 = vpop.f32.mrb[59].mxu1  ;;  %v1533_v19 = vld [vmem:[#allocation8 + $0x8] sm:$0xff] }
 0x55c   : > { %v2512_v39 = vmax.f32 %v2510_v30, %v2435_v38  ;;  %v2554_v11 = vmin.f32 %v2552_v12, %v2435_v38 }
 0x560   : > { %v2439_v53 = vpop.f32.mrb[60].mxu1 }
 0x561   : > { %v2492_v40 = vmax.f32 %v2490_v45, %v2439_v53  ;;  %v2534_v41 = vmin.f32 %v2532_v28, %v2439_v53  ;;  %v2441_v43 = vpop.f32.mrb[61].mxu1 }
 0x562   : > { %v2513_v44 = vmax.f32 %v2511_v32, %v2441_v43  ;;  %v2555_v13 = vmin.f32 %v2553_v18, %v2441_v43  ;;  %v2443_v46 = vpop.f32.mrb[62].mxu1  ;;  %v1538_v32 = vld [vmem:[#allocation8 + $0x30] sm:$0xff] }
 0x563   : > { %v2493_v47 = vmax.f32 %v2491_v36, %v2443_v46  ;;  %v2535_v48 = vmin.f32 %v2533_v37, %v2443_v46  ;;  %v2445_v49 = vpop.f32.mrb[63].mxu1  ;;  %v1536_v37 = vld [vmem:[#allocation8 + $0x20] sm:$0xff] }
 0x564   : > { %v2514_v22 = vmax.f32 %v2512_v39, %v2445_v49  ;;  %v2556_v52 = vmin.f32 %v2554_v11, %v2445_v49 }
 0x568   : > { %v2449_v54 = vpop.f32.mrb[64].mxu1 }
 0x569   : > { %v2494_v55 = vmax.f32 %v2492_v40, %v2449_v54  ;;  %v2536_v57 = vmin.f32 %v2534_v41, %v2449_v54  ;;  %v2451_v58 = vpop.f32.mrb[65].mxu1  ;;  %v1539_v40 = vld [vmem:[#allocation8 + $0x38] sm:$0xff] }
 0x56a   : > { %v2515_v60 = vmax.f32 %v2513_v44, %v2451_v58  ;;  %v2557_v61 = vmin.f32 %v2555_v13, %v2451_v58  ;;  %v2453_v62 = vpop.f32.mrb[66].mxu1 }
 0x56b   : > { %v2495_v0 = vmax.f32 %v2493_v47, %v2453_v62  ;;  %v2537_v3 = vmin.f32 %v2535_v48, %v2453_v62  ;;  %v2455_v63 = vpop.f32.mrb[67].mxu1  ;;  %v1537_v47 = vld [vmem:[#allocation8 + $0x28] sm:$0xff] }
 0x56c   : > { %v2516_v4 = vmax.f32 %v2514_v22, %v2455_v63  ;;  %v2558_v6 = vmin.f32 %v2556_v52, %v2455_v63 }
 0x570   : > { %v2459_v1 = vpop.f32.mrb[68].mxu1 }
 0x571   : > { %v2496_v7 = vmax.f32 %v2494_v55, %v2459_v1  ;;  %v2538_v8 = vmin.f32 %v2536_v57, %v2459_v1  ;;  %v2461_v9 = vpop.f32.mrb[69].mxu1 }
 0x572   : > { %v2517_v20 = vmax.f32 %v2515_v60, %v2461_v9  ;;  %v2559_v10 = vmin.f32 %v2557_v61, %v2461_v9  ;;  %v2463_v24 = vpop.f32.mrb[70].mxu1  ;;  %v3508_v50 = vpop.f32.mrb[16].mxu0  ;;  %v1542_v60 = vld [vmem:[#allocation8 + $0x50] sm:$0xff] }
 0x573   : > { %v2497_v16 = vmax.f32 %v2495_v0, %v2463_v24  ;;  %v2539_v14 = vmin.f32 %v2537_v3, %v2463_v24  ;;  %v1663_v34 = vadd.f32 %v3508_v50, %v1534_v5  ;;  %v2465_v59 = vpop.f32.mrb[71].mxu1  ;;  %v1598_v17 = vpop.f32.mrb[17].mxu0  ;;  %v1540_v3 = vld [vmem:[#allocation8 + $0x40] sm:$0xff]  ;;  %v1543_v5 = vld [vmem:[#allocation8 + $0x58] sm:$0xff] }
 0x574   : > { %v2518_v21 = vmax.f32 %v2516_v4, %v2465_v59  ;;  %v2560_v23 = vmin.f32 %v2558_v6, %v2465_v59  ;;  %v1661_v30 = vadd.f32 %v1598_v17, %v1532_v15  ;;  %v3509_v12 = vpop.f32.mrb[18].mxu0 }
 0x575   : > { %1679 = vst [vmem:[#allocation8 + $0x10] sm:$0xff] %v1663_v34  ;;  %v1664_v35 = vadd.f32 %v3509_v12, %v1535_v27  ;;  %v1601_v45 = vpop.f32.mrb[19].mxu0 }
 0x576   : > { %1677 = vst [vmem:[#allocation8] sm:$0xff] %v1661_v30  ;;  %v1662_v28 = vadd.f32 %v1601_v45, %v1533_v19 }
 0x577   : > { %1680 = vst [vmem:[#allocation8 + $0x18] sm:$0xff] %v1664_v35 }
 0x578   : > { %1678 = vst [vmem:[#allocation8 + $0x8] sm:$0xff] %v1662_v28  ;;  %v2469_v31 = vpop.f32.mrb[72].mxu1 }
 0x579   : > { %v2498_v18 = vmax.f32 %v2496_v7, %v2469_v31  ;;  %v2540_v42 = vmin.f32 %v2538_v8, %v2469_v31  ;;  %v2471_v36 = vpop.f32.mrb[73].mxu1  ;;  %v1546_v31 = vld [vmem:[#allocation8 + $0x70] sm:$0xff] }
 0x57a   : > { %v2519_v38 = vmax.f32 %v2517_v20, %v2471_v36  ;;  %v2561_v39 = vmin.f32 %v2559_v10, %v2471_v36  ;;  %v2473_v11 = vpop.f32.mrb[74].mxu1  ;;  %v3512_v53 = vpop.f32.mrb[20].mxu0  ;;  %v1541_v10 = vld [vmem:[#allocation8 + $0x48] sm:$0xff]  ;;  %v1544_v36 = vld [vmem:[#allocation8 + $0x60] sm:$0xff] }
 0x57b   : > { %v2499_v41 = vmax.f32 %v2497_v16, %v2473_v11  ;;  %v2541_v43 = vmin.f32 %v2539_v14, %v2473_v11  ;;  %v1667_v44 = vadd.f32 %v3512_v53, %v1538_v32  ;;  %v2475_v13 = vpop.f32.mrb[75].mxu1  ;;  %v1614_v46 = vpop.f32.mrb[21].mxu0  ;;  %v1547_v53 = vld [vmem:[#allocation8 + $0x78] sm:$0xff] }
 0x57c   : > { %v2520_v48 = vmax.f32 %v2518_v21, %v2475_v13  ;;  %v2562_v49 = vmin.f32 %v2560_v23, %v2475_v13  ;;  %v1665_v22 = vadd.f32 %v1614_v46, %v1536_v37  ;;  %v3513_v52 = vpop.f32.mrb[22].mxu0  ;;  %v1545_v46 = vld [vmem:[#allocation8 + $0x68] sm:$0xff] }
 0x57d   : > { %1683 = vst [vmem:[#allocation8 + $0x30] sm:$0xff] %v1667_v44  ;;  %v1668_v54 = vadd.f32 %v3513_v52, %v1539_v40  ;;  %v1617_v55 = vpop.f32.mrb[23].mxu0 }
 0x57e   : > { %1681 = vst [vmem:[#allocation8 + $0x20] sm:$0xff] %v1665_v22  ;;  %v1666_v57 = vadd.f32 %v1617_v55, %v1537_v47 }
 0x57f   : > { %1684 = vst [vmem:[#allocation8 + $0x38] sm:$0xff] %v1668_v54 }
 0x580   : > { %1682 = vst [vmem:[#allocation8 + $0x28] sm:$0xff] %v1666_v57  ;;  %v2479_v58 = vpop.f32.mrb[76].mxu1 }
 0x581   : > { %v2500_v61 = vmax.f32 %v2498_v18, %v2479_v58  ;;  %v2542_v62 = vmin.f32 %v2540_v42, %v2479_v58  ;;  %v2481_v0 = vpop.f32.mrb[77].mxu1 }
 0x582   : > { %v2521_v63 = vmax.f32 %v2519_v38, %v2481_v0  ;;  %v2563_v4 = vmin.f32 %v2561_v39, %v2481_v0  ;;  %v2483_v6 = vpop.f32.mrb[78].mxu1  ;;  %v3516_v1 = vpop.f32.mrb[24].mxu0 }
 0x583   : > { %v2501_v7 = vmax.f32 %v2499_v41, %v2483_v6  ;;  %v2543_v8 = vmin.f32 %v2541_v43, %v2483_v6  ;;  %v1671_v9 = vadd.f32 %v3516_v1, %v1542_v60  ;;  %v2485_v15 = vpop.f32.mrb[79].mxu1  ;;  %v1630_v20 = vpop.f32.mrb[25].mxu0 }
 0x584   : > { %v2522_v24 = vmax.f32 %v2520_v48, %v2485_v15  ;;  %v2564_v50 = vmin.f32 %v2562_v49, %v2485_v15  ;;  %v1669_v27 = vadd.f32 %v1630_v20, %v1540_v3  ;;  %v3517_v16 = vpop.f32.mrb[26].mxu0 }
 0x585   : > { %v2502_v14 = vmax.f32 %v2500_v61, %v2501_v7  ;;  %v2544_v34 = vmin.f32 %v2542_v62, %v2543_v8  ;;  %1687 = vst [vmem:[#allocation8 + $0x50] sm:$0xff] %v1671_v9  ;;  %v1672_v59 = vadd.f32 %v3517_v16, %v1543_v5  ;;  %v1633_v17 = vpop.f32.mrb[27].mxu0 }
 0x586   : > { %v2523_v19 = vmax.f32 %v2521_v63, %v2522_v24  ;;  %v2565_v21 = vmin.f32 %v2563_v4, %v2564_v50  ;;  %1685 = vst [vmem:[#allocation8 + $0x40] sm:$0xff] %v1669_v27  ;;  %v1670_v23 = vadd.f32 %v1633_v17, %v1541_v10 }
 0x587   : > { %v2503_v30 = vrot.slane %v2502_v14, 4  ;;  %v2545_v12 = vrot.slane %v2544_v34, 4  ;;  %1688 = vst [vmem:[#allocation8 + $0x58] sm:$0xff] %v1672_v59 }
 0x588   : > { %v2524_v35 = vrot.slane %v2523_v19, 4  ;;  %v2566_v45 = vrot.slane %v2565_v21, 4  ;;  %1686 = vst [vmem:[#allocation8 + $0x48] sm:$0xff] %v1670_v23  ;;  %v4633_v28 = vpop.f32.mrb[80].mxu1 }
 0x589   : > { %v2504_v32 = vmax.f32 %v2502_v14, %v2503_v30  ;;  %v2546_v18 = vmin.f32 %v2544_v34, %v2545_v12  ;;  %v4635_v42 = vpop.f32.mrb[81].mxu1 }
 0x58a   : > { %v2525_v37 = vmax.f32 %v2523_v19, %v2524_v35  ;;  %v2567_v38 = vmin.f32 %v2565_v21, %v2566_v45  ;;  %v4637_v39 = vpop.f32.mrb[82].mxu1  ;;  %v3520_v11 = vpop.f32.mrb[28].mxu0 }
 0x58b   : > { %v2505_v40 = vrot.slane %v2504_v32, 2  ;;  %v2547_v41 = vrot.slane %v2546_v18, 2  ;;  %v1675_v43 = vadd.f32 %v3520_v11, %v1546_v31  ;;  %v4639_v44 = vpop.f32.mrb[83].mxu1  ;;  %v1646_v13 = vpop.f32.mrb[29].mxu0 }
 0x58c   : > { %v2526_v47 = vrot.slane %v2525_v37, 2  ;;  %v2568_v48 = vrot.slane %v2567_v38, 2  ;;  %v1673_v49 = vadd.f32 %v1646_v13, %v1544_v36  ;;  %v3521_v22 = vpop.f32.mrb[30].mxu0 }
 0x58d   : > { %v2506_v52 = vmax.f32 %v2504_v32, %v2505_v40  ;;  %v2548_v54 = vmin.f32 %v2546_v18, %v2547_v41  ;;  %1691 = vst [vmem:[#allocation8 + $0x70] sm:$0xff] %v1675_v43  ;;  %v1676_v55 = vadd.f32 %v3521_v22, %v1547_v53  ;;  %v1649_v57 = vpop.f32.mrb[31].mxu0 }
 0x58e   : > { %v2527_v58 = vmax.f32 %v2525_v37, %v2526_v47  ;;  %v2569_v60 = vmin.f32 %v2567_v38, %v2568_v48  ;;  %1689 = vst [vmem:[#allocation8 + $0x60] sm:$0xff] %v1673_v49  ;;  %v1674_v61 = vadd.f32 %v1649_v57, %v1545_v46 }
 0x58f   : > { %v2507_v62 = vrot.slane %v2506_v52, 1  ;;  %v2549_v0 = vrot.slane %v2548_v54, 1  ;;  %1692 = vst [vmem:[#allocation8 + $0x78] sm:$0xff] %v1676_v55 }
 0x590   : > { %v2528_v3 = vrot.slane %v2527_v58, 1  ;;  %v2570_v63 = vrot.slane %v2569_v60, 1  ;;  %1690 = vst [vmem:[#allocation8 + $0x68] sm:$0xff] %v1674_v61 }
 0x591   : > { %v4641_v4 = vmax.f32 %v2506_v52, %v2507_v62  ;;  %v4643_v6 = vmin.f32 %v2548_v54, %v2549_v0 }
 0x592   : > { %v4645_v1 = vmax.f32 %v2527_v58, %v2528_v3  ;;  %v4647_v5 = vmin.f32 %v2569_v60, %v2570_v63  ;;  %v2116_v7 = vpop.f32.mrb[32].mxu0 }
 0x593   : > { %v2118_v8 = vpop.f32.mrb[33].mxu0 }
 0x594   : > { %v2876_v9 = vcombine.low %v4641_v4, %v4645_v1  ;;  %v2937_v15 = vcombine.low %v4643_v6, %v4647_v5  ;;  %v2120_v20 = vpop.f32.mrb[34].mxu0  ;;  %v2865_v5 = vld [vmem:[%s4147_s18] sm:$0xff] }
 0x595   : > { %v2122_v10 = vpop.f32.mrb[35].mxu0 }
 0x59a   : > { %v2126_v24 = vpop.f32.mrb[36].mxu0 }
 0x59b   : > { %v2195_v50 = vmax.f32 %v2116_v7, %v2126_v24  ;;  %v2237_v27 = vmin.f32 %v2116_v7, %v2126_v24  ;;  %v2128_v16 = vpop.f32.mrb[37].mxu0 }
 0x59c   : > { %v2216_v14 = vmax.f32 %v2118_v8, %v2128_v16  ;;  %v2258_v34 = vmin.f32 %v2118_v8, %v2128_v16  ;;  %v2130_v59 = vpop.f32.mrb[38].mxu0 }
 0x59d   : > { %v2196_v17 = vmax.f32 %v2120_v20, %v2130_v59  ;;  %v2238_v19 = vmin.f32 %v2120_v20, %v2130_v59  ;;  %v2132_v21 = vpop.f32.mrb[39].mxu0 }
 0x59e   : > { %v2217_v23 = vmax.f32 %v2122_v10, %v2132_v21  ;;  %v2259_v30 = vmin.f32 %v2122_v10, %v2132_v21 }
 0x5a2   : > { %v2136_v12 = vpop.f32.mrb[40].mxu0 }
 0x5a3   : > { %v2197_v35 = vmax.f32 %v2195_v50, %v2136_v12  ;;  %v2239_v45 = vmin.f32 %v2237_v27, %v2136_v12  ;;  %v2138_v31 = vpop.f32.mrb[41].mxu0 }
 0x5a4   : > { %v2218_v32 = vmax.f32 %v2216_v14, %v2138_v31  ;;  %v2260_v18 = vmin.f32 %v2258_v34, %v2138_v31  ;;  %v2140_v36 = vpop.f32.mrb[42].mxu0 }
 0x5a5   : > { %v2198_v37 = vmax.f32 %v2196_v17, %v2140_v36  ;;  %v2240_v38 = vmin.f32 %v2238_v19, %v2140_v36  ;;  %v2142_v11 = vpop.f32.mrb[43].mxu0 }
 0x5a6   : > { %v2219_v53 = vmax.f32 %v2217_v23, %v2142_v11  ;;  %v2261_v40 = vmin.f32 %v2259_v30, %v2142_v11 }
 0x5aa   : > { %v2146_v41 = vpop.f32.mrb[44].mxu0 }
 0x5ab   : > { %v2199_v43 = vmax.f32 %v2197_v35, %v2146_v41  ;;  %v2241_v13 = vmin.f32 %v2239_v45, %v2146_v41  ;;  %v2148_v46 = vpop.f32.mrb[45].mxu0 }
 0x5ac   : > { %v2220_v47 = vmax.f32 %v2218_v32, %v2148_v46  ;;  %v2262_v48 = vmin.f32 %v2260_v18, %v2148_v46  ;;  %v2150_v49 = vpop.f32.mrb[46].mxu0 }
 0x5ad   : > { %v2200_v22 = vmax.f32 %v2198_v37, %v2150_v49  ;;  %v2242_v52 = vmin.f32 %v2240_v38, %v2150_v49  ;;  %v2152_v54 = vpop.f32.mrb[47].mxu0 }
 0x5ae   : > { %v2221_v55 = vmax.f32 %v2219_v53, %v2152_v54  ;;  %v2263_v57 = vmin.f32 %v2261_v40, %v2152_v54 }
 0x5b2   : > { %v2156_v58 = vpop.f32.mrb[48].mxu0 }
 0x5b3   : > { %v2201_v60 = vmax.f32 %v2199_v43, %v2156_v58  ;;  %v2243_v61 = vmin.f32 %v2241_v13, %v2156_v58  ;;  %v2158_v62 = vpop.f32.mrb[49].mxu0 }
 0x5b4   : > { %v2222_v0 = vmax.f32 %v2220_v47, %v2158_v62  ;;  %v2264_v3 = vmin.f32 %v2262_v48, %v2158_v62  ;;  %v2160_v63 = vpop.f32.mrb[50].mxu0 }
 0x5b5   : > { %v2202_v7 = vmax.f32 %v2200_v22, %v2160_v63  ;;  %v2244_v8 = vmin.f32 %v2242_v52, %v2160_v63  ;;  %v2162_v20 = vpop.f32.mrb[51].mxu0 }
 0x5b6   : > { %v2223_v10 = vmax.f32 %v2221_v55, %v2162_v20  ;;  %v2265_v24 = vmin.f32 %v2263_v57, %v2162_v20 }
 0x5ba   : > { %v2166_v50 = vpop.f32.mrb[52].mxu0 }
 0x5bb   : > { %v2203_v27 = vmax.f32 %v2201_v60, %v2166_v50  ;;  %v2245_v16 = vmin.f32 %v2243_v61, %v2166_v50  ;;  %v2168_v14 = vpop.f32.mrb[53].mxu0 }
 0x5bc   : > { %v2224_v34 = vmax.f32 %v2222_v0, %v2168_v14  ;;  %v2266_v59 = vmin.f32 %v2264_v3, %v2168_v14  ;;  %v2170_v17 = vpop.f32.mrb[54].mxu0 }
 0x5bd   : > { %v2204_v19 = vmax.f32 %v2202_v7, %v2170_v17  ;;  %v2246_v21 = vmin.f32 %v2244_v8, %v2170_v17  ;;  %v2172_v23 = vpop.f32.mrb[55].mxu0  ;;  %v3933_v7 = vmov 1966171168  }
 0x5be   : > { %v2225_v30 = vmax.f32 %v2223_v10, %v2172_v23  ;;  %v2267_v12 = vmin.f32 %v2265_v24, %v2172_v23  ;;  %v2879_v8 = vunpack.c.l.s4 %v3933_v7 }
 0x5c0   : > { %v2880_v23 = vunpack.c.0.s8 %v2879_v8 }
 0x5c2   : > { %v2176_v35 = vpop.f32.mrb[56].mxu0 }
 0x5c3   : > { %v2205_v45 = vmax.f32 %v2203_v27, %v2176_v35  ;;  %v2247_v31 = vmin.f32 %v2245_v16, %v2176_v35  ;;  %v2178_v32 = vpop.f32.mrb[57].mxu0 }
 0x5c4   : > { %v2226_v18 = vmax.f32 %v2224_v34, %v2178_v32  ;;  %v2268_v36 = vmin.f32 %v2266_v59, %v2178_v32  ;;  %v2180_v37 = vpop.f32.mrb[58].mxu0 }
 0x5c5   : > { %v2206_v38 = vmax.f32 %v2204_v19, %v2180_v37  ;;  %v2248_v11 = vmin.f32 %v2246_v21, %v2180_v37  ;;  %v2182_v53 = vpop.f32.mrb[59].mxu0  ;;  %v4654_v37 = vsub.s32 %v2880_v23, %v4353_v2 }
 0x5c6   : > { %v2227_v40 = vmax.f32 %v2225_v30, %v2182_v53  ;;  %v2269_v41 = vmin.f32 %v2267_v12, %v2182_v53 }
 0x5ca   : > { %v2186_v43 = vpop.f32.mrb[60].mxu0 }
 0x5cb   : > { %v2207_v13 = vmax.f32 %v2205_v45, %v2186_v43  ;;  %v2249_v46 = vmin.f32 %v2247_v31, %v2186_v43  ;;  %v2188_v47 = vpop.f32.mrb[61].mxu0 }
 0x5cc   : > { %v2228_v48 = vmax.f32 %v2226_v18, %v2188_v47  ;;  %v2270_v49 = vmin.f32 %v2268_v36, %v2188_v47  ;;  %v2190_v22 = vpop.f32.mrb[62].mxu0 }
 0x5cd   : > { %v2208_v52 = vmax.f32 %v2206_v38, %v2190_v22  ;;  %v2250_v54 = vmin.f32 %v2248_v11, %v2190_v22  ;;  %v2192_v55 = vpop.f32.mrb[63].mxu0 }
 0x5ce   : > { %v2229_v57 = vmax.f32 %v2227_v40, %v2192_v55  ;;  %v2271_v58 = vmin.f32 %v2269_v41, %v2192_v55 }
 0x5cf   : > { %v2209_v60 = vmax.f32 %v2207_v13, %v2208_v52  ;;  %v2251_v61 = vmin.f32 %v2249_v46, %v2250_v54 }
 0x5d0   : > { %v2230_v62 = vmax.f32 %v2228_v48, %v2229_v57  ;;  %v2272_v0 = vmin.f32 %v2270_v49, %v2271_v58 }
 0x5d1   : > { %v2210_v3 = vrot.slane %v2209_v60, 4  ;;  %v2252_v63 = vrot.slane %v2251_v61, 4 }
 0x5d2   : > { %v2231_v20 = vrot.slane %v2230_v62, 4  ;;  %v2273_v10 = vrot.slane %v2272_v0, 4  ;;  %v2702_v24 = vpop.f32.mrb[64].mxu0 }
 0x5d3   : > { %v2211_v50 = vmax.f32 %v2209_v60, %v2210_v3  ;;  %v2253_v27 = vmin.f32 %v2251_v61, %v2252_v63  ;;  %v2704_v16 = vpop.f32.mrb[65].mxu0 }
 0x5d4   : > { %v2232_v14 = vmax.f32 %v2230_v62, %v2231_v20  ;;  %v2274_v34 = vmin.f32 %v2272_v0, %v2273_v10  ;;  %v2706_v59 = vpop.f32.mrb[66].mxu0  ;;  %v4660_v62 = vrot.slane %v2874_v51, %v4654_v37  ;;  %v4666_v0 = vrot.slane %v2935_v25, %v4654_v37 }
 0x5d5   : > { %v2212_v17 = vrot.slane %v2211_v50, 2  ;;  %v2254_v19 = vrot.slane %v2253_v27, 2  ;;  %v2708_v21 = vpop.f32.mrb[67].mxu0 }
 0x5d6   : > { %v2233_v30 = vrot.slane %v2232_v14, 2  ;;  %v2275_v12 = vrot.slane %v2274_v34, 2 }
 0x5d7   : > { %v2213_v35 = vmax.f32 %v2211_v50, %v2212_v17  ;;  %v2255_v45 = vmin.f32 %v2253_v27, %v2254_v19 }
 0x5d8   : > { %v2234_v31 = vmax.f32 %v2232_v14, %v2233_v30  ;;  %v2276_v32 = vmin.f32 %v2274_v34, %v2275_v12 }
 0x5d9   : > { %v2214_v18 = vrot.slane %v2213_v35, 1  ;;  %v2256_v36 = vrot.slane %v2255_v45, 1 }
 0x5da   : > { %v2235_v38 = vrot.slane %v2234_v31, 1  ;;  %v2277_v11 = vrot.slane %v2276_v32, 1  ;;  %v2712_v53 = vpop.f32.mrb[68].mxu0 }
 0x5db   : > { %v2215_v40 = vmax.f32 %v2213_v35, %v2214_v18  ;;  %v2257_v41 = vmin.f32 %v2255_v45, %v2256_v36  ;;  %v2781_v43 = vmax.f32 %v2702_v24, %v2712_v53  ;;  %v2823_v13 = vmin.f32 %v2702_v24, %v2712_v53  ;;  %v2714_v46 = vpop.f32.mrb[69].mxu0 }
 0x5dc   : > { %v2236_v47 = vmax.f32 %v2234_v31, %v2235_v38  ;;  %v2278_v48 = vmin.f32 %v2276_v32, %v2277_v11  ;;  %v2802_v49 = vmax.f32 %v2704_v16, %v2714_v46  ;;  %v2844_v22 = vmin.f32 %v2704_v16, %v2714_v46  ;;  %v2716_v52 = vpop.f32.mrb[70].mxu0 }
 0x5dd   : > { %v2782_v54 = vmax.f32 %v2706_v59, %v2716_v52  ;;  %v2824_v55 = vmin.f32 %v2706_v59, %v2716_v52  ;;  %v2718_v57 = vpop.f32.mrb[71].mxu0 }
 0x5de   : > { %v2875_v58 = vcombine.low %v2215_v40, %v2236_v47  ;;  %v2936_v60 = vcombine.low %v2257_v41, %v2278_v48  ;;  %v2803_v2 = vmax.f32 %v2708_v21, %v2718_v57  ;;  %v2845_v61 = vmin.f32 %v2708_v21, %v2718_v57 }
 0x5e0   : > { %v4669_v3 = vrot.slane %v2875_v58, %v4654_v37  ;;  %v4672_v63 = vrot.slane %v2936_v60, %v4654_v37 }
 0x5e2   : > { %v2906_v7 = vcombine.low %v4660_v62, %v4669_v3  ;;  %v2967_v26 = vcombine.low %v4666_v0, %v4672_v63  ;;  %v2722_v29 = vpop.f32.mrb[72].mxu0 }
 0x5e3   : > { %v2783_v51 = vmax.f32 %v2781_v43, %v2722_v29  ;;  %v2825_v8 = vmin.f32 %v2823_v13, %v2722_v29  ;;  %v2724_v20 = vpop.f32.mrb[73].mxu0 }
 0x5e4   : > { %v2804_v10 = vmax.f32 %v2802_v49, %v2724_v20  ;;  %v2846_v56 = vmin.f32 %v2844_v22, %v2724_v20  ;;  %v2726_v33 = vpop.f32.mrb[74].mxu0  ;;  %v2975_v4 = vrot.slane %v2967_v26, %v4654_v37 }
 0x5e5   : > { %v2784_v25 = vmax.f32 %v2782_v54, %v2726_v33  ;;  %v2826_v24 = vmin.f32 %v2824_v55, %v2726_v33  ;;  %v2728_v50 = vpop.f32.mrb[75].mxu0 }
 0x5e6   : > { %v2805_v27 = vmax.f32 %v2803_v2, %v2728_v50  ;;  %v2847_v16 = vmin.f32 %v2845_v61, %v2728_v50 }
 0x5ea   : > { %v2732_v14 = vpop.f32.mrb[76].mxu0 }
 0x5eb   : > { %v2785_v34 = vmax.f32 %v2783_v51, %v2732_v14  ;;  %v2827_v59 = vmin.f32 %v2825_v8, %v2732_v14  ;;  %v2734_v17 = vpop.f32.mrb[77].mxu0 }
 0x5ec   : > { %v2806_v19 = vmax.f32 %v2804_v10, %v2734_v17  ;;  %v2848_v21 = vmin.f32 %v2846_v56, %v2734_v17  ;;  %v2736_v23 = vpop.f32.mrb[78].mxu0 }
 0x5ed   : > { %v2786_v30 = vmax.f32 %v2784_v25, %v2736_v23  ;;  %v2828_v12 = vmin.f32 %v2826_v24, %v2736_v23  ;;  %v2738_v35 = vpop.f32.mrb[79].mxu0 }
 0x5ee   : > { %v2807_v45 = vmax.f32 %v2805_v27, %v2738_v35  ;;  %v2849_v31 = vmin.f32 %v2847_v16, %v2738_v35 }
 0x5f2   : > { %v2742_v32 = vpop.f32.mrb[80].mxu0 }
 0x5f3   : > { %v2787_v18 = vmax.f32 %v2785_v34, %v2742_v32  ;;  %v2829_v36 = vmin.f32 %v2827_v59, %v2742_v32  ;;  %v2744_v38 = vpop.f32.mrb[81].mxu0 }
 0x5f4   : > { %v2808_v11 = vmax.f32 %v2806_v19, %v2744_v38  ;;  %v2850_v53 = vmin.f32 %v2848_v21, %v2744_v38  ;;  %v2746_v40 = vpop.f32.mrb[82].mxu0 }
 0x5f5   : > { %v2788_v41 = vmax.f32 %v2786_v30, %v2746_v40  ;;  %v2830_v43 = vmin.f32 %v2828_v12, %v2746_v40  ;;  %v2748_v13 = vpop.f32.mrb[83].mxu0 }
 0x5f6   : > { %v2809_v46 = vmax.f32 %v2807_v45, %v2748_v13  ;;  %v2851_v47 = vmin.f32 %v2849_v31, %v2748_v13 }
 0x5fa   : > { %v2752_v48 = vpop.f32.mrb[84].mxu0 }
 0x5fb   : > { %v2789_v49 = vmax.f32 %v2787_v18, %v2752_v48  ;;  %v2831_v22 = vmin.f32 %v2829_v36, %v2752_v48  ;;  %v2754_v52 = vpop.f32.mrb[85].mxu0 }
 0x5fc   : > { %v2810_v54 = vmax.f32 %v2808_v11, %v2754_v52  ;;  %v2852_v55 = vmin.f32 %v2850_v53, %v2754_v52  ;;  %v2756_v57 = vpop.f32.mrb[86].mxu0 }
 0x5fd   : > { %v2790_v58 = vmax.f32 %v2788_v41, %v2756_v57  ;;  %v2832_v60 = vmin.f32 %v2830_v43, %v2756_v57  ;;  %v2758_v2 = vpop.f32.mrb[87].mxu0 }
 0x5fe   : > { %v2811_v61 = vmax.f32 %v2809_v46, %v2758_v2  ;;  %v2853_v29 = vmin.f32 %v2851_v47, %v2758_v2 }
 0x602   : > { %v2762_v51 = vpop.f32.mrb[88].mxu0 }
 0x603   : > { %v2791_v8 = vmax.f32 %v2789_v49, %v2762_v51  ;;  %v2833_v20 = vmin.f32 %v2831_v22, %v2762_v51  ;;  %v2764_v10 = vpop.f32.mrb[89].mxu0  ;;  %v2959_v51 = vrot.slane %v2937_v15, %v4654_v37 }
 0x604   : > { %v2812_v56 = vmax.f32 %v2810_v54, %v2764_v10  ;;  %v2854_v33 = vmin.f32 %v2852_v55, %v2764_v10  ;;  %v2766_v25 = vpop.f32.mrb[90].mxu0 }
 0x605   : > { %v2793_v24 = vmax.f32 %v2791_v8, %v4633_v28  ;;  %v2835_v50 = vmin.f32 %v2833_v20, %v4633_v28  ;;  %v2792_v27 = vmax.f32 %v2790_v58, %v2766_v25  ;;  %v2834_v16 = vmin.f32 %v2832_v60, %v2766_v25  ;;  %v2768_v14 = vpop.f32.mrb[91].mxu0 }
 0x606   : > { %v2814_v34 = vmax.f32 %v2812_v56, %v4635_v42  ;;  %v2856_v59 = vmin.f32 %v2854_v33, %v4635_v42  ;;  %v2813_v17 = vmax.f32 %v2811_v61, %v2768_v14  ;;  %v2855_v19 = vmin.f32 %v2853_v29, %v2768_v14 }
 0x607   : > { %v2794_v21 = vmax.f32 %v2792_v27, %v4637_v39  ;;  %v2836_v23 = vmin.f32 %v2834_v16, %v4637_v39  ;;  %v2898_v29 = vrot.slane %v2876_v9, %v4654_v37  ;;  %v2914_v33 = vrot.slane %v2906_v7, %v4654_v37  ;;  %v2926_v9 = vld [vmem:[%s4149_s17] sm:$0xff] }
 0x608   : > { %v2815_v30 = vmax.f32 %v2813_v17, %v4639_v44  ;;  %v2857_v12 = vmin.f32 %v2855_v19, %v4639_v44 }
 0x609   : > { %v2795_v35 = vmax.f32 %v2793_v24, %v2794_v21  ;;  %v2837_v45 = vmin.f32 %v2835_v50, %v2836_v23 }
 0x60a   : > { %v2816_v28 = vmax.f32 %v2814_v34, %v2815_v30  ;;  %v2858_v31 = vmin.f32 %v2856_v59, %v2857_v12 }
 0x60b   : > { %v2796_v32 = vrot.slane %v2795_v35, 4  ;;  %v2838_v18 = vrot.slane %v2837_v45, 4 }
 0x60c   : > { %v2817_v36 = vrot.slane %v2816_v28, 4  ;;  %v2859_v38 = vrot.slane %v2858_v31, 4 }
 0x60d   : > { %v2797_v11 = vmax.f32 %v2795_v35, %v2796_v32  ;;  %v2839_v42 = vmin.f32 %v2837_v45, %v2838_v18 }
 0x60e   : > { %v2818_v53 = vmax.f32 %v2816_v28, %v2817_v36  ;;  %v2860_v40 = vmin.f32 %v2858_v31, %v2859_v38 }
 0x60f   : > { %v2798_v41 = vrot.slane %v2797_v11, 2  ;;  %v2840_v43 = vrot.slane %v2839_v42, 2 }
 0x610   : > { %v2819_v13 = vrot.slane %v2818_v53, 2  ;;  %v2861_v39 = vrot.slane %v2860_v40, 2 }
 0x611   : > { %v2799_v46 = vmax.f32 %v2797_v11, %v2798_v41  ;;  %v2841_v47 = vmin.f32 %v2839_v42, %v2840_v43 }
 0x612   : > { %v2820_v48 = vmax.f32 %v2818_v53, %v2819_v13  ;;  %v2862_v44 = vmin.f32 %v2860_v40, %v2861_v39 }
 0x613   : > { %v2800_v49 = vrot.slane %v2799_v46, 1  ;;  %v2842_v22 = vrot.slane %v2841_v47, 1 }
 0x614   : > { %v2821_v52 = vrot.slane %v2820_v48, 1  ;;  %v2863_v54 = vrot.slane %v2862_v44, 1 }
 0x615   : > { %v2801_v55 = vmax.f32 %v2799_v46, %v2800_v49  ;;  %v2843_v57 = vmin.f32 %v2841_v47, %v2842_v22 }
 0x616   : > { %v2822_v58 = vmax.f32 %v2820_v48, %v2821_v52  ;;  %v2864_v60 = vmin.f32 %v2862_v44, %v2863_v54 }
 0x618   : > { %v2877_v2 = vcombine.low %v2801_v55, %v2822_v58  ;;  %v2938_v61 = vcombine.low %v2843_v57, %v2864_v60 }
 0x61a   : > { %v2905_v8 = vrot.slane %v2877_v2, %v4654_v37  ;;  %v2966_v20 = vrot.slane %v2938_v61, %v4654_v37 }
 0x61c   : > { %v2907_v10 = vcombine.low %v2898_v29, %v2905_v8  ;;  %v2968_v56 = vcombine.low %v2959_v51, %v2966_v20 }
 0x61e   : > { %v2921_v6 = vrot.slane %v2907_v10, %v4654_v37  ;;  %v2982_v1 = vrot.slane %v2968_v56, %v4654_v37 }
 0x620   : > { %v2922_v15 = vcombine.low %v2914_v33, %v2921_v6  ;;  %v2983_v25 = vcombine.low %v2975_v4, %v2982_v1 }
 0x622   : > { %v2924_v24 = vmax.f32 %v2865_v5, %v2922_v15  ;;  %v2985_v50 = vmin.f32 %v2926_v9, %v2983_v25 }
 0x624   : > { %2925 = vst [vmem:[%s4147_s18] sm:$0xff] %v2924_v24  ;;  %2986 = vst [vmem:[%s4149_s17] sm:$0xff] %v2985_v50 }
 0x625 PF: > { %s3934_s12 = smov [#allocation7]   ;;  %s2987_s28 = sand.u32 1, %s4054_s13  }
 0x626   : > { %s3004_s16 = sshll.u32 %s3934_s12, 4  ;;  %p4913_p6 = scmp.eq.s32.totalorder %s4054_s13, 7  ;;  %s3005_s16 = int_to_ptr.vmem [resolvable:$true] %s3004_s16 }
 0x627   : > { %s3721_s20 = scalar_lea.vmem %s3005_s16, 16  ;;  %s3727_s24 = scalar_lea.vmem %s3005_s16, 32 }
 0x628   : > { %p3722_p3 = scmp.ne.s32.totalorder %s3005_s16, %s3721_s20  ;;  %p3728_p5 = scmp.lt.s32.totalorder %s3005_s16, %s3005_s16 }
 0x629   : > { %p3729_p7 = scmp.lt.s32.totalorder %s3727_s24, %s3721_s20 }
 0x62a   : > { %p3723_p4 = pnand %p3722_p3, %p4913_p6 }
 0x62b   : > { %p3730_p11 = por %p3729_p7, %p3728_p5 }
 0x62c   : > { %p3724_p2 = pneg %p3723_p4 }
 0x62e   : > { %p3731_p12 = pnand %p3730_p11, %p3724_p2 }
 0x630   : > { %3734 = shalt.err (!%p3731_p12)
}
 0x631   : > { %s3735_s21 = scalar_lea.hbm %s4868_s9, 16  ;;  %p4914_p8 = pmov %p4913_p6 }
 0x632   : > { %p3736_p1 = scmp.ne.s32.totalorder %s4868_s9, %s3735_s21  ;;  %p3741_p13 = scmp.lt.u32.totalorder %s3735_s21, %s4868_s9 }
 0x634   : > { %p3737_p9 = pnand %p3736_p1, %p4914_p8 }
 0x636   : > { %p3738_p10 = pneg %p3737_p9 }
 0x638   : > { %p3743_p0 = pnand %p3741_p13, %p3738_p10 }
 0x63a   : > { %3746 = shalt.err (!%p3743_p0)
}
 0x63b   : > { %p4915_p3 = pmov %p4913_p6  ;;  %s3024_s29 = smul.u32 %s3903_s25, %s3907_s26 }
 0x63c   : > { %s3032_s15 = sshll.u32 %s4147_s18, 4  ;;  %s3935_s27 = smov [#allocation8]   ;;  %s4732_s15 = int_to_ptr.vmem [resolvable:$true] %s3032_s15 }
 0x63d   : > { %3543 = dma.vmem_to_hbm [thread:$0]  (%p4915_p3), %s3005_s16, 16, %s4868_s9, [#allocation6]  }
 0x63e   : > { %s4734_s21 = sshll.u32 %s3024_s29, 7  ;;  %s3014_s14 = sshll.u32 %s3935_s27, 4  ;;  %s4742_s14 = int_to_ptr.vmem [resolvable:$true] %s3014_s14 }
 0x63f   : > { %s4740_s20 = scalar_lea.hbm %s4870_s11, %s4734_s21  ;;  %s4744_s16 = scalar_lea.sflag [#allocation6], %s2987_s28 }
 0x640   : > { %s3747_s25 = scalar_lea.vmem %s4732_s15, 128  ;;  %p4916_p4 = scmp.ne.s32.totalorder %s4897_s19, 0 }
 0x641   : > { %p3748_p6 = scmp.ne.s32.totalorder %s4732_s15, %s3747_s25  ;;  %s3936_s26 = smov [#allocation10]  }
 0x642   : > { %s3751_s18 = sshll.u32 %s3936_s26, 4  ;;  %s3752_s18 = int_to_ptr.vmem [resolvable:$false] %s3751_s18 }
 0x643   : > { %p3749_p2 = pnand %p3748_p6, %p4916_p4  ;;  %s3753_s24 = scalar_lea.vmem %s3752_s18, 256 }
 0x644   : > { %p3754_p7 = scmp.lt.s32.totalorder %s4732_s15, %s3752_s18  ;;  %p3755_p11 = scmp.lt.s32.totalorder %s3753_s24, %s3747_s25 }
 0x645   : > { %p3750_p5 = pneg %p3749_p2 }
 0x646   : > { %p3756_p12 = por %p3755_p11, %p3754_p7 }
 0x648   : > { %p3757_p1 = pnand %p3756_p12, %p3750_p5 }
 0x64a   : > { %3760 = shalt.err (!%p3757_p1)
}
 0x64b   : > { %s3761_s28 = scalar_lea.hbm %s4740_s20, 128  ;;  %s3765_s10 = scalar_lea.hbm %s4870_s11, 256 }
 0x64c   : > { %p3762_p8 = scmp.ne.s32.totalorder %s4740_s20, %s3761_s28  ;;  %p3766_p13 = scmp.lt.u32.totalorder %s4740_s20, %s4870_s11 }
 0x64d   : > { %p3767_p0 = scmp.lt.u32.totalorder %s3765_s10, %s3761_s28  ;;  %p3769_p6 = scmp.lt.u32.totalorder %s3761_s28, %s4740_s20 }
 0x64e   : > { %p3763_p9 = pnand %p3762_p8, %p4916_p4 }
 0x64f   : > { %p3768_p3 = por %p3767_p0, %p3766_p13 }
 0x650   : > { %p3764_p10 = pneg %p3763_p9 }
 0x651   : > { %p3770_p2 = por %p3769_p6, %p3768_p3 }
 0x653   : > { %p3771_p5 = pnand %p3770_p2, %p3764_p10 }
 0x655   : > { %3774 = shalt.err (!%p3771_p5)
}
 0x656   : > { %3546 = dma.vmem_to_hbm [thread:$0]  (%p4916_p4), %s4732_s15, 128, %s4740_s20, %s4744_s16  }
 0x657   : > { %s3775_s25 = scalar_lea.vmem %s4742_s14, 2048  ;;  %p4917_p11 = scmp.eq.s32.totalorder %s4054_s13, 7 }
 0x658   : > { %p3776_p7 = scmp.ne.s32.totalorder %s4742_s14, %s3775_s25  ;;  %p3782_p8 = scmp.lt.s32.totalorder %s4742_s14, %s4742_s14 }
 0x659   : > { %p3783_p9 = scmp.lt.s32.totalorder %s3775_s25, %s3775_s25 }
 0x65a   : > { %p3777_p12 = pnand %p3776_p7, %p4917_p11 }
 0x65b   : > { %p3784_p10 = por %p3783_p9, %p3782_p8 }
 0x65c   : > { %p3778_p1 = pneg %p3777_p12 }
 0x65e   : > { %p3785_p13 = pnand %p3784_p10, %p3778_p1 }
 0x660   : > { %3788 = shalt.err (!%p3785_p13)
}
 0x661   : > { %s4918_s28 = sld [smem:[#allocation27_spill]]  ;;  %p4920_p3 = pmov %p4917_p11 }
 0x667   : > { %s4919_s10 = smov %s4918_s28  ;;  %s3789_s29 = scalar_lea.hbm %s4918_s28, 2048 }
 0x668   : > { %p3790_p0 = scmp.ne.s32.totalorder %s4919_s10, %s3789_s29  ;;  %p3795_p5 = scmp.lt.u32.totalorder %s3789_s29, %s4919_s10 }
 0x66a   : > { %p3791_p6 = pnand %p3790_p0, %p4920_p3 }
 0x66c   : > { %p3792_p2 = pneg %p3791_p6 }
 0x66e   : > { %p3797_p7 = pnand %p3795_p5, %p3792_p2 }
 0x670   : > { %3800 = shalt.err (!%p3797_p7)
}
 0x671   : > { %s3937_s26 = smov 128   ;;  %s3938_s25 = smov 8  }
 0x672   : > { %p4921_p11 = pmov %p4920_p3  ;;  %s4922_s12 = sld [smem:[#allocation28_spill]] }
 0x673   : > { %s3047_s29 = sshll.u32 %s4149_s17, 4  ;;  %s3939_s20 = smov [#allocation11]   ;;  %s3048_s29 = int_to_ptr.vmem [resolvable:$true] %s3047_s29 }
 0x674   : > { %3545 = dma.vmem_to_hbm [thread:$0]  (%p4921_p11), %s4742_s14, 2048, %s4919_s10, [#allocation9], %s3937_s26, %s3937_s26, %s3938_s25  }
 0x675   : > { %s3801_s15 = scalar_lea.vmem %s3048_s29, 128  ;;  %s3805_s1 = sshll.u32 %s3939_s20, 4  ;;  %s3806_s1 = int_to_ptr.vmem [resolvable:$false] %s3805_s1 }
 0x676   : > { %p3802_p12 = scmp.ne.s32.totalorder %s3048_s29, %s3801_s15  ;;  %s3807_s2 = scalar_lea.vmem %s3806_s1, 256 }
 0x677   : > { %p3808_p9 = scmp.lt.s32.totalorder %s3048_s29, %s3806_s1  ;;  %p3809_p10 = scmp.lt.s32.totalorder %s3807_s2, %s3801_s15 }
 0x678   : > { %s4795_s0 = scalar_lea.hbm %s4922_s12, %s4734_s21  ;;  %p3803_p1 = pnand %p3802_p12, %p4916_p4 }
 0x679   : > { %p3810_p13 = por %p3809_p10, %p3808_p9 }
 0x67a   : > { %p3804_p8 = pneg %p3803_p1 }
 0x67c   : > { %p3811_p0 = pnand %p3810_p13, %p3804_p8 }
 0x67e   : > { %3814 = shalt.err (!%p3811_p0)
}
 0x67f   : > { %s3815_s17 = scalar_lea.hbm %s4795_s0, 128  ;;  %s3819_s26 = scalar_lea.hbm %s4922_s12, 256 }
 0x680   : > { %p3816_p3 = scmp.ne.s32.totalorder %s4795_s0, %s3815_s17  ;;  %p3820_p5 = scmp.lt.u32.totalorder %s4795_s0, %s4922_s12 }
 0x681   : > { %p3821_p7 = scmp.lt.u32.totalorder %s3819_s26, %s3815_s17  ;;  %p3823_p12 = scmp.lt.u32.totalorder %s3815_s17, %s4795_s0 }
 0x682   : > { %p3817_p6 = pnand %p3816_p3, %p4916_p4 }
 0x683   : > { %p3822_p11 = por %p3821_p7, %p3820_p5 }
 0x684   : > { %p3818_p2 = pneg %p3817_p6 }
 0x685   : > { %p3824_p1 = por %p3823_p12, %p3822_p11 }
 0x687   : > { %p3825_p8 = pnand %p3824_p1, %p3818_p2 }
 0x689   : > { %3828 = shalt.err (!%p3825_p8)
}
 0x68a   : > { %3547 = dma.vmem_to_hbm [thread:$0]  (%p4916_p4), %s3048_s29, 128, %s4795_s0, %s4744_s16  }
 0x68b   : > { %p4923_p9 = scmp.eq.s32.totalorder %s4054_s13, 7 }
 0x68d   : > { %3874 = dma.done.wait (%p4923_p9), [#allocation6], 16   ;;  %p4924_p10 = pmov %p4923_p9 }
 0x68e   : > { %p4925_p13 = pmov %p4923_p9 }
 0x68f   : > { %3876 = vsyncadd (%p4924_p10), [#allocation6], 4294967280 }
 0x690   : > { %3878 = dma.done.wait (%p4925_p13), [#allocation9], 2048   ;;  %p4926_p0 = pmov %p4923_p9 }
 0x692   : > { %3880 = vsyncadd (%p4926_p0), [#allocation9], 4294965248 }
 0x693 PF: > { %s4927_s2 = sld [smem:[#allocation19_spill]]  ;;  %s4928_s18 = sld [smem:[#allocation22_spill]] }
 0x699   : > { %p3571_p3 = scmp.ge.s32.totalorder %s4927_s2, 2  ;;  %s4929_s19 = sadd.s32 4294967294, %s4927_s2  }
 0x69a   : > { %s3067_s24 = sand.u32 1, %s4929_s19   ;;  %p4930_p6 = scmp.ne.s32.totalorder %s4928_s18, 0 }
 0x69b   : > { %s3068_s0 = scalar_lea.sflag [#allocation6], %s3067_s24 }
 0x69c   : > { %p3559_p4 = pnand %p3571_p3, %p4930_p6 }
 0x69e   : > { %3882 = dma.done.wait (!%p3559_p4), %s3068_s0, 256  }
 0x69f   : > { %3884 = vsyncadd (!%p3559_p4), %s3068_s0, 4294967040  ;;  %s26_s16 = sadd.s32 1, %s4927_s2   ;;  %s4931_s24 = sld [smem:[#allocation16_spill]] }
 0x6a0   : > { %p23_p2 = scmp.ge.s32.totalorder %s26_s16, 10   ;;  %s4932_s25 = sld [smem:[#allocation17_spill]] }
 0x6a1   : > { %s4933_s26 = sld [smem:[#allocation18_spill]]  ;;  %s4934_s27 = sld [smem:[#allocation20_spill]] }
 0x6a2   : > { %s4935_s28 = sld [smem:[#allocation21_spill]]  ;;  %s4936_s29 = sld [smem:[#allocation23_spill]] }
 0x6a3   : > { %s4937_s21 = smov %s3891_s22  ;;  %s4938_s22 = smov %s3895_s23 }
 0x6a4   : > { %s4939_s23 = smov %s4105_s30  ;;  %s4940_s30 = smov %s26_s16 }
 0x6a5   :  { %25 = sbr.rel (!%p23_p2) target bundleno = 13 (0xd), region = 146 }
 0x6ac   :  { %3082 = vsyncpa [#allocation5], 1 }
 0x6ad   :  { %3084 = vsyncpa [#allocation5 + $0x1], 1 }
 0x6ae   :  { %3085 = vsyncpa [#allocation6], 1 }
 0x6af   :  { %3087 = vsyncpa [#allocation6 + $0x1], 1 }
 0x6b0   :  { %3088 = vsyncpa [#allocation9], 1 }

</bundles_post_ra>
